<compile_context>
chip_gen: v7x
topology: tpu7x:2x2x1
jax: 0.10.0
libtpu: 0.0.40
codegen_flags: <defaults>
</compile_context>

<pallas_src>
import functools
import math

import jax
import jax.numpy as jnp
from jax.experimental import pallas as pl
from jax.experimental.pallas import tpu as pltpu

F32 = jnp.float32
BF16 = jnp.bfloat16


def _gelu(x):
    # TODO(synk): torch nn.GELU() default is exact erf; tanh approximation used in-kernel.
    c = math.sqrt(2.0 / math.pi)
    return 0.5 * x * (1.0 + jnp.tanh(c * (x + 0.044715 * x * x * x)))


def _round_up(x, m):
    return ((x + m - 1) // m) * m


def _row_tiling(M, max_tile=256):
    # 256-row tiles for v6e/v7x MXU occupancy (128 would suffice on v5e); for small M
    # use one full-extent block so there is no per-call padding at these shapes.
    tile_m = min(max_tile, _round_up(M, 8))
    Mp = _round_up(M, tile_m)
    return tile_m, Mp


def _parallel(n):
    return pltpu.CompilerParams(dimension_semantics=("parallel",) * n)


# ----------------------------- Pallas kernels ------------------------------

def _ln_linear_kernel(x_ref, g_ref, b_ref, w_ref, bias_ref, o_ref, *, eps, activation):
    """y = act(LN(x) @ W + bias); W is bf16, accumulate in f32."""
    x = x_ref[...].astype(F32)
    mu = jnp.mean(x, axis=-1, keepdims=True)
    var = jnp.mean((x - mu) ** 2, axis=-1, keepdims=True)
    h = (x - mu) * jax.lax.rsqrt(var + eps)
    h = h * g_ref[...] + b_ref[...]
    y = jnp.dot(h.astype(BF16), w_ref[...], preferred_element_type=F32) + bias_ref[...]
    if activation == "gelu":
        y = _gelu(y)
    o_ref[...] = y


def pallas_ln_linear(x, g, b, w, bias, activation=None, eps=1e-5):
    M, K = x.shape
    N = w.shape[1]
    tile_m, Mp = _row_tiling(M)
    xp = x.astype(F32)
    if Mp != M:
        xp = jnp.pad(xp, ((0, Mp - M), (0, 0)))
    out = pl.pallas_call(
        functools.partial(_ln_linear_kernel, eps=eps, activation=activation),
        out_shape=jax.ShapeDtypeStruct((Mp, N), F32),
        grid=(Mp // tile_m,),
        in_specs=[
            pl.BlockSpec((tile_m, K), lambda i: (i, 0)),
            pl.BlockSpec((1, K), lambda i: (0, 0)),
            pl.BlockSpec((1, K), lambda i: (0, 0)),
            pl.BlockSpec((K, N), lambda i: (0, 0)),
            pl.BlockSpec((1, N), lambda i: (0, 0)),
        ],
        out_specs=pl.BlockSpec((tile_m, N), lambda i: (i, 0)),
        compiler_params=_parallel(1),
    )(xp, g.reshape(1, K).astype(F32), b.reshape(1, K).astype(F32),
      w.astype(BF16), bias.reshape(1, N).astype(F32))
    return out if Mp == M else out[:M]


def _linear_residual_kernel(x_ref, w_ref, bias_ref, res_ref, o_ref):
    """o = res + x @ W + bias (bf16 MXU inputs, f32 accumulate)."""
    y = jnp.dot(x_ref[...].astype(BF16), w_ref[...], preferred_element_type=F32) + bias_ref[...]
    o_ref[...] = res_ref[...].astype(F32) + y


def pallas_linear_residual(x, w, bias, res):
    M, K = x.shape
    N = w.shape[1]
    tile_m, Mp = _row_tiling(M)
    xp = x.astype(F32)
    rp = res.astype(F32)
    if Mp != M:
        xp = jnp.pad(xp, ((0, Mp - M), (0, 0)))
        rp = jnp.pad(rp, ((0, Mp - M), (0, 0)))
    out = pl.pallas_call(
        _linear_residual_kernel,
        out_shape=jax.ShapeDtypeStruct((Mp, N), F32),
        grid=(Mp // tile_m,),
        in_specs=[
            pl.BlockSpec((tile_m, K), lambda i: (i, 0)),
            pl.BlockSpec((K, N), lambda i: (0, 0)),
            pl.BlockSpec((1, N), lambda i: (0, 0)),
            pl.BlockSpec((tile_m, N), lambda i: (i, 0)),
        ],
        out_specs=pl.BlockSpec((tile_m, N), lambda i: (i, 0)),
        compiler_params=_parallel(1),
    )(xp, w.astype(BF16), bias.reshape(1, N).astype(F32), rp)
    return out if Mp == M else out[:M]


def _ln_mlp_residual_kernel(x_ref, g_ref, b_ref, w1_ref, b1_ref, w2_ref, b2_ref, o_ref, *, eps):
    """o = x + fc2(gelu(fc1(LN(x)))) — whole MLP fused, bf16 MXU, f32 math."""
    x = x_ref[...].astype(F32)
    mu = jnp.mean(x, axis=-1, keepdims=True)
    var = jnp.mean((x - mu) ** 2, axis=-1, keepdims=True)
    h = (x - mu) * jax.lax.rsqrt(var + eps)
    h = h * g_ref[...] + b_ref[...]
    h = jnp.dot(h.astype(BF16), w1_ref[...], preferred_element_type=F32) + b1_ref[...]
    h = _gelu(h)
    h = jnp.dot(h.astype(BF16), w2_ref[...], preferred_element_type=F32) + b2_ref[...]
    o_ref[...] = x + h


def pallas_ln_mlp_residual(x, g, b, w1, b1, w2, b2, eps=1e-5):
    M, D = x.shape
    H = w1.shape[1]
    tile_m, Mp = _row_tiling(M)
    xp = x.astype(F32)
    if Mp != M:
        xp = jnp.pad(xp, ((0, Mp - M), (0, 0)))
    out = pl.pallas_call(
        functools.partial(_ln_mlp_residual_kernel, eps=eps),
        out_shape=jax.ShapeDtypeStruct((Mp, D), F32),
        grid=(Mp // tile_m,),
        in_specs=[
            pl.BlockSpec((tile_m, D), lambda i: (i, 0)),
            pl.BlockSpec((1, D), lambda i: (0, 0)),
            pl.BlockSpec((1, D), lambda i: (0, 0)),
            pl.BlockSpec((D, H), lambda i: (0, 0)),
            pl.BlockSpec((1, H), lambda i: (0, 0)),
            pl.BlockSpec((H, D), lambda i: (0, 0)),
            pl.BlockSpec((1, D), lambda i: (0, 0)),
        ],
        out_specs=pl.BlockSpec((tile_m, D), lambda i: (i, 0)),
        compiler_params=_parallel(1),
    )(xp, g.reshape(1, D).astype(F32), b.reshape(1, D).astype(F32),
      w1.astype(BF16), b1.reshape(1, H).astype(F32),
      w2.astype(BF16), b2.reshape(1, D).astype(F32))
    return out if Mp == M else out[:M]


def _attention_kernel(q_ref, k_ref, v_ref, m_ref, o_ref, *, scale):
    """All heads of one batch element per grid step; mask shared across heads."""
    q = q_ref[0].astype(BF16)   # [H, T, Dh]
    k = k_ref[0].astype(BF16)
    v = v_ref[0].astype(BF16)
    s = jnp.einsum("hqd,hkd->hqk", q, k, preferred_element_type=F32) * scale
    s = s + m_ref[0]            # [1, T, T] broadcasts over heads
    s = s - jnp.max(s, axis=-1, keepdims=True)
    p = jnp.exp(s)
    p = p * pl.reciprocal(jnp.sum(p, axis=-1, keepdims=True), approx=True)
    o_ref[0] = jnp.einsum("hqk,hkd->hqd", p.astype(BF16), v, preferred_element_type=F32)
    # TODO(synk): for long sequences convert to flash-style online softmax with a KV grid axis.


def pallas_attention(q, k, v, add_mask):
    """q,k,v: [B, H, T, Dh]; add_mask: [B, 1, T, T] additive (0 / -1e9), head-shared."""
    B, H, T, Dh = q.shape
    scale = 1.0 / math.sqrt(Dh)
    out = pl.pallas_call(
        functools.partial(_attention_kernel, scale=scale),
        out_shape=jax.ShapeDtypeStruct((B, H, T, Dh), F32),
        grid=(B,),
        in_specs=[
            pl.BlockSpec((1, H, T, Dh), lambda i: (i, 0, 0, 0)),
            pl.BlockSpec((1, H, T, Dh), lambda i: (i, 0, 0, 0)),
            pl.BlockSpec((1, H, T, Dh), lambda i: (i, 0, 0, 0)),
            pl.BlockSpec((1, 1, T, T), lambda i: (i, 0, 0, 0)),
        ],
        out_specs=pl.BlockSpec((1, H, T, Dh), lambda i: (i, 0, 0, 0)),
        compiler_params=_parallel(1),
    )(q.astype(F32), k.astype(F32), v.astype(F32), add_mask.astype(F32))
    return out


def _patch_embed_kernel(x_ref, cw_ref, cb_ref, pw_ref, pb_ref, o_ref, *, k, stride, l_out, c_out):
    """Temporal conv (VPU multiply-adds) + GELU fused with the patch projection."""
    x = x_ref[...].astype(F32)            # [tm, T]
    cw = cw_ref[...]                      # [k, c_out]
    cb = cb_ref[...]                      # [1, c_out]
    y = jnp.zeros((x.shape[0], pw_ref.shape[1]), F32) + pb_ref[...]
    for l in range(l_out):
        acc = jnp.zeros((x.shape[0], c_out), F32) + cb
        for j in range(k):
            col = l * stride + j
            acc = acc + x[:, col:col + 1] * cw[j:j + 1, :]
        acc = _gelu(acc)
        y = y + jnp.dot(acc.astype(BF16), pw_ref[l * c_out:(l + 1) * c_out, :],
                        preferred_element_type=F32)
    o_ref[...] = y


def pallas_patch_embed(x, conv_w, conv_b, patch_w, patch_b, *, k, stride):
    M, T = x.shape
    c_out = conv_w.shape[1]
    l_out = (T - k) // stride + 1
    conv_feat = l_out * c_out
    D = patch_w.shape[1]
    tile_m, Mp = _row_tiling(M)
    xp = x.astype(F32)
    if Mp != M:
        xp = jnp.pad(xp, ((0, Mp - M), (0, 0)))
    out = pl.pallas_call(
        functools.partial(_patch_embed_kernel, k=k, stride=stride, l_out=l_out, c_out=c_out),
        out_shape=jax.ShapeDtypeStruct((Mp, D), F32),
        grid=(Mp // tile_m,),
        in_specs=[
            pl.BlockSpec((tile_m, T), lambda i: (i, 0)),
            pl.BlockSpec((k, c_out), lambda i: (0, 0)),
            pl.BlockSpec((1, c_out), lambda i: (0, 0)),
            pl.BlockSpec((conv_feat, D), lambda i: (0, 0)),
            pl.BlockSpec((1, D), lambda i: (0, 0)),
        ],
        out_specs=pl.BlockSpec((tile_m, D), lambda i: (i, 0)),
        compiler_params=_parallel(1),
    )(xp, conv_w.astype(F32), conv_b.reshape(1, c_out).astype(F32),
      patch_w.astype(BF16), patch_b.reshape(1, D).astype(F32))
    return out if Mp == M else out[:M]


def _cross_entropy_kernel(logits_ref, tgt_ref, loss_ref, valid_ref, correct_ref, *, v_real):
    logits = logits_ref[...].astype(F32)          # [tm, Vp] (lane-padded vocab)
    tgt = tgt_ref[...]                            # [tm, 1] int32, -1 = ignore
    tm, vp = logits.shape
    col = jax.lax.broadcasted_iota(jnp.int32, (tm, vp), 1)
    logits = jnp.where(col < v_real, logits, -1e30)      # mask padded vocab columns
    onehot = (col == tgt).astype(F32)
    m = jnp.max(logits, axis=-1, keepdims=True)
    lse = m + jnp.log(jnp.sum(jnp.exp(logits - m), axis=-1, keepdims=True))
    tlogit = jnp.sum(logits * onehot, axis=-1, keepdims=True)
    valid = (tgt >= 0).astype(F32)
    loss_ref[...] = (lse - tlogit) * valid
    valid_ref[...] = valid
    # argmax with first-index tie-break, kept in int32 for exactness
    pred = jnp.min(jnp.where(logits == m, col, vp), axis=-1, keepdims=True)
    correct_ref[...] = (pred == tgt).astype(F32) * valid


def pallas_cross_entropy(logits, targets, v_real):
    """logits [M, Vp] f32 (padded vocab), targets [M] int32 (-1 ignored)."""
    M, Vp = logits.shape
    tile_m, Mp = _row_tiling(M)
    lp = logits.astype(F32)
    tp = targets.reshape(M, 1).astype(jnp.int32)
    if Mp != M:
        lp = jnp.pad(lp, ((0, Mp - M), (0, 0)))
        tp = jnp.pad(tp, ((0, Mp - M), (0, 0)), constant_values=-1)
    loss_v, valid_v, correct_v = pl.pallas_call(
        functools.partial(_cross_entropy_kernel, v_real=v_real),
        out_shape=(
            jax.ShapeDtypeStruct((Mp, 1), F32),
            jax.ShapeDtypeStruct((Mp, 1), F32),
            jax.ShapeDtypeStruct((Mp, 1), F32),
        ),
        grid=(Mp // tile_m,),
        in_specs=[
            pl.BlockSpec((tile_m, Vp), lambda i: (i, 0)),
            pl.BlockSpec((tile_m, 1), lambda i: (i, 0)),
        ],
        out_specs=(
            pl.BlockSpec((tile_m, 1), lambda i: (i, 0)),
            pl.BlockSpec((tile_m, 1), lambda i: (i, 0)),
            pl.BlockSpec((tile_m, 1), lambda i: (i, 0)),
        ),
        compiler_params=_parallel(1),
    )(lp, tp)
    if Mp != M:
        loss_v, valid_v, correct_v = loss_v[:M], valid_v[:M], correct_v[:M]
    return loss_v, valid_v, correct_v


# ------------------------------- Model glue --------------------------------

class Cfg:
    # shapes kept small for a synthetic run
    B, N1, T, N2 = 2, 4, 16, 8
    # tokenizer (NeuralTransformer, stands in for the VQ-aligned encoder)
    tok_embd, tok_heads, tok_layers = 32, 2, 1
    conv_k, conv_stride, conv_out = 5, 2, 8
    num_chan_types, tok_time_size = 16, 32
    # GPT-2 (shrunk)
    n_embd, n_head, n_layer = 64, 2, 2
    vocab_text, vocab_eeg = 64, 32          # enlarge_lm_head(vocab + eeg_vocab)
    block_size = 32
    pos_embed_size = 256                    # nn.Embedding(256, n_embd)


def init_params(key, cfg):
    L_out = (cfg.T - cfg.conv_k) // cfg.conv_stride + 1
    conv_feat = L_out * cfg.conv_out
    keys = iter(jax.random.split(key, 128))

    def nrm(shape, std=0.02):
        return jax.random.normal(next(keys), shape, F32) * std

    def block(D):
        return dict(
            ln1_g=jnp.ones((D,), F32), ln1_b=jnp.zeros((D,), F32),
            attn_w=nrm((D, 3 * D)), attn_b=jnp.zeros((3 * D,), F32),
            proj_w=nrm((D, D)), proj_b=jnp.zeros((D,), F32),
            ln2_g=jnp.ones((D,), F32), ln2_b=jnp.zeros((D,), F32),
            fc_w=nrm((D, 4 * D)), fc_b=jnp.zeros((4 * D,), F32),
            fc2_w=nrm((4 * D, D)), fc2_b=jnp.zeros((D,), F32),
        )

    return dict(
        # tokenizer (TemporalConv-lite patch embed + transformer)
        # TODO(synk): real TemporalConv is a 3-stage Conv2d+GroupNorm+GELU stack.
        tok_conv_w=nrm((cfg.conv_k, cfg.conv_out)),
        tok_conv_b=jnp.zeros((cfg.conv_out,), F32),
        tok_patch_w=nrm((conv_feat, cfg.tok_embd)),
        tok_patch_b=jnp.zeros((cfg.tok_embd,), F32),
        tok_chan_emb=nrm((cfg.num_chan_types, cfg.tok_embd)),
        tok_time_emb=nrm((cfg.tok_time_size, cfg.tok_embd)),
        tok_blocks=[block(cfg.tok_embd) for _ in range(cfg.tok_layers)],
        tok_ln_f_g=jnp.ones((cfg.tok_embd,), F32),
        tok_ln_f_b=jnp.zeros((cfg.tok_embd,), F32),
        # encode_transform_layer = Linear(tok_embd, n_embd) + GELU (dims differ)
        enc_w=nrm((cfg.tok_embd, cfg.n_embd)),
        enc_b=jnp.zeros((cfg.n_embd,), F32),
        # pos_embed = nn.Embedding(256, n_embd)
        pos_embed=nrm((cfg.pos_embed_size, cfg.n_embd)),
        # GPT-2
        wte=nrm((cfg.vocab_text, cfg.n_embd)),
        wpe=nrm((cfg.block_size, cfg.n_embd)),
        gpt_blocks=[block(cfg.n_embd) for _ in range(cfg.n_layer)],
        gpt_ln_f_g=jnp.ones((cfg.n_embd,), F32),
        gpt_ln_f_b=jnp.zeros((cfg.n_embd,), F32),
        lm_head_w=nrm((cfg.n_embd, cfg.vocab_text + cfg.vocab_eeg)),
    )


def transformer_block(x, blk, n_head, add_mask):
    """Pre-norm block: x = x + proj(attn(ln1(x)));  x = x + mlp(ln2(x)).  4 pallas_calls."""
    B, T, D = x.shape
    xf = x.reshape(B * T, D)
    qkv = pallas_ln_linear(xf, blk["ln1_g"], blk["ln1_b"],
                           blk["attn_w"], blk["attn_b"]).reshape(B, T, 3 * D)
    q, k, v = jnp.split(qkv, 3, axis=-1)
    Dh = D // n_head

    def heads(t):
        return t.reshape(B, T, n_head, Dh).transpose(0, 2, 1, 3)

    attn = pallas_attention(heads(q), heads(k), heads(v), add_mask)   # mask [B,1,T,T]
    attn = attn.transpose(0, 2, 1, 3).reshape(B * T, D)
    xf = pallas_linear_residual(attn, blk["proj_w"], blk["proj_b"], xf)
    xf = pallas_ln_mlp_residual(xf, blk["ln2_g"], blk["ln2_b"],
                                blk["fc_w"], blk["fc_b"], blk["fc2_w"], blk["fc2_b"])
    return xf.reshape(B, T, D)


def tokenizer_forward(p, cfg, x_eeg, input_chans, input_time, mask4d):
    """NeuralTransformer(x, input_chans, input_time, mask, return_all_tokens=True)
    (final LN is fused with encode_transform in neurolm_forward)."""
    B, N1, T = x_eeg.shape
    xf = x_eeg.reshape(B * N1, T)
    tok = pallas_patch_embed(xf, p["tok_conv_w"], p["tok_conv_b"],
                             p["tok_patch_w"], p["tok_patch_b"],
                             k=cfg.conv_k, stride=cfg.conv_stride)
    tok = tok.reshape(B, N1, cfg.tok_embd)
    tok = tok + p["tok_chan_emb"][input_chans] + p["tok_time_emb"][input_time]

    add_mask = (1.0 - mask4d.astype(F32)) * -1e9                 # [B, 1, N1, N1] head-shared
    for blk in p["tok_blocks"]:
        tok = transformer_block(tok, blk, cfg.tok_heads, add_mask)
    return tok


def gpt_forward(p, cfg, x_eeg_emb, y_eeg, x_text, y_text, eeg_time_idx, eeg_mask, eeg_text_mask):
    B, N1, D = x_eeg_emb.shape
    N2 = x_text.shape[1]
    L = N1 + N2
    V = cfg.vocab_text + cfg.vocab_eeg
    Vp = _round_up(V, 128)                                       # lane-dense lm_head output

    tok_text = p["wte"][x_text] + p["wpe"][jnp.arange(N2)][None]
    eeg = x_eeg_emb + p["wpe"][eeg_time_idx]
    x = jnp.concatenate([eeg, tok_text], axis=1)                 # [B, L, D]

    add_mask = (1.0 - eeg_text_mask.astype(F32)) * -1e9          # [B, 1, L, L] head-shared
    for blk in p["gpt_blocks"]:
        x = transformer_block(x, blk, cfg.n_head, add_mask)

    # final LN fused with lm_head (weight zero-padded to 128 lanes)
    # TODO(synk): for a real 50k+ vocab, add N/K grid axes to keep the weight block in VMEM.
    lm_w = jnp.pad(p["lm_head_w"], ((0, 0), (0, Vp - V)))
    logits_p = pallas_ln_linear(x.reshape(B * L, D), p["gpt_ln_f_g"], p["gpt_ln_f_b"],
                                lm_w, jnp.zeros((Vp,), F32)).reshape(B, L, Vp)

    # targets: EEG tokens predict VQ ids offset by text vocab size, text predicts y_text
    y_eeg_shift = jnp.where(y_eeg >= 0, y_eeg + cfg.vocab_text, -1)
    y_eeg_shift = jnp.where(eeg_mask > 0, y_eeg_shift, -1)
    targets = jnp.concatenate([y_eeg_shift, y_text], axis=1).astype(jnp.int32)   # [B, L]

    loss_v, valid_v, correct_v = pallas_cross_entropy(logits_p.reshape(B * L, Vp),
                                                      targets.reshape(B * L), V)
    loss = jnp.sum(loss_v) / jnp.maximum(jnp.sum(valid_v), 1.0)
    # accuracy over text positions (as logged by NeuroLM)
    corr_t = correct_v.reshape(B, L)[:, N1:]
    val_t = valid_v.reshape(B, L)[:, N1:]
    accuracy = jnp.sum(corr_t) / jnp.maximum(jnp.sum(val_t), 1.0)
    logits = logits_p[:, :, :V]
    return logits, loss, accuracy


def neurolm_forward(p, cfg, x_eeg, y_eeg, x_text, y_text, input_chans, input_time,
                    input_mask, eeg_mask, eeg_text_mask, training=True):
    if x_eeg is not None:
        B, N1, _ = x_eeg.shape
        # input_mask.unsqueeze(1).repeat(1, N1, 1).unsqueeze(1) -> [B,1,N1,N1]
        mask4d = jnp.broadcast_to(input_mask[:, None, :], (B, N1, N1))[:, None]
        x_tok = tokenizer_forward(p, cfg, x_eeg, input_chans, input_time, mask4d)
        # tokenizer final LN fused with encode_transform (Linear + GELU)
        x_emb = pallas_ln_linear(x_tok.reshape(B * N1, cfg.tok_embd),
                                 p["tok_ln_f_g"], p["tok_ln_f_b"],
                                 p["enc_w"], p["enc_b"], activation="gelu")
        x_emb = x_emb.reshape(B, N1, cfg.n_embd) + p["pos_embed"][input_chans]
    else:
        x_emb = None
    logits, loss, accuracy = gpt_forward(p, cfg, x_emb, y_eeg, x_text, y_text,
                                         input_time, eeg_mask, eeg_text_mask)
    split = "train" if training else "val"
    # device scalars (no host-side float() sync in the hot path)
    log = {f"{split}/loss": loss, f"{split}/accuracy": accuracy}
    return loss, log, logits


# ---------------------------------- main -----------------------------------

if __name__ == "__main__":
    cfg = Cfg()
    key = jax.random.PRNGKey(0)
    kp, k1, k2, k3, k4, k5, k6 = jax.random.split(key, 7)
    params = init_params(kp, cfg)

    x_eeg = jax.random.normal(k1, (cfg.B, cfg.N1, cfg.T), F32)
    x_text = jax.random.randint(k2, (cfg.B, cfg.N2), 0, cfg.vocab_text)
    y_text = jax.random.randint(k3, (cfg.B, cfg.N2), 0, cfg.vocab_text)
    y_eeg = jax.random.randint(k4, (cfg.B, cfg.N1), 0, cfg.vocab_eeg)
    input_chans = jax.random.randint(k5, (cfg.B, cfg.N1), 0, cfg.num_chan_types)
    input_time = jax.random.randint(k6, (cfg.B, cfg.N1), 0, cfg.N2)
    input_mask = jnp.ones((cfg.B, cfg.N1), jnp.int32)
    eeg_mask = jnp.ones((cfg.B, cfg.N1), jnp.int32)
    L = cfg.N1 + cfg.N2
    eeg_text_mask = jnp.broadcast_to(jnp.tril(jnp.ones((L, L), F32))[None, None],
                                     (cfg.B, 1, L, L))

    fwd = jax.jit(lambda p, *a: neurolm_forward(p, cfg, *a))
    loss, log, logits = fwd(params, x_eeg, y_eeg, x_text, y_text,
                            input_chans, input_time, input_mask, eeg_mask, eeg_text_mask)
    jax.block_until_ready((loss, logits))
    assert logits.shape == (cfg.B, L, cfg.vocab_text + cfg.vocab_eeg)
    assert bool(jnp.isfinite(loss))
    print("KERNEL_OK")
</pallas_src>

<mosaic_0001>
module attributes {stable_mosaic.version = 11 : i64} {
  func.func @_ln_linear_kernel(%arg0: i32, %arg1: memref<8x32xf32, #tpu.memory_space<vmem>>, %arg2: memref<1x32xf32, #tpu.memory_space<vmem>>, %arg3: memref<1x32xf32, #tpu.memory_space<vmem>>, %arg4: memref<32x96xbf16, #tpu.memory_space<vmem>>, %arg5: memref<1x96xf32, #tpu.memory_space<vmem>>, %arg6: memref<8x96xf32, #tpu.memory_space<vmem>>) attributes {dimension_semantics = [#tpu.dimension_semantics<parallel>], iteration_bounds = array<i64: 1>, scalar_prefetch = 0 : i64, scratch_operands = 0 : i64, tpu.core_type = #tpu.core_type<tc>, window_params = [{transform_indices = @transform_0, window_bounds = array<i64: 8, 32>}, {pipeline_mode = #tpu.pipeline_mode<synchronous>, transform_indices = @transform_1, window_bounds = array<i64: 1, 32>}, {pipeline_mode = #tpu.pipeline_mode<synchronous>, transform_indices = @transform_2, window_bounds = array<i64: 1, 32>}, {pipeline_mode = #tpu.pipeline_mode<synchronous>, transform_indices = @transform_3, window_bounds = array<i64: 32, 96>}, {pipeline_mode = #tpu.pipeline_mode<synchronous>, transform_indices = @transform_4, window_bounds = array<i64: 1, 96>}, {transform_indices = @transform_5, window_bounds = array<i64: 8, 96>}]} {
    %c0 = arith.constant 0 : index
    %c0_0 = arith.constant 0 : index
    %0 = vector.load %arg1[%c0, %c0_0] : memref<8x32xf32, #tpu.memory_space<vmem>>, vector<8x32xf32>
    %cst = arith.constant dense<0.000000e+00> : vector<8xf32>
    %1 = vector.multi_reduction <add>, %0, %cst [1] : vector<8x32xf32> to vector<8xf32>
    %2 = vector.shape_cast %1 : vector<8xf32> to vector<8x1xf32>
    %cst_1 = arith.constant 3.200000e+01 : f32
    %3 = vector.broadcast %cst_1 : f32 to vector<8x1xf32>
    %4 = arith.divf %2, %3 : vector<8x1xf32>
    %5 = vector.broadcast %4 : vector<8x1xf32> to vector<8x32xf32>
    %6 = arith.subf %0, %5 : vector<8x32xf32>
    %7 = arith.mulf %6, %6 : vector<8x32xf32>
    %cst_2 = arith.constant dense<0.000000e+00> : vector<8xf32>
    %8 = vector.multi_reduction <add>, %7, %cst_2 [1] : vector<8x32xf32> to vector<8xf32>
    %9 = vector.shape_cast %8 : vector<8xf32> to vector<8x1xf32>
    %cst_3 = arith.constant 3.200000e+01 : f32
    %10 = vector.broadcast %cst_3 : f32 to vector<8x1xf32>
    %11 = arith.divf %9, %10 : vector<8x1xf32>
    %12 = vector.broadcast %4 : vector<8x1xf32> to vector<8x32xf32>
    %13 = arith.subf %0, %12 : vector<8x32xf32>
    %cst_4 = arith.constant 9.99999974E-6 : f32
    %14 = vector.broadcast %cst_4 : f32 to vector<8x1xf32>
    %15 = arith.addf %11, %14 : vector<8x1xf32>
    %16 = math.rsqrt %15 : vector<8x1xf32>
    %17 = vector.broadcast %16 : vector<8x1xf32> to vector<8x32xf32>
    %18 = arith.mulf %13, %17 : vector<8x32xf32>
    %c0_5 = arith.constant 0 : index
    %c0_6 = arith.constant 0 : index
    %19 = vector.load %arg2[%c0_5, %c0_6] : memref<1x32xf32, #tpu.memory_space<vmem>>, vector<1x32xf32>
    %20 = vector.broadcast %19 : vector<1x32xf32> to vector<8x32xf32>
    %21 = arith.mulf %18, %20 : vector<8x32xf32>
    %c0_7 = arith.constant 0 : index
    %c0_8 = arith.constant 0 : index
    %22 = vector.load %arg3[%c0_7, %c0_8] : memref<1x32xf32, #tpu.memory_space<vmem>>, vector<1x32xf32>
    %23 = vector.broadcast %22 : vector<1x32xf32> to vector<8x32xf32>
    %24 = arith.addf %21, %23 : vector<8x32xf32>
    %25 = arith.truncf %24 : vector<8x32xf32> to vector<8x32xbf16>
    %c0_9 = arith.constant 0 : index
    %c0_10 = arith.constant 0 : index
    %26 = vector.load %arg4[%c0_9, %c0_10] : memref<32x96xbf16, #tpu.memory_space<vmem>>, vector<32x96xbf16>
    %cst_11 = arith.constant dense<0.000000e+00> : vector<8x96xf32>
    %27 = tpu.matmul %25, %26, %cst_11 {dimension_numbers = #tpu.dot_dimension_numbers<[1], [0], [0], [1], [0, 0, 1, 1], [], []>} : vector<8x32xbf16>, vector<32x96xbf16>, vector<8x96xf32> -> vector<8x96xf32>
    %c0_12 = arith.constant 0 : index
    %c0_13 = arith.constant 0 : index
    %28 = vector.load %arg5[%c0_12, %c0_13] : memref<1x96xf32, #tpu.memory_space<vmem>>, vector<1x96xf32>
    %29 = vector.broadcast %28 : vector<1x96xf32> to vector<8x96xf32>
    %30 = arith.addf %27, %29 : vector<8x96xf32>
    %c0_14 = arith.constant 0 : index
    %c0_15 = arith.constant 0 : index
    %31 = vector.load %arg6[%c0_14, %c0_15] : memref<8x96xf32, #tpu.memory_space<vmem>>, vector<8x96xf32>
    tpu.vector_store %arg6[%c0_14, %c0_15], %30 {strides = array<i32>} : memref<8x96xf32, #tpu.memory_space<vmem>>, vector<8x96xf32>,
    return
  }
  func.func @transform_0(%arg0: i32) -> (i32, i32) {
    %c0_i32 = arith.constant 0 : i32
    %c0_i32_0 = arith.constant 0 : i32
    return %arg0, %c0_i32 : i32, i32
  }
  func.func @transform_1(%arg0: i32) -> (i32, i32) {
    %c0_i32 = arith.constant 0 : i32
    %c0_i32_0 = arith.constant 0 : i32
    %c0_i32_1 = arith.constant 0 : i32
    return %c0_i32, %c0_i32_0 : i32, i32
  }
  func.func @transform_2(%arg0: i32) -> (i32, i32) {
    %c0_i32 = arith.constant 0 : i32
    %c0_i32_0 = arith.constant 0 : i32
    %c0_i32_1 = arith.constant 0 : i32
    return %c0_i32, %c0_i32_0 : i32, i32
  }
  func.func @transform_3(%arg0: i32) -> (i32, i32) {
    %c0_i32 = arith.constant 0 : i32
    %c0_i32_0 = arith.constant 0 : i32
    %c0_i32_1 = arith.constant 0 : i32
    return %c0_i32, %c0_i32_0 : i32, i32
  }
  func.func @transform_4(%arg0: i32) -> (i32, i32) {
    %c0_i32 = arith.constant 0 : i32
    %c0_i32_0 = arith.constant 0 : i32
    %c0_i32_1 = arith.constant 0 : i32
    return %c0_i32, %c0_i32_0 : i32, i32
  }
  func.func @transform_5(%arg0: i32) -> (i32, i32) {
    %c0_i32 = arith.constant 0 : i32
    %c0_i32_0 = arith.constant 0 : i32
    return %arg0, %c0_i32 : i32, i32
  }
}

module attributes {stable_mosaic.version = 11 : i64} {
  func.func @_patch_embed_kernel(%arg0: i32, %arg1: memref<8x16xf32, #tpu.memory_space<vmem>>, %arg2: memref<5x8xf32, #tpu.memory_space<vmem>>, %arg3: memref<1x8xf32, #tpu.memory_space<vmem>>, %arg4: memref<48x32xbf16, #tpu.memory_space<vmem>>, %arg5: memref<1x32xf32, #tpu.memory_space<vmem>>, %arg6: memref<8x32xf32, #tpu.memory_space<vmem>>) attributes {dimension_semantics = [#tpu.dimension_semantics<parallel>], iteration_bounds = array<i64: 1>, scalar_prefetch = 0 : i64, scratch_operands = 0 : i64, tpu.core_type = #tpu.core_type<tc>, window_params = [{transform_indices = @transform_0, window_bounds = array<i64: 8, 16>}, {pipeline_mode = #tpu.pipeline_mode<synchronous>, transform_indices = @transform_1, window_bounds = array<i64: 5, 8>}, {pipeline_mode = #tpu.pipeline_mode<synchronous>, transform_indices = @transform_2, window_bounds = array<i64: 1, 8>}, {pipeline_mode = #tpu.pipeline_mode<synchronous>, transform_indices = @transform_3, window_bounds = array<i64: 48, 32>}, {pipeline_mode = #tpu.pipeline_mode<synchronous>, transform_indices = @transform_4, window_bounds = array<i64: 1, 32>}, {transform_indices = @transform_5, window_bounds = array<i64: 8, 32>}]} {
    %c0 = arith.constant 0 : index
    %c0_0 = arith.constant 0 : index
    %0 = vector.load %arg1[%c0, %c0_0] : memref<8x16xf32, #tpu.memory_space<vmem>>, vector<8x16xf32>
    %c0_1 = arith.constant 0 : index
    %c0_2 = arith.constant 0 : index
    %1 = vector.load %arg2[%c0_1, %c0_2] : memref<5x8xf32, #tpu.memory_space<vmem>>, vector<5x8xf32>
    %c0_3 = arith.constant 0 : index
    %c0_4 = arith.constant 0 : index
    %2 = vector.load %arg3[%c0_3, %c0_4] : memref<1x8xf32, #tpu.memory_space<vmem>>, vector<1x8xf32>
    %cst = arith.constant 0.000000e+00 : f32
    %3 = vector.broadcast %cst : f32 to vector<8x32xf32>
    %c0_5 = arith.constant 0 : index
    %c0_6 = arith.constant 0 : index
    %4 = vector.load %arg5[%c0_5, %c0_6] : memref<1x32xf32, #tpu.memory_space<vmem>>, vector<1x32xf32>
    %5 = vector.broadcast %4 : vector<1x32xf32> to vector<8x32xf32>
    %6 = arith.addf %3, %5 : vector<8x32xf32>
    %cst_7 = arith.constant 0.000000e+00 : f32
    %7 = vector.broadcast %cst_7 : f32 to vector<8x8xf32>
    %8 = vector.broadcast %2 : vector<1x8xf32> to vector<8x8xf32>
    %9 = arith.addf %7, %8 : vector<8x8xf32>
    %10 = vector.extract_strided_slice %0 {offsets = [0, 0], sizes = [8, 1], strides = [1, 1]} : vector<8x16xf32> to vector<8x1xf32>
    %11 = vector.extract_strided_slice %1 {offsets = [0, 0], sizes = [1, 8], strides = [1, 1]} : vector<5x8xf32> to vector<1x8xf32>
    %12 = vector.broadcast %10 : vector<8x1xf32> to vector<8x8xf32>
    %13 = vector.broadcast %11 : vector<1x8xf32> to vector<8x8xf32>
    %14 = arith.mulf %12, %13 : vector<8x8xf32>
    %15 = arith.addf %9, %14 : vector<8x8xf32>
    %16 = vector.extract_strided_slice %0 {offsets = [0, 1], sizes = [8, 1], strides = [1, 1]} : vector<8x16xf32> to vector<8x1xf32>
    %17 = vector.extract_strided_slice %1 {offsets = [1, 0], sizes = [1, 8], strides = [1, 1]} : vector<5x8xf32> to vector<1x8xf32>
    %18 = vector.broadcast %16 : vector<8x1xf32> to vector<8x8xf32>
    %19 = vector.broadcast %17 : vector<1x8xf32> to vector<8x8xf32>
    %20 = arith.mulf %18, %19 : vector<8x8xf32>
    %21 = arith.addf %15, %20 : vector<8x8xf32>
    %22 = vector.extract_strided_slice %0 {offsets = [0, 2], sizes = [8, 1], strides = [1, 1]} : vector<8x16xf32> to vector<8x1xf32>
    %23 = vector.extract_strided_slice %1 {offsets = [2, 0], sizes = [1, 8], strides = [1, 1]} : vector<5x8xf32> to vector<1x8xf32>
    %24 = vector.broadcast %22 : vector<8x1xf32> to vector<8x8xf32>
    %25 = vector.broadcast %23 : vector<1x8xf32> to vector<8x8xf32>
    %26 = arith.mulf %24, %25 : vector<8x8xf32>
    %27 = arith.addf %21, %26 : vector<8x8xf32>
    %28 = vector.extract_strided_slice %0 {offsets = [0, 3], sizes = [8, 1], strides = [1, 1]} : vector<8x16xf32> to vector<8x1xf32>
    %29 = vector.extract_strided_slice %1 {offsets = [3, 0], sizes = [1, 8], strides = [1, 1]} : vector<5x8xf32> to vector<1x8xf32>
    %30 = vector.broadcast %28 : vector<8x1xf32> to vector<8x8xf32>
    %31 = vector.broadcast %29 : vector<1x8xf32> to vector<8x8xf32>
    %32 = arith.mulf %30, %31 : vector<8x8xf32>
    %33 = arith.addf %27, %32 : vector<8x8xf32>
    %34 = vector.extract_strided_slice %0 {offsets = [0, 4], sizes = [8, 1], strides = [1, 1]} : vector<8x16xf32> to vector<8x1xf32>
    %35 = vector.extract_strided_slice %1 {offsets = [4, 0], sizes = [1, 8], strides = [1, 1]} : vector<5x8xf32> to vector<1x8xf32>
    %36 = vector.broadcast %34 : vector<8x1xf32> to vector<8x8xf32>
    %37 = vector.broadcast %35 : vector<1x8xf32> to vector<8x8xf32>
    %38 = arith.mulf %36, %37 : vector<8x8xf32>
    %39 = arith.addf %33, %38 : vector<8x8xf32>
    %cst_8 = arith.constant 5.000000e-01 : f32
    %40 = vector.broadcast %cst_8 : f32 to vector<8x8xf32>
    %41 = arith.mulf %40, %39 : vector<8x8xf32>
    %cst_9 = arith.constant 4.471500e-02 : f32
    %42 = vector.broadcast %cst_9 : f32 to vector<8x8xf32>
    %43 = arith.mulf %42, %39 : vector<8x8xf32>
    %44 = arith.mulf %43, %39 : vector<8x8xf32>
    %45 = arith.mulf %44, %39 : vector<8x8xf32>
    %46 = arith.addf %39, %45 : vector<8x8xf32>
    %cst_10 = arith.constant 0.797884583 : f32
    %47 = vector.broadcast %cst_10 : f32 to vector<8x8xf32>
    %48 = arith.mulf %47, %46 : vector<8x8xf32>
    %49 = math.tanh %48 : vector<8x8xf32>
    %cst_11 = arith.constant 1.000000e+00 : f32
    %50 = vector.broadcast %cst_11 : f32 to vector<8x8xf32>
    %51 = arith.addf %50, %49 : vector<8x8xf32>
    %52 = arith.mulf %41, %51 : vector<8x8xf32>
    %53 = arith.truncf %52 : vector<8x8xf32> to vector<8x8xbf16>
    %c0_12 = arith.constant 0 : index
    %c0_13 = arith.constant 0 : index
    %54 = vector.load %arg4[%c0_12, %c0_13] : memref<48x32xbf16, #tpu.memory_space<vmem>>, vector<8x32xbf16>
    %cst_14 = arith.constant dense<0.000000e+00> : vector<8x32xf32>
    %55 = tpu.matmul %53, %54, %cst_14 {dimension_numbers = #tpu.dot_dimension_numbers<[1], [0], [0], [1], [0, 0, 1, 1], [], []>} : vector<8x8xbf16>, vector<8x32xbf16>, vector<8x32xf32> -> vector<8x32xf32>
    %56 = arith.addf %6, %55 : vector<8x32xf32>
    %cst_15 = arith.constant 0.000000e+00 : f32
    %57 = vector.broadcast %cst_15 : f32 to vector<8x8xf32>
    %58 = vector.broadcast %2 : vector<1x8xf32> to vector<8x8xf32>
    %59 = arith.addf %57, %58 : vector<8x8xf32>
    %60 = vector.extract_strided_slice %0 {offsets = [0, 2], sizes = [8, 1], strides = [1, 1]} : vector<8x16xf32> to vector<8x1xf32>
    %61 = vector.extract_strided_slice %1 {offsets = [0, 0], sizes = [1, 8], strides = [1, 1]} : vector<5x8xf32> to vector<1x8xf32>
    %62 = vector.broadcast %60 : vector<8x1xf32> to vector<8x8xf32>
    %63 = vector.broadcast %61 : vector<1x8xf32> to vector<8x8xf32>
    %64 = arith.mulf %62, %63 : vector<8x8xf32>
    %65 = arith.addf %59, %64 : vector<8x8xf32>
    %66 = vector.extract_strided_slice %0 {offsets = [0, 3], sizes = [8, 1], strides = [1, 1]} : vector<8x16xf32> to vector<8x1xf32>
    %67 = vector.extract_strided_slice %1 {offsets = [1, 0], sizes = [1, 8], strides = [1, 1]} : vector<5x8xf32> to vector<1x8xf32>
    %68 = vector.broadcast %66 : vector<8x1xf32> to vector<8x8xf32>
    %69 = vector.broadcast %67 : vector<1x8xf32> to vector<8x8xf32>
    %70 = arith.mulf %68, %69 : vector<8x8xf32>
    %71 = arith.addf %65, %70 : vector<8x8xf32>
    %72 = vector.extract_strided_slice %0 {offsets = [0, 4], sizes = [8, 1], strides = [1, 1]} : vector<8x16xf32> to vector<8x1xf32>
    %73 = vector.extract_strided_slice %1 {offsets = [2, 0], sizes = [1, 8], strides = [1, 1]} : vector<5x8xf32> to vector<1x8xf32>
    %74 = vector.broadcast %72 : vector<8x1xf32> to vector<8x8xf32>
    %75 = vector.broadcast %73 : vector<1x8xf32> to vector<8x8xf32>
    %76 = arith.mulf %74, %75 : vector<8x8xf32>
    %77 = arith.addf %71, %76 : vector<8x8xf32>
    %78 = vector.extract_strided_slice %0 {offsets = [0, 5], sizes = [8, 1], strides = [1, 1]} : vector<8x16xf32> to vector<8x1xf32>
    %79 = vector.extract_strided_slice %1 {offsets = [3, 0], sizes = [1, 8], strides = [1, 1]} : vector<5x8xf32> to vector<1x8xf32>
    %80 = vector.broadcast %78 : vector<8x1xf32> to vector<8x8xf32>
    %81 = vector.broadcast %79 : vector<1x8xf32> to vector<8x8xf32>
    %82 = arith.mulf %80, %81 : vector<8x8xf32>
    %83 = arith.addf %77, %82 : vector<8x8xf32>
    %84 = vector.extract_strided_slice %0 {offsets = [0, 6], sizes = [8, 1], strides = [1, 1]} : vector<8x16xf32> to vector<8x1xf32>
    %85 = vector.extract_strided_slice %1 {offsets = [4, 0], sizes = [1, 8], strides = [1, 1]} : vector<5x8xf32> to vector<1x8xf32>
    %86 = vector.broadcast %84 : vector<8x1xf32> to vector<8x8xf32>
    %87 = vector.broadcast %85 : vector<1x8xf32> to vector<8x8xf32>
    %88 = arith.mulf %86, %87 : vector<8x8xf32>
    %89 = arith.addf %83, %88 : vector<8x8xf32>
    %cst_16 = arith.constant 5.000000e-01 : f32
    %90 = vector.broadcast %cst_16 : f32 to vector<8x8xf32>
    %91 = arith.mulf %90, %89 : vector<8x8xf32>
    %cst_17 = arith.constant 4.471500e-02 : f32
    %92 = vector.broadcast %cst_17 : f32 to vector<8x8xf32>
    %93 = arith.mulf %92, %89 : vector<8x8xf32>
    %94 = arith.mulf %93, %89 : vector<8x8xf32>
    %95 = arith.mulf %94, %89 : vector<8x8xf32>
    %96 = arith.addf %89, %95 : vector<8x8xf32>
    %cst_18 = arith.constant 0.797884583 : f32
    %97 = vector.broadcast %cst_18 : f32 to vector<8x8xf32>
    %98 = arith.mulf %97, %96 : vector<8x8xf32>
    %99 = math.tanh %98 : vector<8x8xf32>
    %cst_19 = arith.constant 1.000000e+00 : f32
    %100 = vector.broadcast %cst_19 : f32 to vector<8x8xf32>
    %101 = arith.addf %100, %99 : vector<8x8xf32>
    %102 = arith.mulf %91, %101 : vector<8x8xf32>
    %103 = arith.truncf %102 : vector<8x8xf32> to vector<8x8xbf16>
    %c8 = arith.constant 8 : index
    %c0_20 = arith.constant 0 : index
    %104 = vector.load %arg4[%c8, %c0_20] : memref<48x32xbf16, #tpu.memory_space<vmem>>, vector<8x32xbf16>
    %cst_21 = arith.constant dense<0.000000e+00> : vector<8x32xf32>
    %105 = tpu.matmul %103, %104, %cst_21 {dimension_numbers = #tpu.dot_dimension_numbers<[1], [0], [0], [1], [0, 0, 1, 1], [], []>} : vector<8x8xbf16>, vector<8x32xbf16>, vector<8x32xf32> -> vector<8x32xf32>
    %106 = arith.addf %56, %105 : vector<8x32xf32>
    %cst_22 = arith.constant 0.000000e+00 : f32
    %107 = vector.broadcast %cst_22 : f32 to vector<8x8xf32>
    %108 = vector.broadcast %2 : vector<1x8xf32> to vector<8x8xf32>
    %109 = arith.addf %107, %108 : vector<8x8xf32>
    %110 = vector.extract_strided_slice %0 {offsets = [0, 4], sizes = [8, 1], strides = [1, 1]} : vector<8x16xf32> to vector<8x1xf32>
    %111 = vector.extract_strided_slice %1 {offsets = [0, 0], sizes = [1, 8], strides = [1, 1]} : vector<5x8xf32> to vector<1x8xf32>
    %112 = vector.broadcast %110 : vector<8x1xf32> to vector<8x8xf32>
    %113 = vector.broadcast %111 : vector<1x8xf32> to vector<8x8xf32>
    %114 = arith.mulf %112, %113 : vector<8x8xf32>
    %115 = arith.addf %109, %114 : vector<8x8xf32>
    %116 = vector.extract_strided_slice %0 {offsets = [0, 5], sizes = [8, 1], strides = [1, 1]} : vector<8x16xf32> to vector<8x1xf32>
    %117 = vector.extract_strided_slice %1 {offsets = [1, 0], sizes = [1, 8], strides = [1, 1]} : vector<5x8xf32> to vector<1x8xf32>
    %118 = vector.broadcast %116 : vector<8x1xf32> to vector<8x8xf32>
    %119 = vector.broadcast %117 : vector<1x8xf32> to vector<8x8xf32>
    %120 = arith.mulf %118, %119 : vector<8x8xf32>
    %121 = arith.addf %115, %120 : vector<8x8xf32>
    %122 = vector.extract_strided_slice %0 {offsets = [0, 6], sizes = [8, 1], strides = [1, 1]} : vector<8x16xf32> to vector<8x1xf32>
    %123 = vector.extract_strided_slice %1 {offsets = [2, 0], sizes = [1, 8], strides = [1, 1]} : vector<5x8xf32> to vector<1x8xf32>
    %124 = vector.broadcast %122 : vector<8x1xf32> to vector<8x8xf32>
    %125 = vector.broadcast %123 : vector<1x8xf32> to vector<8x8xf32>
    %126 = arith.mulf %124, %125 : vector<8x8xf32>
    %127 = arith.addf %121, %126 : vector<8x8xf32>
    %128 = vector.extract_strided_slice %0 {offsets = [0, 7], sizes = [8, 1], strides = [1, 1]} : vector<8x16xf32> to vector<8x1xf32>
    %129 = vector.extract_strided_slice %1 {offsets = [3, 0], sizes = [1, 8], strides = [1, 1]} : vector<5x8xf32> to vector<1x8xf32>
    %130 = vector.broadcast %128 : vector<8x1xf32> to vector<8x8xf32>
    %131 = vector.broadcast %129 : vector<1x8xf32> to vector<8x8xf32>
    %132 = arith.mulf %130, %131 : vector<8x8xf32>
    %133 = arith.addf %127, %132 : vector<8x8xf32>
    %134 = vector.extract_strided_slice %0 {offsets = [0, 8], sizes = [8, 1], strides = [1, 1]} : vector<8x16xf32> to vector<8x1xf32>
    %135 = vector.extract_strided_slice %1 {offsets = [4, 0], sizes = [1, 8], strides = [1, 1]} : vector<5x8xf32> to vector<1x8xf32>
    %136 = vector.broadcast %134 : vector<8x1xf32> to vector<8x8xf32>
    %137 = vector.broadcast %135 : vector<1x8xf32> to vector<8x8xf32>
    %138 = arith.mulf %136, %137 : vector<8x8xf32>
    %139 = arith.addf %133, %138 : vector<8x8xf32>
    %cst_23 = arith.constant 5.000000e-01 : f32
    %140 = vector.broadcast %cst_23 : f32 to vector<8x8xf32>
    %141 = arith.mulf %140, %139 : vector<8x8xf32>
    %cst_24 = arith.constant 4.471500e-02 : f32
    %142 = vector.broadcast %cst_24 : f32 to vector<8x8xf32>
    %143 = arith.mulf %142, %139 : vector<8x8xf32>
    %144 = arith.mulf %143, %139 : vector<8x8xf32>
    %145 = arith.mulf %144, %139 : vector<8x8xf32>
    %146 = arith.addf %139, %145 : vector<8x8xf32>
    %cst_25 = arith.constant 0.797884583 : f32
    %147 = vector.broadcast %cst_25 : f32 to vector<8x8xf32>
    %148 = arith.mulf %147, %146 : vector<8x8xf32>
    %149 = math.tanh %148 : vector<8x8xf32>
    %cst_26 = arith.constant 1.000000e+00 : f32
    %150 = vector.broadcast %cst_26 : f32 to vector<8x8xf32>
    %151 = arith.addf %150, %149 : vector<8x8xf32>
    %152 = arith.mulf %141, %151 : vector<8x8xf32>
    %153 = arith.truncf %152 : vector<8x8xf32> to vector<8x8xbf16>
    %c16 = arith.constant 16 : index
    %c0_27 = arith.constant 0 : index
    %154 = vector.load %arg4[%c16, %c0_27] : memref<48x32xbf16, #tpu.memory_space<vmem>>, vector<8x32xbf16>
    %cst_28 = arith.constant dense<0.000000e+00> : vector<8x32xf32>
    %155 = tpu.matmul %153, %154, %cst_28 {dimension_numbers = #tpu.dot_dimension_numbers<[1], [0], [0], [1], [0, 0, 1, 1], [], []>} : vector<8x8xbf16>, vector<8x32xbf16>, vector<8x32xf32> -> vector<8x32xf32>
    %156 = arith.addf %106, %155 : vector<8x32xf32>
    %cst_29 = arith.constant 0.000000e+00 : f32
    %157 = vector.broadcast %cst_29 : f32 to vector<8x8xf32>
    %158 = vector.broadcast %2 : vector<1x8xf32> to vector<8x8xf32>
    %159 = arith.addf %157, %158 : vector<8x8xf32>
    %160 = vector.extract_strided_slice %0 {offsets = [0, 6], sizes = [8, 1], strides = [1, 1]} : vector<8x16xf32> to vector<8x1xf32>
    %161 = vector.extract_strided_slice %1 {offsets = [0, 0], sizes = [1, 8], strides = [1, 1]} : vector<5x8xf32> to vector<1x8xf32>
    %162 = vector.broadcast %160 : vector<8x1xf32> to vector<8x8xf32>
    %163 = vector.broadcast %161 : vector<1x8xf32> to vector<8x8xf32>
    %164 = arith.mulf %162, %163 : vector<8x8xf32>
    %165 = arith.addf %159, %164 : vector<8x8xf32>
    %166 = vector.extract_strided_slice %0 {offsets = [0, 7], sizes = [8, 1], strides = [1, 1]} : vector<8x16xf32> to vector<8x1xf32>
    %167 = vector.extract_strided_slice %1 {offsets = [1, 0], sizes = [1, 8], strides = [1, 1]} : vector<5x8xf32> to vector<1x8xf32>
    %168 = vector.broadcast %166 : vector<8x1xf32> to vector<8x8xf32>
    %169 = vector.broadcast %167 : vector<1x8xf32> to vector<8x8xf32>
    %170 = arith.mulf %168, %169 : vector<8x8xf32>
    %171 = arith.addf %165, %170 : vector<8x8xf32>
    %172 = vector.extract_strided_slice %0 {offsets = [0, 8], sizes = [8, 1], strides = [1, 1]} : vector<8x16xf32> to vector<8x1xf32>
    %173 = vector.extract_strided_slice %1 {offsets = [2, 0], sizes = [1, 8], strides = [1, 1]} : vector<5x8xf32> to vector<1x8xf32>
    %174 = vector.broadcast %172 : vector<8x1xf32> to vector<8x8xf32>
    %175 = vector.broadcast %173 : vector<1x8xf32> to vector<8x8xf32>
    %176 = arith.mulf %174, %175 : vector<8x8xf32>
    %177 = arith.addf %171, %176 : vector<8x8xf32>
    %178 = vector.extract_strided_slice %0 {offsets = [0, 9], sizes = [8, 1], strides = [1, 1]} : vector<8x16xf32> to vector<8x1xf32>
    %179 = vector.extract_strided_slice %1 {offsets = [3, 0], sizes = [1, 8], strides = [1, 1]} : vector<5x8xf32> to vector<1x8xf32>
    %180 = vector.broadcast %178 : vector<8x1xf32> to vector<8x8xf32>
    %181 = vector.broadcast %179 : vector<1x8xf32> to vector<8x8xf32>
    %182 = arith.mulf %180, %181 : vector<8x8xf32>
    %183 = arith.addf %177, %182 : vector<8x8xf32>
    %184 = vector.extract_strided_slice %0 {offsets = [0, 10], sizes = [8, 1], strides = [1, 1]} : vector<8x16xf32> to vector<8x1xf32>
    %185 = vector.extract_strided_slice %1 {offsets = [4, 0], sizes = [1, 8], strides = [1, 1]} : vector<5x8xf32> to vector<1x8xf32>
    %186 = vector.broadcast %184 : vector<8x1xf32> to vector<8x8xf32>
    %187 = vector.broadcast %185 : vector<1x8xf32> to vector<8x8xf32>
    %188 = arith.mulf %186, %187 : vector<8x8xf32>
    %189 = arith.addf %183, %188 : vector<8x8xf32>
    %cst_30 = arith.constant 5.000000e-01 : f32
    %190 = vector.broadcast %cst_30 : f32 to vector<8x8xf32>
    %191 = arith.mulf %190, %189 : vector<8x8xf32>
    %cst_31 = arith.constant 4.471500e-02 : f32
    %192 = vector.broadcast %cst_31 : f32 to vector<8x8xf32>
    %193 = arith.mulf %192, %189 : vector<8x8xf32>
    %194 = arith.mulf %193, %189 : vector<8x8xf32>
    %195 = arith.mulf %194, %189 : vector<8x8xf32>
    %196 = arith.addf %189, %195 : vector<8x8xf32>
    %cst_32 = arith.constant 0.797884583 : f32
    %197 = vector.broadcast %cst_32 : f32 to vector<8x8xf32>
    %198 = arith.mulf %197, %196 : vector<8x8xf32>
    %199 = math.tanh %198 : vector<8x8xf32>
    %cst_33 = arith.constant 1.000000e+00 : f32
    %200 = vector.broadcast %cst_33 : f32 to vector<8x8xf32>
    %201 = arith.addf %200, %199 : vector<8x8xf32>
    %202 = arith.mulf %191, %201 : vector<8x8xf32>
    %203 = arith.truncf %202 : vector<8x8xf32> to vector<8x8xbf16>
    %c24 = arith.constant 24 : index
    %c0_34 = arith.constant 0 : index
    %204 = vector.load %arg4[%c24, %c0_34] : memref<48x32xbf16, #tpu.memory_space<vmem>>, vector<8x32xbf16>
    %cst_35 = arith.constant dense<0.000000e+00> : vector<8x32xf32>
    %205 = tpu.matmul %203, %204, %cst_35 {dimension_numbers = #tpu.dot_dimension_numbers<[1], [0], [0], [1], [0, 0, 1, 1], [], []>} : vector<8x8xbf16>, vector<8x32xbf16>, vector<8x32xf32> -> vector<8x32xf32>
    %206 = arith.addf %156, %205 : vector<8x32xf32>
    %cst_36 = arith.constant 0.000000e+00 : f32
    %207 = vector.broadcast %cst_36 : f32 to vector<8x8xf32>
    %208 = vector.broadcast %2 : vector<1x8xf32> to vector<8x8xf32>
    %209 = arith.addf %207, %208 : vector<8x8xf32>
    %210 = vector.extract_strided_slice %0 {offsets = [0, 8], sizes = [8, 1], strides = [1, 1]} : vector<8x16xf32> to vector<8x1xf32>
    %211 = vector.extract_strided_slice %1 {offsets = [0, 0], sizes = [1, 8], strides = [1, 1]} : vector<5x8xf32> to vector<1x8xf32>
    %212 = vector.broadcast %210 : vector<8x1xf32> to vector<8x8xf32>
    %213 = vector.broadcast %211 : vector<1x8xf32> to vector<8x8xf32>
    %214 = arith.mulf %212, %213 : vector<8x8xf32>
    %215 = arith.addf %209, %214 : vector<8x8xf32>
    %216 = vector.extract_strided_slice %0 {offsets = [0, 9], sizes = [8, 1], strides = [1, 1]} : vector<8x16xf32> to vector<8x1xf32>
    %217 = vector.extract_strided_slice %1 {offsets = [1, 0], sizes = [1, 8], strides = [1, 1]} : vector<5x8xf32> to vector<1x8xf32>
    %218 = vector.broadcast %216 : vector<8x1xf32> to vector<8x8xf32>
    %219 = vector.broadcast %217 : vector<1x8xf32> to vector<8x8xf32>
    %220 = arith.mulf %218, %219 : vector<8x8xf32>
    %221 = arith.addf %215, %220 : vector<8x8xf32>
    %222 = vector.extract_strided_slice %0 {offsets = [0, 10], sizes = [8, 1], strides = [1, 1]} : vector<8x16xf32> to vector<8x1xf32>
    %223 = vector.extract_strided_slice %1 {offsets = [2, 0], sizes = [1, 8], strides = [1, 1]} : vector<5x8xf32> to vector<1x8xf32>
    %224 = vector.broadcast %222 : vector<8x1xf32> to vector<8x8xf32>
    %225 = vector.broadcast %223 : vector<1x8xf32> to vector<8x8xf32>
    %226 = arith.mulf %224, %225 : vector<8x8xf32>
    %227 = arith.addf %221, %226 : vector<8x8xf32>
    %228 = vector.extract_strided_slice %0 {offsets = [0, 11], sizes = [8, 1], strides = [1, 1]} : vector<8x16xf32> to vector<8x1xf32>
    %229 = vector.extract_strided_slice %1 {offsets = [3, 0], sizes = [1, 8], strides = [1, 1]} : vector<5x8xf32> to vector<1x8xf32>
    %230 = vector.broadcast %228 : vector<8x1xf32> to vector<8x8xf32>
    %231 = vector.broadcast %229 : vector<1x8xf32> to vector<8x8xf32>
    %232 = arith.mulf %230, %231 : vector<8x8xf32>
    %233 = arith.addf %227, %232 : vector<8x8xf32>
    %234 = vector.extract_strided_slice %0 {offsets = [0, 12], sizes = [8, 1], strides = [1, 1]} : vector<8x16xf32> to vector<8x1xf32>
    %235 = vector.extract_strided_slice %1 {offsets = [4, 0], sizes = [1, 8], strides = [1, 1]} : vector<5x8xf32> to vector<1x8xf32>
    %236 = vector.broadcast %234 : vector<8x1xf32> to vector<8x8xf32>
    %237 = vector.broadcast %235 : vector<1x8xf32> to vector<8x8xf32>
    %238 = arith.mulf %236, %237 : vector<8x8xf32>
    %239 = arith.addf %233, %238 : vector<8x8xf32>
    %cst_37 = arith.constant 5.000000e-01 : f32
    %240 = vector.broadcast %cst_37 : f32 to vector<8x8xf32>
    %241 = arith.mulf %240, %239 : vector<8x8xf32>
    %cst_38 = arith.constant 4.471500e-02 : f32
    %242 = vector.broadcast %cst_38 : f32 to vector<8x8xf32>
    %243 = arith.mulf %242, %239 : vector<8x8xf32>
    %244 = arith.mulf %243, %239 : vector<8x8xf32>
    %245 = arith.mulf %244, %239 : vector<8x8xf32>
    %246 = arith.addf %239, %245 : vector<8x8xf32>
    %cst_39 = arith.constant 0.797884583 : f32
    %247 = vector.broadcast %cst_39 : f32 to vector<8x8xf32>
    %248 = arith.mulf %247, %246 : vector<8x8xf32>
    %249 = math.tanh %248 : vector<8x8xf32>
    %cst_40 = arith.constant 1.000000e+00 : f32
    %250 = vector.broadcast %cst_40 : f32 to vector<8x8xf32>
    %251 = arith.addf %250, %249 : vector<8x8xf32>
    %252 = arith.mulf %241, %251 : vector<8x8xf32>
    %253 = arith.truncf %252 : vector<8x8xf32> to vector<8x8xbf16>
    %c32 = arith.constant 32 : index
    %c0_41 = arith.constant 0 : index
    %254 = vector.load %arg4[%c32, %c0_41] : memref<48x32xbf16, #tpu.memory_space<vmem>>, vector<8x32xbf16>
    %cst_42 = arith.constant dense<0.000000e+00> : vector<8x32xf32>
    %255 = tpu.matmul %253, %254, %cst_42 {dimension_numbers = #tpu.dot_dimension_numbers<[1], [0], [0], [1], [0, 0, 1, 1], [], []>} : vector<8x8xbf16>, vector<8x32xbf16>, vector<8x32xf32> -> vector<8x32xf32>
    %256 = arith.addf %206, %255 : vector<8x32xf32>
    %cst_43 = arith.constant 0.000000e+00 : f32
    %257 = vector.broadcast %cst_43 : f32 to vector<8x8xf32>
    %258 = vector.broadcast %2 : vector<1x8xf32> to vector<8x8xf32>
    %259 = arith.addf %257, %258 : vector<8x8xf32>
    %260 = vector.extract_strided_slice %0 {offsets = [0, 10], sizes = [8, 1], strides = [1, 1]} : vector<8x16xf32> to vector<8x1xf32>
    %261 = vector.extract_strided_slice %1 {offsets = [0, 0], sizes = [1, 8], strides = [1, 1]} : vector<5x8xf32> to vector<1x8xf32>
    %262 = vector.broadcast %260 : vector<8x1xf32> to vector<8x8xf32>
    %263 = vector.broadcast %261 : vector<1x8xf32> to vector<8x8xf32>
    %264 = arith.mulf %262, %263 : vector<8x8xf32>
    %265 = arith.addf %259, %264 : vector<8x8xf32>
    %266 = vector.extract_strided_slice %0 {offsets = [0, 11], sizes = [8, 1], strides = [1, 1]} : vector<8x16xf32> to vector<8x1xf32>
    %267 = vector.extract_strided_slice %1 {offsets = [1, 0], sizes = [1, 8], strides = [1, 1]} : vector<5x8xf32> to vector<1x8xf32>
    %268 = vector.broadcast %266 : vector<8x1xf32> to vector<8x8xf32>
    %269 = vector.broadcast %267 : vector<1x8xf32> to vector<8x8xf32>
    %270 = arith.mulf %268, %269 : vector<8x8xf32>
    %271 = arith.addf %265, %270 : vector<8x8xf32>
    %272 = vector.extract_strided_slice %0 {offsets = [0, 12], sizes = [8, 1], strides = [1, 1]} : vector<8x16xf32> to vector<8x1xf32>
    %273 = vector.extract_strided_slice %1 {offsets = [2, 0], sizes = [1, 8], strides = [1, 1]} : vector<5x8xf32> to vector<1x8xf32>
    %274 = vector.broadcast %272 : vector<8x1xf32> to vector<8x8xf32>
    %275 = vector.broadcast %273 : vector<1x8xf32> to vector<8x8xf32>
    %276 = arith.mulf %274, %275 : vector<8x8xf32>
    %277 = arith.addf %271, %276 : vector<8x8xf32>
    %278 = vector.extract_strided_slice %0 {offsets = [0, 13], sizes = [8, 1], strides = [1, 1]} : vector<8x16xf32> to vector<8x1xf32>
    %279 = vector.extract_strided_slice %1 {offsets = [3, 0], sizes = [1, 8], strides = [1, 1]} : vector<5x8xf32> to vector<1x8xf32>
    %280 = vector.broadcast %278 : vector<8x1xf32> to vector<8x8xf32>
    %281 = vector.broadcast %279 : vector<1x8xf32> to vector<8x8xf32>
    %282 = arith.mulf %280, %281 : vector<8x8xf32>
    %283 = arith.addf %277, %282 : vector<8x8xf32>
    %284 = vector.extract_strided_slice %0 {offsets = [0, 14], sizes = [8, 1], strides = [1, 1]} : vector<8x16xf32> to vector<8x1xf32>
    %285 = vector.extract_strided_slice %1 {offsets = [4, 0], sizes = [1, 8], strides = [1, 1]} : vector<5x8xf32> to vector<1x8xf32>
    %286 = vector.broadcast %284 : vector<8x1xf32> to vector<8x8xf32>
    %287 = vector.broadcast %285 : vector<1x8xf32> to vector<8x8xf32>
    %288 = arith.mulf %286, %287 : vector<8x8xf32>
    %289 = arith.addf %283, %288 : vector<8x8xf32>
    %cst_44 = arith.constant 5.000000e-01 : f32
    %290 = vector.broadcast %cst_44 : f32 to vector<8x8xf32>
    %291 = arith.mulf %290, %289 : vector<8x8xf32>
    %cst_45 = arith.constant 4.471500e-02 : f32
    %292 = vector.broadcast %cst_45 : f32 to vector<8x8xf32>
    %293 = arith.mulf %292, %289 : vector<8x8xf32>
    %294 = arith.mulf %293, %289 : vector<8x8xf32>
    %295 = arith.mulf %294, %289 : vector<8x8xf32>
    %296 = arith.addf %289, %295 : vector<8x8xf32>
    %cst_46 = arith.constant 0.797884583 : f32
    %297 = vector.broadcast %cst_46 : f32 to vector<8x8xf32>
    %298 = arith.mulf %297, %296 : vector<8x8xf32>
    %299 = math.tanh %298 : vector<8x8xf32>
    %cst_47 = arith.constant 1.000000e+00 : f32
    %300 = vector.broadcast %cst_47 : f32 to vector<8x8xf32>
    %301 = arith.addf %300, %299 : vector<8x8xf32>
    %302 = arith.mulf %291, %301 : vector<8x8xf32>
    %303 = arith.truncf %302 : vector<8x8xf32> to vector<8x8xbf16>
    %c40 = arith.constant 40 : index
    %c0_48 = arith.constant 0 : index
    %304 = vector.load %arg4[%c40, %c0_48] : memref<48x32xbf16, #tpu.memory_space<vmem>>, vector<8x32xbf16>
    %cst_49 = arith.constant dense<0.000000e+00> : vector<8x32xf32>
    %305 = tpu.matmul %303, %304, %cst_49 {dimension_numbers = #tpu.dot_dimension_numbers<[1], [0], [0], [1], [0, 0, 1, 1], [], []>} : vector<8x8xbf16>, vector<8x32xbf16>, vector<8x32xf32> -> vector<8x32xf32>
    %306 = arith.addf %256, %305 : vector<8x32xf32>
    %c0_50 = arith.constant 0 : index
    %c0_51 = arith.constant 0 : index
    %307 = vector.load %arg6[%c0_50, %c0_51] : memref<8x32xf32, #tpu.memory_space<vmem>>, vector<8x32xf32>
    tpu.vector_store %arg6[%c0_50, %c0_51], %306 {strides = array<i32>} : memref<8x32xf32, #tpu.memory_space<vmem>>, vector<8x32xf32>,
    return
  }
  func.func @transform_0(%arg0: i32) -> (i32, i32) {
    %c0_i32 = arith.constant 0 : i32
    %c0_i32_0 = arith.constant 0 : i32
    return %arg0, %c0_i32 : i32, i32
  }
  func.func @transform_1(%arg0: i32) -> (i32, i32) {
    %c0_i32 = arith.constant 0 : i32
    %c0_i32_0 = arith.constant 0 : i32
    %c0_i32_1 = arith.constant 0 : i32
    return %c0_i32, %c0_i32_0 : i32, i32
  }
  func.func @transform_2(%arg0: i32) -> (i32, i32) {
    %c0_i32 = arith.constant 0 : i32
    %c0_i32_0 = arith.constant 0 : i32
    %c0_i32_1 = arith.constant 0 : i32
    return %c0_i32, %c0_i32_0 : i32, i32
  }
  func.func @transform_3(%arg0: i32) -> (i32, i32) {
    %c0_i32 = arith.constant 0 : i32
    %c0_i32_0 = arith.constant 0 : i32
    %c0_i32_1 = arith.constant 0 : i32
    return %c0_i32, %c0_i32_0 : i32, i32
  }
  func.func @transform_4(%arg0: i32) -> (i32, i32) {
    %c0_i32 = arith.constant 0 : i32
    %c0_i32_0 = arith.constant 0 : i32
    %c0_i32_1 = arith.constant 0 : i32
    return %c0_i32, %c0_i32_0 : i32, i32
  }
  func.func @transform_5(%arg0: i32) -> (i32, i32) {
    %c0_i32 = arith.constant 0 : i32
    %c0_i32_0 = arith.constant 0 : i32
    return %arg0, %c0_i32 : i32, i32
  }
}

module attributes {stable_mosaic.version = 11 : i64} {
  func.func @_attention_kernel(%arg0: i32, %arg1: memref<1x2x4x16xf32, #tpu.memory_space<vmem>>, %arg2: memref<1x2x4x16xf32, #tpu.memory_space<vmem>>, %arg3: memref<1x2x4x16xf32, #tpu.memory_space<vmem>>, %arg4: memref<1x1x4x4xf32, #tpu.memory_space<vmem>>, %arg5: memref<1x2x4x16xf32, #tpu.memory_space<vmem>>) attributes {dimension_semantics = [#tpu.dimension_semantics<parallel>], iteration_bounds = array<i64: 2>, scalar_prefetch = 0 : i64, scratch_operands = 0 : i64, tpu.core_type = #tpu.core_type<tc>, window_params = [{transform_indices = @transform_0, window_bounds = array<i64: 1, 2, 4, 16>}, {transform_indices = @transform_1, window_bounds = array<i64: 1, 2, 4, 16>}, {transform_indices = @transform_2, window_bounds = array<i64: 1, 2, 4, 16>}, {transform_indices = @transform_3, window_bounds = array<i64: 1, 1, 4, 4>}, {transform_indices = @transform_4, window_bounds = array<i64: 1, 2, 4, 16>}]} {
    %c0 = arith.constant 0 : index
    %c0_0 = arith.constant 0 : index
    %c0_1 = arith.constant 0 : index
    %c0_2 = arith.constant 0 : index
    %0 = vector.load %arg1[%c0, %c0_0, %c0_1, %c0_2] : memref<1x2x4x16xf32, #tpu.memory_space<vmem>>, vector<1x2x4x16xf32>
    %1 = vector.shape_cast %0 : vector<1x2x4x16xf32> to vector<2x4x16xf32>
    %2 = arith.truncf %1 : vector<2x4x16xf32> to vector<2x4x16xbf16>
    %c0_3 = arith.constant 0 : index
    %c0_4 = arith.constant 0 : index
    %c0_5 = arith.constant 0 : index
    %c0_6 = arith.constant 0 : index
    %3 = vector.load %arg2[%c0_3, %c0_4, %c0_5, %c0_6] : memref<1x2x4x16xf32, #tpu.memory_space<vmem>>, vector<1x2x4x16xf32>
    %4 = vector.shape_cast %3 : vector<1x2x4x16xf32> to vector<2x4x16xf32>
    %5 = arith.truncf %4 : vector<2x4x16xf32> to vector<2x4x16xbf16>
    %c0_7 = arith.constant 0 : index
    %c0_8 = arith.constant 0 : index
    %c0_9 = arith.constant 0 : index
    %c0_10 = arith.constant 0 : index
    %6 = vector.load %arg3[%c0_7, %c0_8, %c0_9, %c0_10] : memref<1x2x4x16xf32, #tpu.memory_space<vmem>>, vector<1x2x4x16xf32>
    %7 = vector.shape_cast %6 : vector<1x2x4x16xf32> to vector<2x4x16xf32>
    %8 = arith.truncf %7 : vector<2x4x16xf32> to vector<2x4x16xbf16>
    "tpu.trace_start"() <{level = 10 : i32, message = "hqd,hkd->hqk"}> : () -> ()
    %cst = arith.constant dense<0.000000e+00> : vector<2x4x4xf32>
    %9 = tpu.matmul %2, %5, %cst {dimension_numbers = #tpu.dot_dimension_numbers<[2], [2], [1], [1], [0, 0, 0, 1, 1, 1], [0], [0]>} : vector<2x4x16xbf16>, vector<2x4x16xbf16>, vector<2x4x4xf32> -> vector<2x4x4xf32>
    "tpu.trace_stop"() : () -> ()
    %cst_11 = arith.constant 2.500000e-01 : f32
    %10 = vector.broadcast %cst_11 : f32 to vector<2x4x4xf32>
    %11 = arith.mulf %9, %10 : vector<2x4x4xf32>
    %c0_12 = arith.constant 0 : index
    %c0_13 = arith.constant 0 : index
    %c0_14 = arith.constant 0 : index
    %c0_15 = arith.constant 0 : index
    %12 = vector.load %arg4[%c0_12, %c0_13, %c0_14, %c0_15] : memref<1x1x4x4xf32, #tpu.memory_space<vmem>>, vector<1x1x4x4xf32>
    %13 = vector.shape_cast %12 : vector<1x1x4x4xf32> to vector<1x4x4xf32>
    %14 = vector.broadcast %13 : vector<1x4x4xf32> to vector<2x4x4xf32>
    %15 = arith.addf %11, %14 : vector<2x4x4xf32>
    %cst_16 = arith.constant dense<0xFF800000> : vector<2x4xf32>
    %16 = vector.multi_reduction <maximumf>, %15, %cst_16 [2] : vector<2x4x4xf32> to vector<2x4xf32>
    %17 = vector.shape_cast %16 : vector<2x4xf32> to vector<2x4x1xf32>
    %18 = vector.broadcast %17 : vector<2x4x1xf32> to vector<2x4x4xf32>
    %19 = arith.subf %15, %18 : vector<2x4x4xf32>
    %20 = math.exp %19 : vector<2x4x4xf32>
    %cst_17 = arith.constant dense<0.000000e+00> : vector<2x4xf32>
    %21 = vector.multi_reduction <add>, %20, %cst_17 [2] : vector<2x4x4xf32> to vector<2x4xf32>
    %22 = vector.shape_cast %21 : vector<2x4xf32> to vector<2x4x1xf32>
    %23 = tpu.reciprocal %22 {approx = true} : vector<2x4x1xf32> -> vector<2x4x1xf32>
    %24 = vector.broadcast %23 : vector<2x4x1xf32> to vector<2x4x4xf32>
    %25 = arith.mulf %20, %24 : vector<2x4x4xf32>
    %26 = arith.truncf %25 : vector<2x4x4xf32> to vector<2x4x4xbf16>
    "tpu.trace_start"() <{level = 10 : i32, message = "hqk,hkd->hqd"}> : () -> ()
    %cst_18 = arith.constant dense<0.000000e+00> : vector<2x4x16xf32>
    %27 = tpu.matmul %26, %8, %cst_18 {dimension_numbers = #tpu.dot_dimension_numbers<[2], [1], [1], [2], [0, 0, 0, 1, 1, 2], [0], [0]>} : vector<2x4x4xbf16>, vector<2x4x16xbf16>, vector<2x4x16xf32> -> vector<2x4x16xf32>
    "tpu.trace_stop"() : () -> ()
    %c0_19 = arith.constant 0 : index
    %c0_20 = arith.constant 0 : index
    %c0_21 = arith.constant 0 : index
    %c0_22 = arith.constant 0 : index
    %28 = vector.load %arg5[%c0_19, %c0_20, %c0_21, %c0_22] : memref<1x2x4x16xf32, #tpu.memory_space<vmem>>, vector<1x2x4x16xf32>
    %29 = vector.shape_cast %28 : vector<1x2x4x16xf32> to vector<2x4x16xf32>
    %30 = vector.shape_cast %27 : vector<2x4x16xf32> to vector<1x2x4x16xf32>
    tpu.vector_store %arg5[%c0_19, %c0_20, %c0_21, %c0_22], %30 {strides = array<i32>} : memref<1x2x4x16xf32, #tpu.memory_space<vmem>>, vector<1x2x4x16xf32>,
    return
  }
  func.func @transform_0(%arg0: i32) -> (i32, i32, i32, i32) {
    %c0_i32 = arith.constant 0 : i32
    %c0_i32_0 = arith.constant 0 : i32
    %c0_i32_1 = arith.constant 0 : i32
    %c0_i32_2 = arith.constant 0 : i32
    return %arg0, %c0_i32, %c0_i32_0, %c0_i32_1 : i32, i32, i32, i32
  }
  func.func @transform_1(%arg0: i32) -> (i32, i32, i32, i32) {
    %c0_i32 = arith.constant 0 : i32
    %c0_i32_0 = arith.constant 0 : i32
    %c0_i32_1 = arith.constant 0 : i32
    %c0_i32_2 = arith.constant 0 : i32
    return %arg0, %c0_i32, %c0_i32_0, %c0_i32_1 : i32, i32, i32, i32
  }
  func.func @transform_2(%arg0: i32) -> (i32, i32, i32, i32) {
    %c0_i32 = arith.constant 0 : i32
    %c0_i32_0 = arith.constant 0 : i32
    %c0_i32_1 = arith.constant 0 : i32
    %c0_i32_2 = arith.constant 0 : i32
    return %arg0, %c0_i32, %c0_i32_0, %c0_i32_1 : i32, i32, i32, i32
  }
  func.func @transform_3(%arg0: i32) -> (i32, i32, i32, i32) {
    %c0_i32 = arith.constant 0 : i32
    %c0_i32_0 = arith.constant 0 : i32
    %c0_i32_1 = arith.constant 0 : i32
    %c0_i32_2 = arith.constant 0 : i32
    return %arg0, %c0_i32, %c0_i32_0, %c0_i32_1 : i32, i32, i32, i32
  }
  func.func @transform_4(%arg0: i32) -> (i32, i32, i32, i32) {
    %c0_i32 = arith.constant 0 : i32
    %c0_i32_0 = arith.constant 0 : i32
    %c0_i32_1 = arith.constant 0 : i32
    %c0_i32_2 = arith.constant 0 : i32
    return %arg0, %c0_i32, %c0_i32_0, %c0_i32_1 : i32, i32, i32, i32
  }
}

module attributes {stable_mosaic.version = 11 : i64} {
  func.func @_linear_residual_kernel(%arg0: i32, %arg1: memref<8x32xf32, #tpu.memory_space<vmem>>, %arg2: memref<32x32xbf16, #tpu.memory_space<vmem>>, %arg3: memref<1x32xf32, #tpu.memory_space<vmem>>, %arg4: memref<8x32xf32, #tpu.memory_space<vmem>>, %arg5: memref<8x32xf32, #tpu.memory_space<vmem>>) attributes {dimension_semantics = [#tpu.dimension_semantics<parallel>], iteration_bounds = array<i64: 1>, scalar_prefetch = 0 : i64, scratch_operands = 0 : i64, tpu.core_type = #tpu.core_type<tc>, window_params = [{transform_indices = @transform_0, window_bounds = array<i64: 8, 32>}, {pipeline_mode = #tpu.pipeline_mode<synchronous>, transform_indices = @transform_1, window_bounds = array<i64: 32, 32>}, {pipeline_mode = #tpu.pipeline_mode<synchronous>, transform_indices = @transform_2, window_bounds = array<i64: 1, 32>}, {transform_indices = @transform_3, window_bounds = array<i64: 8, 32>}, {transform_indices = @transform_4, window_bounds = array<i64: 8, 32>}]} {
    %c0 = arith.constant 0 : index
    %c0_0 = arith.constant 0 : index
    %0 = vector.load %arg1[%c0, %c0_0] : memref<8x32xf32, #tpu.memory_space<vmem>>, vector<8x32xf32>
    %1 = arith.truncf %0 : vector<8x32xf32> to vector<8x32xbf16>
    %c0_1 = arith.constant 0 : index
    %c0_2 = arith.constant 0 : index
    %2 = vector.load %arg2[%c0_1, %c0_2] : memref<32x32xbf16, #tpu.memory_space<vmem>>, vector<32x32xbf16>
    %cst = arith.constant dense<0.000000e+00> : vector<8x32xf32>
    %3 = tpu.matmul %1, %2, %cst {dimension_numbers = #tpu.dot_dimension_numbers<[1], [0], [0], [1], [0, 0, 1, 1], [], []>} : vector<8x32xbf16>, vector<32x32xbf16>, vector<8x32xf32> -> vector<8x32xf32>
    %c0_3 = arith.constant 0 : index
    %c0_4 = arith.constant 0 : index
    %4 = vector.load %arg3[%c0_3, %c0_4] : memref<1x32xf32, #tpu.memory_space<vmem>>, vector<1x32xf32>
    %5 = vector.broadcast %4 : vector<1x32xf32> to vector<8x32xf32>
    %6 = arith.addf %3, %5 : vector<8x32xf32>
    %c0_5 = arith.constant 0 : index
    %c0_6 = arith.constant 0 : index
    %7 = vector.load %arg4[%c0_5, %c0_6] : memref<8x32xf32, #tpu.memory_space<vmem>>, vector<8x32xf32>
    %8 = arith.addf %7, %6 : vector<8x32xf32>
    %c0_7 = arith.constant 0 : index
    %c0_8 = arith.constant 0 : index
    %9 = vector.load %arg5[%c0_7, %c0_8] : memref<8x32xf32, #tpu.memory_space<vmem>>, vector<8x32xf32>
    tpu.vector_store %arg5[%c0_7, %c0_8], %8 {strides = array<i32>} : memref<8x32xf32, #tpu.memory_space<vmem>>, vector<8x32xf32>,
    return
  }
  func.func @transform_0(%arg0: i32) -> (i32, i32) {
    %c0_i32 = arith.constant 0 : i32
    %c0_i32_0 = arith.constant 0 : i32
    return %arg0, %c0_i32 : i32, i32
  }
  func.func @transform_1(%arg0: i32) -> (i32, i32) {
    %c0_i32 = arith.constant 0 : i32
    %c0_i32_0 = arith.constant 0 : i32
    %c0_i32_1 = arith.constant 0 : i32
    return %c0_i32, %c0_i32_0 : i32, i32
  }
  func.func @transform_2(%arg0: i32) -> (i32, i32) {
    %c0_i32 = arith.constant 0 : i32
    %c0_i32_0 = arith.constant 0 : i32
    %c0_i32_1 = arith.constant 0 : i32
    return %c0_i32, %c0_i32_0 : i32, i32
  }
  func.func @transform_3(%arg0: i32) -> (i32, i32) {
    %c0_i32 = arith.constant 0 : i32
    %c0_i32_0 = arith.constant 0 : i32
    return %arg0, %c0_i32 : i32, i32
  }
  func.func @transform_4(%arg0: i32) -> (i32, i32) {
    %c0_i32 = arith.constant 0 : i32
    %c0_i32_0 = arith.constant 0 : i32
    return %arg0, %c0_i32 : i32, i32
  }
}

module attributes {stable_mosaic.version = 11 : i64} {
  func.func @_ln_mlp_residual_kernel(%arg0: i32, %arg1: memref<8x32xf32, #tpu.memory_space<vmem>>, %arg2: memref<1x32xf32, #tpu.memory_space<vmem>>, %arg3: memref<1x32xf32, #tpu.memory_space<vmem>>, %arg4: memref<32x128xbf16, #tpu.memory_space<vmem>>, %arg5: memref<1x128xf32, #tpu.memory_space<vmem>>, %arg6: memref<128x32xbf16, #tpu.memory_space<vmem>>, %arg7: memref<1x32xf32, #tpu.memory_space<vmem>>, %arg8: memref<8x32xf32, #tpu.memory_space<vmem>>) attributes {dimension_semantics = [#tpu.dimension_semantics<parallel>], iteration_bounds = array<i64: 1>, scalar_prefetch = 0 : i64, scratch_operands = 0 : i64, tpu.core_type = #tpu.core_type<tc>, window_params = [{transform_indices = @transform_0, window_bounds = array<i64: 8, 32>}, {pipeline_mode = #tpu.pipeline_mode<synchronous>, transform_indices = @transform_1, window_bounds = array<i64: 1, 32>}, {pipeline_mode = #tpu.pipeline_mode<synchronous>, transform_indices = @transform_2, window_bounds = array<i64: 1, 32>}, {pipeline_mode = #tpu.pipeline_mode<synchronous>, transform_indices = @transform_3, window_bounds = array<i64: 32, 128>}, {pipeline_mode = #tpu.pipeline_mode<synchronous>, transform_indices = @transform_4, window_bounds = array<i64: 1, 128>}, {pipeline_mode = #tpu.pipeline_mode<synchronous>, transform_indices = @transform_5, window_bounds = array<i64: 128, 32>}, {pipeline_mode = #tpu.pipeline_mode<synchronous>, transform_indices = @transform_6, window_bounds = array<i64: 1, 32>}, {transform_indices = @transform_7, window_bounds = array<i64: 8, 32>}]} {
    %c0 = arith.constant 0 : index
    %c0_0 = arith.constant 0 : index
    %0 = vector.load %arg1[%c0, %c0_0] : memref<8x32xf32, #tpu.memory_space<vmem>>, vector<8x32xf32>
    %cst = arith.constant dense<0.000000e+00> : vector<8xf32>
    %1 = vector.multi_reduction <add>, %0, %cst [1] : vector<8x32xf32> to vector<8xf32>
    %2 = vector.shape_cast %1 : vector<8xf32> to vector<8x1xf32>
    %cst_1 = arith.constant 3.200000e+01 : f32
    %3 = vector.broadcast %cst_1 : f32 to vector<8x1xf32>
    %4 = arith.divf %2, %3 : vector<8x1xf32>
    %5 = vector.broadcast %4 : vector<8x1xf32> to vector<8x32xf32>
    %6 = arith.subf %0, %5 : vector<8x32xf32>
    %7 = arith.mulf %6, %6 : vector<8x32xf32>
    %cst_2 = arith.constant dense<0.000000e+00> : vector<8xf32>
    %8 = vector.multi_reduction <add>, %7, %cst_2 [1] : vector<8x32xf32> to vector<8xf32>
    %9 = vector.shape_cast %8 : vector<8xf32> to vector<8x1xf32>
    %cst_3 = arith.constant 3.200000e+01 : f32
    %10 = vector.broadcast %cst_3 : f32 to vector<8x1xf32>
    %11 = arith.divf %9, %10 : vector<8x1xf32>
    %12 = vector.broadcast %4 : vector<8x1xf32> to vector<8x32xf32>
    %13 = arith.subf %0, %12 : vector<8x32xf32>
    %cst_4 = arith.constant 9.99999974E-6 : f32
    %14 = vector.broadcast %cst_4 : f32 to vector<8x1xf32>
    %15 = arith.addf %11, %14 : vector<8x1xf32>
    %16 = math.rsqrt %15 : vector<8x1xf32>
    %17 = vector.broadcast %16 : vector<8x1xf32> to vector<8x32xf32>
    %18 = arith.mulf %13, %17 : vector<8x32xf32>
    %c0_5 = arith.constant 0 : index
    %c0_6 = arith.constant 0 : index
    %19 = vector.load %arg2[%c0_5, %c0_6] : memref<1x32xf32, #tpu.memory_space<vmem>>, vector<1x32xf32>
    %20 = vector.broadcast %19 : vector<1x32xf32> to vector<8x32xf32>
    %21 = arith.mulf %18, %20 : vector<8x32xf32>
    %c0_7 = arith.constant 0 : index
    %c0_8 = arith.constant 0 : index
    %22 = vector.load %arg3[%c0_7, %c0_8] : memref<1x32xf32, #tpu.memory_space<vmem>>, vector<1x32xf32>
    %23 = vector.broadcast %22 : vector<1x32xf32> to vector<8x32xf32>
    %24 = arith.addf %21, %23 : vector<8x32xf32>
    %25 = arith.truncf %24 : vector<8x32xf32> to vector<8x32xbf16>
    %c0_9 = arith.constant 0 : index
    %c0_10 = arith.constant 0 : index
    %26 = vector.load %arg4[%c0_9, %c0_10] : memref<32x128xbf16, #tpu.memory_space<vmem>>, vector<32x128xbf16>
    %cst_11 = arith.constant dense<0.000000e+00> : vector<8x128xf32>
    %27 = tpu.matmul %25, %26, %cst_11 {dimension_numbers = #tpu.dot_dimension_numbers<[1], [0], [0], [1], [0, 0, 1, 1], [], []>} : vector<8x32xbf16>, vector<32x128xbf16>, vector<8x128xf32> -> vector<8x128xf32>
    %c0_12 = arith.constant 0 : index
    %c0_13 = arith.constant 0 : index
    %28 = vector.load %arg5[%c0_12, %c0_13] : memref<1x128xf32, #tpu.memory_space<vmem>>, vector<1x128xf32>
    %29 = vector.broadcast %28 : vector<1x128xf32> to vector<8x128xf32>
    %30 = arith.addf %27, %29 : vector<8x128xf32>
    %cst_14 = arith.constant 5.000000e-01 : f32
    %31 = vector.broadcast %cst_14 : f32 to vector<8x128xf32>
    %32 = arith.mulf %31, %30 : vector<8x128xf32>
    %cst_15 = arith.constant 4.471500e-02 : f32
    %33 = vector.broadcast %cst_15 : f32 to vector<8x128xf32>
    %34 = arith.mulf %33, %30 : vector<8x128xf32>
    %35 = arith.mulf %34, %30 : vector<8x128xf32>
    %36 = arith.mulf %35, %30 : vector<8x128xf32>
    %37 = arith.addf %30, %36 : vector<8x128xf32>
    %cst_16 = arith.constant 0.797884583 : f32
    %38 = vector.broadcast %cst_16 : f32 to vector<8x128xf32>
    %39 = arith.mulf %38, %37 : vector<8x128xf32>
    %40 = math.tanh %39 : vector<8x128xf32>
    %cst_17 = arith.constant 1.000000e+00 : f32
    %41 = vector.broadcast %cst_17 : f32 to vector<8x128xf32>
    %42 = arith.addf %41, %40 : vector<8x128xf32>
    %43 = arith.mulf %32, %42 : vector<8x128xf32>
    %44 = arith.truncf %43 : vector<8x128xf32> to vector<8x128xbf16>
    %c0_18 = arith.constant 0 : index
    %c0_19 = arith.constant 0 : index
    %45 = vector.load %arg6[%c0_18, %c0_19] : memref<128x32xbf16, #tpu.memory_space<vmem>>, vector<128x32xbf16>
    %cst_20 = arith.constant dense<0.000000e+00> : vector<8x32xf32>
    %46 = tpu.matmul %44, %45, %cst_20 {dimension_numbers = #tpu.dot_dimension_numbers<[1], [0], [0], [1], [0, 0, 1, 1], [], []>} : vector<8x128xbf16>, vector<128x32xbf16>, vector<8x32xf32> -> vector<8x32xf32>
    %c0_21 = arith.constant 0 : index
    %c0_22 = arith.constant 0 : index
    %47 = vector.load %arg7[%c0_21, %c0_22] : memref<1x32xf32, #tpu.memory_space<vmem>>, vector<1x32xf32>
    %48 = vector.broadcast %47 : vector<1x32xf32> to vector<8x32xf32>
    %49 = arith.addf %46, %48 : vector<8x32xf32>
    %50 = arith.addf %0, %49 : vector<8x32xf32>
    %c0_23 = arith.constant 0 : index
    %c0_24 = arith.constant 0 : index
    %51 = vector.load %arg8[%c0_23, %c0_24] : memref<8x32xf32, #tpu.memory_space<vmem>>, vector<8x32xf32>
    tpu.vector_store %arg8[%c0_23, %c0_24], %50 {strides = array<i32>} : memref<8x32xf32, #tpu.memory_space<vmem>>, vector<8x32xf32>,
    return
  }
  func.func @transform_0(%arg0: i32) -> (i32, i32) {
    %c0_i32 = arith.constant 0 : i32
    %c0_i32_0 = arith.constant 0 : i32
    return %arg0, %c0_i32 : i32, i32
  }
  func.func @transform_1(%arg0: i32) -> (i32, i32) {
    %c0_i32 = arith.constant 0 : i32
    %c0_i32_0 = arith.constant 0 : i32
    %c0_i32_1 = arith.constant 0 : i32
    return %c0_i32, %c0_i32_0 : i32, i32
  }
  func.func @transform_2(%arg0: i32) -> (i32, i32) {
    %c0_i32 = arith.constant 0 : i32
    %c0_i32_0 = arith.constant 0 : i32
    %c0_i32_1 = arith.constant 0 : i32
    return %c0_i32, %c0_i32_0 : i32, i32
  }
  func.func @transform_3(%arg0: i32) -> (i32, i32) {
    %c0_i32 = arith.constant 0 : i32
    %c0_i32_0 = arith.constant 0 : i32
    %c0_i32_1 = arith.constant 0 : i32
    return %c0_i32, %c0_i32_0 : i32, i32
  }
  func.func @transform_4(%arg0: i32) -> (i32, i32) {
    %c0_i32 = arith.constant 0 : i32
    %c0_i32_0 = arith.constant 0 : i32
    %c0_i32_1 = arith.constant 0 : i32
    return %c0_i32, %c0_i32_0 : i32, i32
  }
  func.func @transform_5(%arg0: i32) -> (i32, i32) {
    %c0_i32 = arith.constant 0 : i32
    %c0_i32_0 = arith.constant 0 : i32
    %c0_i32_1 = arith.constant 0 : i32
    return %c0_i32, %c0_i32_0 : i32, i32
  }
  func.func @transform_6(%arg0: i32) -> (i32, i32) {
    %c0_i32 = arith.constant 0 : i32
    %c0_i32_0 = arith.constant 0 : i32
    %c0_i32_1 = arith.constant 0 : i32
    return %c0_i32, %c0_i32_0 : i32, i32
  }
  func.func @transform_7(%arg0: i32) -> (i32, i32) {
    %c0_i32 = arith.constant 0 : i32
    %c0_i32_0 = arith.constant 0 : i32
    return %arg0, %c0_i32 : i32, i32
  }
}

module attributes {stable_mosaic.version = 11 : i64} {
  func.func @_ln_linear_kernel(%arg0: i32, %arg1: memref<8x32xf32, #tpu.memory_space<vmem>>, %arg2: memref<1x32xf32, #tpu.memory_space<vmem>>, %arg3: memref<1x32xf32, #tpu.memory_space<vmem>>, %arg4: memref<32x64xbf16, #tpu.memory_space<vmem>>, %arg5: memref<1x64xf32, #tpu.memory_space<vmem>>, %arg6: memref<8x64xf32, #tpu.memory_space<vmem>>) attributes {dimension_semantics = [#tpu.dimension_semantics<parallel>], iteration_bounds = array<i64: 1>, scalar_prefetch = 0 : i64, scratch_operands = 0 : i64, tpu.core_type = #tpu.core_type<tc>, window_params = [{transform_indices = @transform_0, window_bounds = array<i64: 8, 32>}, {pipeline_mode = #tpu.pipeline_mode<synchronous>, transform_indices = @transform_1, window_bounds = array<i64: 1, 32>}, {pipeline_mode = #tpu.pipeline_mode<synchronous>, transform_indices = @transform_2, window_bounds = array<i64: 1, 32>}, {pipeline_mode = #tpu.pipeline_mode<synchronous>, transform_indices = @transform_3, window_bounds = array<i64: 32, 64>}, {pipeline_mode = #tpu.pipeline_mode<synchronous>, transform_indices = @transform_4, window_bounds = array<i64: 1, 64>}, {transform_indices = @transform_5, window_bounds = array<i64: 8, 64>}]} {
    %c0 = arith.constant 0 : index
    %c0_0 = arith.constant 0 : index
    %0 = vector.load %arg1[%c0, %c0_0] : memref<8x32xf32, #tpu.memory_space<vmem>>, vector<8x32xf32>
    %cst = arith.constant dense<0.000000e+00> : vector<8xf32>
    %1 = vector.multi_reduction <add>, %0, %cst [1] : vector<8x32xf32> to vector<8xf32>
    %2 = vector.shape_cast %1 : vector<8xf32> to vector<8x1xf32>
    %cst_1 = arith.constant 3.200000e+01 : f32
    %3 = vector.broadcast %cst_1 : f32 to vector<8x1xf32>
    %4 = arith.divf %2, %3 : vector<8x1xf32>
    %5 = vector.broadcast %4 : vector<8x1xf32> to vector<8x32xf32>
    %6 = arith.subf %0, %5 : vector<8x32xf32>
    %7 = arith.mulf %6, %6 : vector<8x32xf32>
    %cst_2 = arith.constant dense<0.000000e+00> : vector<8xf32>
    %8 = vector.multi_reduction <add>, %7, %cst_2 [1] : vector<8x32xf32> to vector<8xf32>
    %9 = vector.shape_cast %8 : vector<8xf32> to vector<8x1xf32>
    %cst_3 = arith.constant 3.200000e+01 : f32
    %10 = vector.broadcast %cst_3 : f32 to vector<8x1xf32>
    %11 = arith.divf %9, %10 : vector<8x1xf32>
    %12 = vector.broadcast %4 : vector<8x1xf32> to vector<8x32xf32>
    %13 = arith.subf %0, %12 : vector<8x32xf32>
    %cst_4 = arith.constant 9.99999974E-6 : f32
    %14 = vector.broadcast %cst_4 : f32 to vector<8x1xf32>
    %15 = arith.addf %11, %14 : vector<8x1xf32>
    %16 = math.rsqrt %15 : vector<8x1xf32>
    %17 = vector.broadcast %16 : vector<8x1xf32> to vector<8x32xf32>
    %18 = arith.mulf %13, %17 : vector<8x32xf32>
    %c0_5 = arith.constant 0 : index
    %c0_6 = arith.constant 0 : index
    %19 = vector.load %arg2[%c0_5, %c0_6] : memref<1x32xf32, #tpu.memory_space<vmem>>, vector<1x32xf32>
    %20 = vector.broadcast %19 : vector<1x32xf32> to vector<8x32xf32>
    %21 = arith.mulf %18, %20 : vector<8x32xf32>
    %c0_7 = arith.constant 0 : index
    %c0_8 = arith.constant 0 : index
    %22 = vector.load %arg3[%c0_7, %c0_8] : memref<1x32xf32, #tpu.memory_space<vmem>>, vector<1x32xf32>
    %23 = vector.broadcast %22 : vector<1x32xf32> to vector<8x32xf32>
    %24 = arith.addf %21, %23 : vector<8x32xf32>
    %25 = arith.truncf %24 : vector<8x32xf32> to vector<8x32xbf16>
    %c0_9 = arith.constant 0 : index
    %c0_10 = arith.constant 0 : index
    %26 = vector.load %arg4[%c0_9, %c0_10] : memref<32x64xbf16, #tpu.memory_space<vmem>>, vector<32x64xbf16>
    %cst_11 = arith.constant dense<0.000000e+00> : vector<8x64xf32>
    %27 = tpu.matmul %25, %26, %cst_11 {dimension_numbers = #tpu.dot_dimension_numbers<[1], [0], [0], [1], [0, 0, 1, 1], [], []>} : vector<8x32xbf16>, vector<32x64xbf16>, vector<8x64xf32> -> vector<8x64xf32>
    %c0_12 = arith.constant 0 : index
    %c0_13 = arith.constant 0 : index
    %28 = vector.load %arg5[%c0_12, %c0_13] : memref<1x64xf32, #tpu.memory_space<vmem>>, vector<1x64xf32>
    %29 = vector.broadcast %28 : vector<1x64xf32> to vector<8x64xf32>
    %30 = arith.addf %27, %29 : vector<8x64xf32>
    %cst_14 = arith.constant 5.000000e-01 : f32
    %31 = vector.broadcast %cst_14 : f32 to vector<8x64xf32>
    %32 = arith.mulf %31, %30 : vector<8x64xf32>
    %cst_15 = arith.constant 4.471500e-02 : f32
    %33 = vector.broadcast %cst_15 : f32 to vector<8x64xf32>
    %34 = arith.mulf %33, %30 : vector<8x64xf32>
    %35 = arith.mulf %34, %30 : vector<8x64xf32>
    %36 = arith.mulf %35, %30 : vector<8x64xf32>
    %37 = arith.addf %30, %36 : vector<8x64xf32>
    %cst_16 = arith.constant 0.797884583 : f32
    %38 = vector.broadcast %cst_16 : f32 to vector<8x64xf32>
    %39 = arith.mulf %38, %37 : vector<8x64xf32>
    %40 = math.tanh %39 : vector<8x64xf32>
    %cst_17 = arith.constant 1.000000e+00 : f32
    %41 = vector.broadcast %cst_17 : f32 to vector<8x64xf32>
    %42 = arith.addf %41, %40 : vector<8x64xf32>
    %43 = arith.mulf %32, %42 : vector<8x64xf32>
    %c0_18 = arith.constant 0 : index
    %c0_19 = arith.constant 0 : index
    %44 = vector.load %arg6[%c0_18, %c0_19] : memref<8x64xf32, #tpu.memory_space<vmem>>, vector<8x64xf32>
    tpu.vector_store %arg6[%c0_18, %c0_19], %43 {strides = array<i32>} : memref<8x64xf32, #tpu.memory_space<vmem>>, vector<8x64xf32>,
    return
  }
  func.func @transform_0(%arg0: i32) -> (i32, i32) {
    %c0_i32 = arith.constant 0 : i32
    %c0_i32_0 = arith.constant 0 : i32
    return %arg0, %c0_i32 : i32, i32
  }
  func.func @transform_1(%arg0: i32) -> (i32, i32) {
    %c0_i32 = arith.constant 0 : i32
    %c0_i32_0 = arith.constant 0 : i32
    %c0_i32_1 = arith.constant 0 : i32
    return %c0_i32, %c0_i32_0 : i32, i32
  }
  func.func @transform_2(%arg0: i32) -> (i32, i32) {
    %c0_i32 = arith.constant 0 : i32
    %c0_i32_0 = arith.constant 0 : i32
    %c0_i32_1 = arith.constant 0 : i32
    return %c0_i32, %c0_i32_0 : i32, i32
  }
  func.func @transform_3(%arg0: i32) -> (i32, i32) {
    %c0_i32 = arith.constant 0 : i32
    %c0_i32_0 = arith.constant 0 : i32
    %c0_i32_1 = arith.constant 0 : i32
    return %c0_i32, %c0_i32_0 : i32, i32
  }
  func.func @transform_4(%arg0: i32) -> (i32, i32) {
    %c0_i32 = arith.constant 0 : i32
    %c0_i32_0 = arith.constant 0 : i32
    %c0_i32_1 = arith.constant 0 : i32
    return %c0_i32, %c0_i32_0 : i32, i32
  }
  func.func @transform_5(%arg0: i32) -> (i32, i32) {
    %c0_i32 = arith.constant 0 : i32
    %c0_i32_0 = arith.constant 0 : i32
    return %arg0, %c0_i32 : i32, i32
  }
}

module attributes {stable_mosaic.version = 11 : i64} {
  func.func @_ln_linear_kernel(%arg0: i32, %arg1: memref<24x64xf32, #tpu.memory_space<vmem>>, %arg2: memref<1x64xf32, #tpu.memory_space<vmem>>, %arg3: memref<1x64xf32, #tpu.memory_space<vmem>>, %arg4: memref<64x192xbf16, #tpu.memory_space<vmem>>, %arg5: memref<1x192xf32, #tpu.memory_space<vmem>>, %arg6: memref<24x192xf32, #tpu.memory_space<vmem>>) attributes {dimension_semantics = [#tpu.dimension_semantics<parallel>], iteration_bounds = array<i64: 1>, scalar_prefetch = 0 : i64, scratch_operands = 0 : i64, tpu.core_type = #tpu.core_type<tc>, window_params = [{transform_indices = @transform_0, window_bounds = array<i64: 24, 64>}, {pipeline_mode = #tpu.pipeline_mode<synchronous>, transform_indices = @transform_1, window_bounds = array<i64: 1, 64>}, {pipeline_mode = #tpu.pipeline_mode<synchronous>, transform_indices = @transform_2, window_bounds = array<i64: 1, 64>}, {pipeline_mode = #tpu.pipeline_mode<synchronous>, transform_indices = @transform_3, window_bounds = array<i64: 64, 192>}, {pipeline_mode = #tpu.pipeline_mode<synchronous>, transform_indices = @transform_4, window_bounds = array<i64: 1, 192>}, {transform_indices = @transform_5, window_bounds = array<i64: 24, 192>}]} {
    %c0 = arith.constant 0 : index
    %c0_0 = arith.constant 0 : index
    %0 = vector.load %arg1[%c0, %c0_0] : memref<24x64xf32, #tpu.memory_space<vmem>>, vector<24x64xf32>
    %cst = arith.constant dense<0.000000e+00> : vector<24xf32>
    %1 = vector.multi_reduction <add>, %0, %cst [1] : vector<24x64xf32> to vector<24xf32>
    %2 = vector.shape_cast %1 : vector<24xf32> to vector<24x1xf32>
    %cst_1 = arith.constant 6.400000e+01 : f32
    %3 = vector.broadcast %cst_1 : f32 to vector<24x1xf32>
    %4 = arith.divf %2, %3 : vector<24x1xf32>
    %5 = vector.broadcast %4 : vector<24x1xf32> to vector<24x64xf32>
    %6 = arith.subf %0, %5 : vector<24x64xf32>
    %7 = arith.mulf %6, %6 : vector<24x64xf32>
    %cst_2 = arith.constant dense<0.000000e+00> : vector<24xf32>
    %8 = vector.multi_reduction <add>, %7, %cst_2 [1] : vector<24x64xf32> to vector<24xf32>
    %9 = vector.shape_cast %8 : vector<24xf32> to vector<24x1xf32>
    %cst_3 = arith.constant 6.400000e+01 : f32
    %10 = vector.broadcast %cst_3 : f32 to vector<24x1xf32>
    %11 = arith.divf %9, %10 : vector<24x1xf32>
    %12 = vector.broadcast %4 : vector<24x1xf32> to vector<24x64xf32>
    %13 = arith.subf %0, %12 : vector<24x64xf32>
    %cst_4 = arith.constant 9.99999974E-6 : f32
    %14 = vector.broadcast %cst_4 : f32 to vector<24x1xf32>
    %15 = arith.addf %11, %14 : vector<24x1xf32>
    %16 = math.rsqrt %15 : vector<24x1xf32>
    %17 = vector.broadcast %16 : vector<24x1xf32> to vector<24x64xf32>
    %18 = arith.mulf %13, %17 : vector<24x64xf32>
    %c0_5 = arith.constant 0 : index
    %c0_6 = arith.constant 0 : index
    %19 = vector.load %arg2[%c0_5, %c0_6] : memref<1x64xf32, #tpu.memory_space<vmem>>, vector<1x64xf32>
    %20 = vector.broadcast %19 : vector<1x64xf32> to vector<24x64xf32>
    %21 = arith.mulf %18, %20 : vector<24x64xf32>
    %c0_7 = arith.constant 0 : index
    %c0_8 = arith.constant 0 : index
    %22 = vector.load %arg3[%c0_7, %c0_8] : memref<1x64xf32, #tpu.memory_space<vmem>>, vector<1x64xf32>
    %23 = vector.broadcast %22 : vector<1x64xf32> to vector<24x64xf32>
    %24 = arith.addf %21, %23 : vector<24x64xf32>
    %25 = arith.truncf %24 : vector<24x64xf32> to vector<24x64xbf16>
    %c0_9 = arith.constant 0 : index
    %c0_10 = arith.constant 0 : index
    %26 = vector.load %arg4[%c0_9, %c0_10] : memref<64x192xbf16, #tpu.memory_space<vmem>>, vector<64x192xbf16>
    %cst_11 = arith.constant dense<0.000000e+00> : vector<24x192xf32>
    %27 = tpu.matmul %25, %26, %cst_11 {dimension_numbers = #tpu.dot_dimension_numbers<[1], [0], [0], [1], [0, 0, 1, 1], [], []>} : vector<24x64xbf16>, vector<64x192xbf16>, vector<24x192xf32> -> vector<24x192xf32>
    %c0_12 = arith.constant 0 : index
    %c0_13 = arith.constant 0 : index
    %28 = vector.load %arg5[%c0_12, %c0_13] : memref<1x192xf32, #tpu.memory_space<vmem>>, vector<1x192xf32>
    %29 = vector.broadcast %28 : vector<1x192xf32> to vector<24x192xf32>
    %30 = arith.addf %27, %29 : vector<24x192xf32>
    %c0_14 = arith.constant 0 : index
    %c0_15 = arith.constant 0 : index
    %31 = vector.load %arg6[%c0_14, %c0_15] : memref<24x192xf32, #tpu.memory_space<vmem>>, vector<24x192xf32>
    tpu.vector_store %arg6[%c0_14, %c0_15], %30 {strides = array<i32>} : memref<24x192xf32, #tpu.memory_space<vmem>>, vector<24x192xf32>,
    return
  }
  func.func @transform_0(%arg0: i32) -> (i32, i32) {
    %c0_i32 = arith.constant 0 : i32
    %c0_i32_0 = arith.constant 0 : i32
    return %arg0, %c0_i32 : i32, i32
  }
  func.func @transform_1(%arg0: i32) -> (i32, i32) {
    %c0_i32 = arith.constant 0 : i32
    %c0_i32_0 = arith.constant 0 : i32
    %c0_i32_1 = arith.constant 0 : i32
    return %c0_i32, %c0_i32_0 : i32, i32
  }
  func.func @transform_2(%arg0: i32) -> (i32, i32) {
    %c0_i32 = arith.constant 0 : i32
    %c0_i32_0 = arith.constant 0 : i32
    %c0_i32_1 = arith.constant 0 : i32
    return %c0_i32, %c0_i32_0 : i32, i32
  }
  func.func @transform_3(%arg0: i32) -> (i32, i32) {
    %c0_i32 = arith.constant 0 : i32
    %c0_i32_0 = arith.constant 0 : i32
    %c0_i32_1 = arith.constant 0 : i32
    return %c0_i32, %c0_i32_0 : i32, i32
  }
  func.func @transform_4(%arg0: i32) -> (i32, i32) {
    %c0_i32 = arith.constant 0 : i32
    %c0_i32_0 = arith.constant 0 : i32
    %c0_i32_1 = arith.constant 0 : i32
    return %c0_i32, %c0_i32_0 : i32, i32
  }
  func.func @transform_5(%arg0: i32) -> (i32, i32) {
    %c0_i32 = arith.constant 0 : i32
    %c0_i32_0 = arith.constant 0 : i32
    return %arg0, %c0_i32 : i32, i32
  }
}

module attributes {stable_mosaic.version = 11 : i64} {
  func.func @_attention_kernel(%arg0: i32, %arg1: memref<1x2x12x32xf32, #tpu.memory_space<vmem>>, %arg2: memref<1x2x12x32xf32, #tpu.memory_space<vmem>>, %arg3: memref<1x2x12x32xf32, #tpu.memory_space<vmem>>, %arg4: memref<1x1x12x12xf32, #tpu.memory_space<vmem>>, %arg5: memref<1x2x12x32xf32, #tpu.memory_space<vmem>>) attributes {dimension_semantics = [#tpu.dimension_semantics<parallel>], iteration_bounds = array<i64: 2>, scalar_prefetch = 0 : i64, scratch_operands = 0 : i64, tpu.core_type = #tpu.core_type<tc>, window_params = [{transform_indices = @transform_0, window_bounds = array<i64: 1, 2, 12, 32>}, {transform_indices = @transform_1, window_bounds = array<i64: 1, 2, 12, 32>}, {transform_indices = @transform_2, window_bounds = array<i64: 1, 2, 12, 32>}, {transform_indices = @transform_3, window_bounds = array<i64: 1, 1, 12, 12>}, {transform_indices = @transform_4, window_bounds = array<i64: 1, 2, 12, 32>}]} {
    %c0 = arith.constant 0 : index
    %c0_0 = arith.constant 0 : index
    %c0_1 = arith.constant 0 : index
    %c0_2 = arith.constant 0 : index
    %0 = vector.load %arg1[%c0, %c0_0, %c0_1, %c0_2] : memref<1x2x12x32xf32, #tpu.memory_space<vmem>>, vector<1x2x12x32xf32>
    %1 = vector.shape_cast %0 : vector<1x2x12x32xf32> to vector<2x12x32xf32>
    %2 = arith.truncf %1 : vector<2x12x32xf32> to vector<2x12x32xbf16>
    %c0_3 = arith.constant 0 : index
    %c0_4 = arith.constant 0 : index
    %c0_5 = arith.constant 0 : index
    %c0_6 = arith.constant 0 : index
    %3 = vector.load %arg2[%c0_3, %c0_4, %c0_5, %c0_6] : memref<1x2x12x32xf32, #tpu.memory_space<vmem>>, vector<1x2x12x32xf32>
    %4 = vector.shape_cast %3 : vector<1x2x12x32xf32> to vector<2x12x32xf32>
    %5 = arith.truncf %4 : vector<2x12x32xf32> to vector<2x12x32xbf16>
    %c0_7 = arith.constant 0 : index
    %c0_8 = arith.constant 0 : index
    %c0_9 = arith.constant 0 : index
    %c0_10 = arith.constant 0 : index
    %6 = vector.load %arg3[%c0_7, %c0_8, %c0_9, %c0_10] : memref<1x2x12x32xf32, #tpu.memory_space<vmem>>, vector<1x2x12x32xf32>
    %7 = vector.shape_cast %6 : vector<1x2x12x32xf32> to vector<2x12x32xf32>
    %8 = arith.truncf %7 : vector<2x12x32xf32> to vector<2x12x32xbf16>
    "tpu.trace_start"() <{level = 10 : i32, message = "hqd,hkd->hqk"}> : () -> ()
    %cst = arith.constant dense<0.000000e+00> : vector<2x12x12xf32>
    %9 = tpu.matmul %2, %5, %cst {dimension_numbers = #tpu.dot_dimension_numbers<[2], [2], [1], [1], [0, 0, 0, 1, 1, 1], [0], [0]>} : vector<2x12x32xbf16>, vector<2x12x32xbf16>, vector<2x12x12xf32> -> vector<2x12x12xf32>
    "tpu.trace_stop"() : () -> ()
    %cst_11 = arith.constant 0.176776692 : f32
    %10 = vector.broadcast %cst_11 : f32 to vector<2x12x12xf32>
    %11 = arith.mulf %9, %10 : vector<2x12x12xf32>
    %c0_12 = arith.constant 0 : index
    %c0_13 = arith.constant 0 : index
    %c0_14 = arith.constant 0 : index
    %c0_15 = arith.constant 0 : index
    %12 = vector.load %arg4[%c0_12, %c0_13, %c0_14, %c0_15] : memref<1x1x12x12xf32, #tpu.memory_space<vmem>>, vector<1x1x12x12xf32>
    %13 = vector.shape_cast %12 : vector<1x1x12x12xf32> to vector<1x12x12xf32>
    %14 = vector.broadcast %13 : vector<1x12x12xf32> to vector<2x12x12xf32>
    %15 = arith.addf %11, %14 : vector<2x12x12xf32>
    %cst_16 = arith.constant dense<0xFF800000> : vector<2x12xf32>
    %16 = vector.multi_reduction <maximumf>, %15, %cst_16 [2] : vector<2x12x12xf32> to vector<2x12xf32>
    %17 = vector.shape_cast %16 : vector<2x12xf32> to vector<2x12x1xf32>
    %18 = vector.broadcast %17 : vector<2x12x1xf32> to vector<2x12x12xf32>
    %19 = arith.subf %15, %18 : vector<2x12x12xf32>
    %20 = math.exp %19 : vector<2x12x12xf32>
    %cst_17 = arith.constant dense<0.000000e+00> : vector<2x12xf32>
    %21 = vector.multi_reduction <add>, %20, %cst_17 [2] : vector<2x12x12xf32> to vector<2x12xf32>
    %22 = vector.shape_cast %21 : vector<2x12xf32> to vector<2x12x1xf32>
    %23 = tpu.reciprocal %22 {approx = true} : vector<2x12x1xf32> -> vector<2x12x1xf32>
    %24 = vector.broadcast %23 : vector<2x12x1xf32> to vector<2x12x12xf32>
    %25 = arith.mulf %20, %24 : vector<2x12x12xf32>
    %26 = arith.truncf %25 : vector<2x12x12xf32> to vector<2x12x12xbf16>
    "tpu.trace_start"() <{level = 10 : i32, message = "hqk,hkd->hqd"}> : () -> ()
    %cst_18 = arith.constant dense<0.000000e+00> : vector<2x12x32xf32>
    %27 = tpu.matmul %26, %8, %cst_18 {dimension_numbers = #tpu.dot_dimension_numbers<[2], [1], [1], [2], [0, 0, 0, 1, 1, 2], [0], [0]>} : vector<2x12x12xbf16>, vector<2x12x32xbf16>, vector<2x12x32xf32> -> vector<2x12x32xf32>
    "tpu.trace_stop"() : () -> ()
    %c0_19 = arith.constant 0 : index
    %c0_20 = arith.constant 0 : index
    %c0_21 = arith.constant 0 : index
    %c0_22 = arith.constant 0 : index
    %28 = vector.load %arg5[%c0_19, %c0_20, %c0_21, %c0_22] : memref<1x2x12x32xf32, #tpu.memory_space<vmem>>, vector<1x2x12x32xf32>
    %29 = vector.shape_cast %28 : vector<1x2x12x32xf32> to vector<2x12x32xf32>
    %30 = vector.shape_cast %27 : vector<2x12x32xf32> to vector<1x2x12x32xf32>
    tpu.vector_store %arg5[%c0_19, %c0_20, %c0_21, %c0_22], %30 {strides = array<i32>} : memref<1x2x12x32xf32, #tpu.memory_space<vmem>>, vector<1x2x12x32xf32>,
    return
  }
  func.func @transform_0(%arg0: i32) -> (i32, i32, i32, i32) {
    %c0_i32 = arith.constant 0 : i32
    %c0_i32_0 = arith.constant 0 : i32
    %c0_i32_1 = arith.constant 0 : i32
    %c0_i32_2 = arith.constant 0 : i32
    return %arg0, %c0_i32, %c0_i32_0, %c0_i32_1 : i32, i32, i32, i32
  }
  func.func @transform_1(%arg0: i32) -> (i32, i32, i32, i32) {
    %c0_i32 = arith.constant 0 : i32
    %c0_i32_0 = arith.constant 0 : i32
    %c0_i32_1 = arith.constant 0 : i32
    %c0_i32_2 = arith.constant 0 : i32
    return %arg0, %c0_i32, %c0_i32_0, %c0_i32_1 : i32, i32, i32, i32
  }
  func.func @transform_2(%arg0: i32) -> (i32, i32, i32, i32) {
    %c0_i32 = arith.constant 0 : i32
    %c0_i32_0 = arith.constant 0 : i32
    %c0_i32_1 = arith.constant 0 : i32
    %c0_i32_2 = arith.constant 0 : i32
    return %arg0, %c0_i32, %c0_i32_0, %c0_i32_1 : i32, i32, i32, i32
  }
  func.func @transform_3(%arg0: i32) -> (i32, i32, i32, i32) {
    %c0_i32 = arith.constant 0 : i32
    %c0_i32_0 = arith.constant 0 : i32
    %c0_i32_1 = arith.constant 0 : i32
    %c0_i32_2 = arith.constant 0 : i32
    return %arg0, %c0_i32, %c0_i32_0, %c0_i32_1 : i32, i32, i32, i32
  }
  func.func @transform_4(%arg0: i32) -> (i32, i32, i32, i32) {
    %c0_i32 = arith.constant 0 : i32
    %c0_i32_0 = arith.constant 0 : i32
    %c0_i32_1 = arith.constant 0 : i32
    %c0_i32_2 = arith.constant 0 : i32
    return %arg0, %c0_i32, %c0_i32_0, %c0_i32_1 : i32, i32, i32, i32
  }
}

module attributes {stable_mosaic.version = 11 : i64} {
  func.func @_linear_residual_kernel(%arg0: i32, %arg1: memref<24x64xf32, #tpu.memory_space<vmem>>, %arg2: memref<64x64xbf16, #tpu.memory_space<vmem>>, %arg3: memref<1x64xf32, #tpu.memory_space<vmem>>, %arg4: memref<24x64xf32, #tpu.memory_space<vmem>>, %arg5: memref<24x64xf32, #tpu.memory_space<vmem>>) attributes {dimension_semantics = [#tpu.dimension_semantics<parallel>], iteration_bounds = array<i64: 1>, scalar_prefetch = 0 : i64, scratch_operands = 0 : i64, tpu.core_type = #tpu.core_type<tc>, window_params = [{transform_indices = @transform_0, window_bounds = array<i64: 24, 64>}, {pipeline_mode = #tpu.pipeline_mode<synchronous>, transform_indices = @transform_1, window_bounds = array<i64: 64, 64>}, {pipeline_mode = #tpu.pipeline_mode<synchronous>, transform_indices = @transform_2, window_bounds = array<i64: 1, 64>}, {transform_indices = @transform_3, window_bounds = array<i64: 24, 64>}, {transform_indices = @transform_4, window_bounds = array<i64: 24, 64>}]} {
    %c0 = arith.constant 0 : index
    %c0_0 = arith.constant 0 : index
    %0 = vector.load %arg1[%c0, %c0_0] : memref<24x64xf32, #tpu.memory_space<vmem>>, vector<24x64xf32>
    %1 = arith.truncf %0 : vector<24x64xf32> to vector<24x64xbf16>
    %c0_1 = arith.constant 0 : index
    %c0_2 = arith.constant 0 : index
    %2 = vector.load %arg2[%c0_1, %c0_2] : memref<64x64xbf16, #tpu.memory_space<vmem>>, vector<64x64xbf16>
    %cst = arith.constant dense<0.000000e+00> : vector<24x64xf32>
    %3 = tpu.matmul %1, %2, %cst {dimension_numbers = #tpu.dot_dimension_numbers<[1], [0], [0], [1], [0, 0, 1, 1], [], []>} : vector<24x64xbf16>, vector<64x64xbf16>, vector<24x64xf32> -> vector<24x64xf32>
    %c0_3 = arith.constant 0 : index
    %c0_4 = arith.constant 0 : index
    %4 = vector.load %arg3[%c0_3, %c0_4] : memref<1x64xf32, #tpu.memory_space<vmem>>, vector<1x64xf32>
    %5 = vector.broadcast %4 : vector<1x64xf32> to vector<24x64xf32>
    %6 = arith.addf %3, %5 : vector<24x64xf32>
    %c0_5 = arith.constant 0 : index
    %c0_6 = arith.constant 0 : index
    %7 = vector.load %arg4[%c0_5, %c0_6] : memref<24x64xf32, #tpu.memory_space<vmem>>, vector<24x64xf32>
    %8 = arith.addf %7, %6 : vector<24x64xf32>
    %c0_7 = arith.constant 0 : index
    %c0_8 = arith.constant 0 : index
    %9 = vector.load %arg5[%c0_7, %c0_8] : memref<24x64xf32, #tpu.memory_space<vmem>>, vector<24x64xf32>
    tpu.vector_store %arg5[%c0_7, %c0_8], %8 {strides = array<i32>} : memref<24x64xf32, #tpu.memory_space<vmem>>, vector<24x64xf32>,
    return
  }
  func.func @transform_0(%arg0: i32) -> (i32, i32) {
    %c0_i32 = arith.constant 0 : i32
    %c0_i32_0 = arith.constant 0 : i32
    return %arg0, %c0_i32 : i32, i32
  }
  func.func @transform_1(%arg0: i32) -> (i32, i32) {
    %c0_i32 = arith.constant 0 : i32
    %c0_i32_0 = arith.constant 0 : i32
    %c0_i32_1 = arith.constant 0 : i32
    return %c0_i32, %c0_i32_0 : i32, i32
  }
  func.func @transform_2(%arg0: i32) -> (i32, i32) {
    %c0_i32 = arith.constant 0 : i32
    %c0_i32_0 = arith.constant 0 : i32
    %c0_i32_1 = arith.constant 0 : i32
    return %c0_i32, %c0_i32_0 : i32, i32
  }
  func.func @transform_3(%arg0: i32) -> (i32, i32) {
    %c0_i32 = arith.constant 0 : i32
    %c0_i32_0 = arith.constant 0 : i32
    return %arg0, %c0_i32 : i32, i32
  }
  func.func @transform_4(%arg0: i32) -> (i32, i32) {
    %c0_i32 = arith.constant 0 : i32
    %c0_i32_0 = arith.constant 0 : i32
    return %arg0, %c0_i32 : i32, i32
  }
}

module attributes {stable_mosaic.version = 11 : i64} {
  func.func @_ln_mlp_residual_kernel(%arg0: i32, %arg1: memref<24x64xf32, #tpu.memory_space<vmem>>, %arg2: memref<1x64xf32, #tpu.memory_space<vmem>>, %arg3: memref<1x64xf32, #tpu.memory_space<vmem>>, %arg4: memref<64x256xbf16, #tpu.memory_space<vmem>>, %arg5: memref<1x256xf32, #tpu.memory_space<vmem>>, %arg6: memref<256x64xbf16, #tpu.memory_space<vmem>>, %arg7: memref<1x64xf32, #tpu.memory_space<vmem>>, %arg8: memref<24x64xf32, #tpu.memory_space<vmem>>) attributes {dimension_semantics = [#tpu.dimension_semantics<parallel>], iteration_bounds = array<i64: 1>, scalar_prefetch = 0 : i64, scratch_operands = 0 : i64, tpu.core_type = #tpu.core_type<tc>, window_params = [{transform_indices = @transform_0, window_bounds = array<i64: 24, 64>}, {pipeline_mode = #tpu.pipeline_mode<synchronous>, transform_indices = @transform_1, window_bounds = array<i64: 1, 64>}, {pipeline_mode = #tpu.pipeline_mode<synchronous>, transform_indices = @transform_2, window_bounds = array<i64: 1, 64>}, {pipeline_mode = #tpu.pipeline_mode<synchronous>, transform_indices = @transform_3, window_bounds = array<i64: 64, 256>}, {pipeline_mode = #tpu.pipeline_mode<synchronous>, transform_indices = @transform_4, window_bounds = array<i64: 1, 256>}, {pipeline_mode = #tpu.pipeline_mode<synchronous>, transform_indices = @transform_5, window_bounds = array<i64: 256, 64>}, {pipeline_mode = #tpu.pipeline_mode<synchronous>, transform_indices = @transform_6, window_bounds = array<i64: 1, 64>}, {transform_indices = @transform_7, window_bounds = array<i64: 24, 64>}]} {
    %c0 = arith.constant 0 : index
    %c0_0 = arith.constant 0 : index
    %0 = vector.load %arg1[%c0, %c0_0] : memref<24x64xf32, #tpu.memory_space<vmem>>, vector<24x64xf32>
    %cst = arith.constant dense<0.000000e+00> : vector<24xf32>
    %1 = vector.multi_reduction <add>, %0, %cst [1] : vector<24x64xf32> to vector<24xf32>
    %2 = vector.shape_cast %1 : vector<24xf32> to vector<24x1xf32>
    %cst_1 = arith.constant 6.400000e+01 : f32
    %3 = vector.broadcast %cst_1 : f32 to vector<24x1xf32>
    %4 = arith.divf %2, %3 : vector<24x1xf32>
    %5 = vector.broadcast %4 : vector<24x1xf32> to vector<24x64xf32>
    %6 = arith.subf %0, %5 : vector<24x64xf32>
    %7 = arith.mulf %6, %6 : vector<24x64xf32>
    %cst_2 = arith.constant dense<0.000000e+00> : vector<24xf32>
    %8 = vector.multi_reduction <add>, %7, %cst_2 [1] : vector<24x64xf32> to vector<24xf32>
    %9 = vector.shape_cast %8 : vector<24xf32> to vector<24x1xf32>
    %cst_3 = arith.constant 6.400000e+01 : f32
    %10 = vector.broadcast %cst_3 : f32 to vector<24x1xf32>
    %11 = arith.divf %9, %10 : vector<24x1xf32>
    %12 = vector.broadcast %4 : vector<24x1xf32> to vector<24x64xf32>
    %13 = arith.subf %0, %12 : vector<24x64xf32>
    %cst_4 = arith.constant 9.99999974E-6 : f32
    %14 = vector.broadcast %cst_4 : f32 to vector<24x1xf32>
    %15 = arith.addf %11, %14 : vector<24x1xf32>
    %16 = math.rsqrt %15 : vector<24x1xf32>
    %17 = vector.broadcast %16 : vector<24x1xf32> to vector<24x64xf32>
    %18 = arith.mulf %13, %17 : vector<24x64xf32>
    %c0_5 = arith.constant 0 : index
    %c0_6 = arith.constant 0 : index
    %19 = vector.load %arg2[%c0_5, %c0_6] : memref<1x64xf32, #tpu.memory_space<vmem>>, vector<1x64xf32>
    %20 = vector.broadcast %19 : vector<1x64xf32> to vector<24x64xf32>
    %21 = arith.mulf %18, %20 : vector<24x64xf32>
    %c0_7 = arith.constant 0 : index
    %c0_8 = arith.constant 0 : index
    %22 = vector.load %arg3[%c0_7, %c0_8] : memref<1x64xf32, #tpu.memory_space<vmem>>, vector<1x64xf32>
    %23 = vector.broadcast %22 : vector<1x64xf32> to vector<24x64xf32>
    %24 = arith.addf %21, %23 : vector<24x64xf32>
    %25 = arith.truncf %24 : vector<24x64xf32> to vector<24x64xbf16>
    %c0_9 = arith.constant 0 : index
    %c0_10 = arith.constant 0 : index
    %26 = vector.load %arg4[%c0_9, %c0_10] : memref<64x256xbf16, #tpu.memory_space<vmem>>, vector<64x256xbf16>
    %cst_11 = arith.constant dense<0.000000e+00> : vector<24x256xf32>
    %27 = tpu.matmul %25, %26, %cst_11 {dimension_numbers = #tpu.dot_dimension_numbers<[1], [0], [0], [1], [0, 0, 1, 1], [], []>} : vector<24x64xbf16>, vector<64x256xbf16>, vector<24x256xf32> -> vector<24x256xf32>
    %c0_12 = arith.constant 0 : index
    %c0_13 = arith.constant 0 : index
    %28 = vector.load %arg5[%c0_12, %c0_13] : memref<1x256xf32, #tpu.memory_space<vmem>>, vector<1x256xf32>
    %29 = vector.broadcast %28 : vector<1x256xf32> to vector<24x256xf32>
    %30 = arith.addf %27, %29 : vector<24x256xf32>
    %cst_14 = arith.constant 5.000000e-01 : f32
    %31 = vector.broadcast %cst_14 : f32 to vector<24x256xf32>
    %32 = arith.mulf %31, %30 : vector<24x256xf32>
    %cst_15 = arith.constant 4.471500e-02 : f32
    %33 = vector.broadcast %cst_15 : f32 to vector<24x256xf32>
    %34 = arith.mulf %33, %30 : vector<24x256xf32>
    %35 = arith.mulf %34, %30 : vector<24x256xf32>
    %36 = arith.mulf %35, %30 : vector<24x256xf32>
    %37 = arith.addf %30, %36 : vector<24x256xf32>
    %cst_16 = arith.constant 0.797884583 : f32
    %38 = vector.broadcast %cst_16 : f32 to vector<24x256xf32>
    %39 = arith.mulf %38, %37 : vector<24x256xf32>
    %40 = math.tanh %39 : vector<24x256xf32>
    %cst_17 = arith.constant 1.000000e+00 : f32
    %41 = vector.broadcast %cst_17 : f32 to vector<24x256xf32>
    %42 = arith.addf %41, %40 : vector<24x256xf32>
    %43 = arith.mulf %32, %42 : vector<24x256xf32>
    %44 = arith.truncf %43 : vector<24x256xf32> to vector<24x256xbf16>
    %c0_18 = arith.constant 0 : index
    %c0_19 = arith.constant 0 : index
    %45 = vector.load %arg6[%c0_18, %c0_19] : memref<256x64xbf16, #tpu.memory_space<vmem>>, vector<256x64xbf16>
    %cst_20 = arith.constant dense<0.000000e+00> : vector<24x64xf32>
    %46 = tpu.matmul %44, %45, %cst_20 {dimension_numbers = #tpu.dot_dimension_numbers<[1], [0], [0], [1], [0, 0, 1, 1], [], []>} : vector<24x256xbf16>, vector<256x64xbf16>, vector<24x64xf32> -> vector<24x64xf32>
    %c0_21 = arith.constant 0 : index
    %c0_22 = arith.constant 0 : index
    %47 = vector.load %arg7[%c0_21, %c0_22] : memref<1x64xf32, #tpu.memory_space<vmem>>, vector<1x64xf32>
    %48 = vector.broadcast %47 : vector<1x64xf32> to vector<24x64xf32>
    %49 = arith.addf %46, %48 : vector<24x64xf32>
    %50 = arith.addf %0, %49 : vector<24x64xf32>
    %c0_23 = arith.constant 0 : index
    %c0_24 = arith.constant 0 : index
    %51 = vector.load %arg8[%c0_23, %c0_24] : memref<24x64xf32, #tpu.memory_space<vmem>>, vector<24x64xf32>
    tpu.vector_store %arg8[%c0_23, %c0_24], %50 {strides = array<i32>} : memref<24x64xf32, #tpu.memory_space<vmem>>, vector<24x64xf32>,
    return
  }
  func.func @transform_0(%arg0: i32) -> (i32, i32) {
    %c0_i32 = arith.constant 0 : i32
    %c0_i32_0 = arith.constant 0 : i32
    return %arg0, %c0_i32 : i32, i32
  }
  func.func @transform_1(%arg0: i32) -> (i32, i32) {
    %c0_i32 = arith.constant 0 : i32
    %c0_i32_0 = arith.constant 0 : i32
    %c0_i32_1 = arith.constant 0 : i32
    return %c0_i32, %c0_i32_0 : i32, i32
  }
  func.func @transform_2(%arg0: i32) -> (i32, i32) {
    %c0_i32 = arith.constant 0 : i32
    %c0_i32_0 = arith.constant 0 : i32
    %c0_i32_1 = arith.constant 0 : i32
    return %c0_i32, %c0_i32_0 : i32, i32
  }
  func.func @transform_3(%arg0: i32) -> (i32, i32) {
    %c0_i32 = arith.constant 0 : i32
    %c0_i32_0 = arith.constant 0 : i32
    %c0_i32_1 = arith.constant 0 : i32
    return %c0_i32, %c0_i32_0 : i32, i32
  }
  func.func @transform_4(%arg0: i32) -> (i32, i32) {
    %c0_i32 = arith.constant 0 : i32
    %c0_i32_0 = arith.constant 0 : i32
    %c0_i32_1 = arith.constant 0 : i32
    return %c0_i32, %c0_i32_0 : i32, i32
  }
  func.func @transform_5(%arg0: i32) -> (i32, i32) {
    %c0_i32 = arith.constant 0 : i32
    %c0_i32_0 = arith.constant 0 : i32
    %c0_i32_1 = arith.constant 0 : i32
    return %c0_i32, %c0_i32_0 : i32, i32
  }
  func.func @transform_6(%arg0: i32) -> (i32, i32) {
    %c0_i32 = arith.constant 0 : i32
    %c0_i32_0 = arith.constant 0 : i32
    %c0_i32_1 = arith.constant 0 : i32
    return %c0_i32, %c0_i32_0 : i32, i32
  }
  func.func @transform_7(%arg0: i32) -> (i32, i32) {
    %c0_i32 = arith.constant 0 : i32
    %c0_i32_0 = arith.constant 0 : i32
    return %arg0, %c0_i32 : i32, i32
  }
}

module attributes {stable_mosaic.version = 11 : i64} {
  func.func @_ln_linear_kernel(%arg0: i32, %arg1: memref<24x64xf32, #tpu.memory_space<vmem>>, %arg2: memref<1x64xf32, #tpu.memory_space<vmem>>, %arg3: memref<1x64xf32, #tpu.memory_space<vmem>>, %arg4: memref<64x128xbf16, #tpu.memory_space<vmem>>, %arg5: memref<1x128xf32, #tpu.memory_space<vmem>>, %arg6: memref<24x128xf32, #tpu.memory_space<vmem>>) attributes {dimension_semantics = [#tpu.dimension_semantics<parallel>], iteration_bounds = array<i64: 1>, scalar_prefetch = 0 : i64, scratch_operands = 0 : i64, tpu.core_type = #tpu.core_type<tc>, window_params = [{transform_indices = @transform_0, window_bounds = array<i64: 24, 64>}, {pipeline_mode = #tpu.pipeline_mode<synchronous>, transform_indices = @transform_1, window_bounds = array<i64: 1, 64>}, {pipeline_mode = #tpu.pipeline_mode<synchronous>, transform_indices = @transform_2, window_bounds = array<i64: 1, 64>}, {pipeline_mode = #tpu.pipeline_mode<synchronous>, transform_indices = @transform_3, window_bounds = array<i64: 64, 128>}, {pipeline_mode = #tpu.pipeline_mode<synchronous>, transform_indices = @transform_4, window_bounds = array<i64: 1, 128>}, {transform_indices = @transform_5, window_bounds = array<i64: 24, 128>}]} {
    %c0 = arith.constant 0 : index
    %c0_0 = arith.constant 0 : index
    %0 = vector.load %arg1[%c0, %c0_0] : memref<24x64xf32, #tpu.memory_space<vmem>>, vector<24x64xf32>
    %cst = arith.constant dense<0.000000e+00> : vector<24xf32>
    %1 = vector.multi_reduction <add>, %0, %cst [1] : vector<24x64xf32> to vector<24xf32>
    %2 = vector.shape_cast %1 : vector<24xf32> to vector<24x1xf32>
    %cst_1 = arith.constant 6.400000e+01 : f32
    %3 = vector.broadcast %cst_1 : f32 to vector<24x1xf32>
    %4 = arith.divf %2, %3 : vector<24x1xf32>
    %5 = vector.broadcast %4 : vector<24x1xf32> to vector<24x64xf32>
    %6 = arith.subf %0, %5 : vector<24x64xf32>
    %7 = arith.mulf %6, %6 : vector<24x64xf32>
    %cst_2 = arith.constant dense<0.000000e+00> : vector<24xf32>
    %8 = vector.multi_reduction <add>, %7, %cst_2 [1] : vector<24x64xf32> to vector<24xf32>
    %9 = vector.shape_cast %8 : vector<24xf32> to vector<24x1xf32>
    %cst_3 = arith.constant 6.400000e+01 : f32
    %10 = vector.broadcast %cst_3 : f32 to vector<24x1xf32>
    %11 = arith.divf %9, %10 : vector<24x1xf32>
    %12 = vector.broadcast %4 : vector<24x1xf32> to vector<24x64xf32>
    %13 = arith.subf %0, %12 : vector<24x64xf32>
    %cst_4 = arith.constant 9.99999974E-6 : f32
    %14 = vector.broadcast %cst_4 : f32 to vector<24x1xf32>
    %15 = arith.addf %11, %14 : vector<24x1xf32>
    %16 = math.rsqrt %15 : vector<24x1xf32>
    %17 = vector.broadcast %16 : vector<24x1xf32> to vector<24x64xf32>
    %18 = arith.mulf %13, %17 : vector<24x64xf32>
    %c0_5 = arith.constant 0 : index
    %c0_6 = arith.constant 0 : index
    %19 = vector.load %arg2[%c0_5, %c0_6] : memref<1x64xf32, #tpu.memory_space<vmem>>, vector<1x64xf32>
    %20 = vector.broadcast %19 : vector<1x64xf32> to vector<24x64xf32>
    %21 = arith.mulf %18, %20 : vector<24x64xf32>
    %c0_7 = arith.constant 0 : index
    %c0_8 = arith.constant 0 : index
    %22 = vector.load %arg3[%c0_7, %c0_8] : memref<1x64xf32, #tpu.memory_space<vmem>>, vector<1x64xf32>
    %23 = vector.broadcast %22 : vector<1x64xf32> to vector<24x64xf32>
    %24 = arith.addf %21, %23 : vector<24x64xf32>
    %25 = arith.truncf %24 : vector<24x64xf32> to vector<24x64xbf16>
    %c0_9 = arith.constant 0 : index
    %c0_10 = arith.constant 0 : index
    %26 = vector.load %arg4[%c0_9, %c0_10] : memref<64x128xbf16, #tpu.memory_space<vmem>>, vector<64x128xbf16>
    %cst_11 = arith.constant dense<0.000000e+00> : vector<24x128xf32>
    %27 = tpu.matmul %25, %26, %cst_11 {dimension_numbers = #tpu.dot_dimension_numbers<[1], [0], [0], [1], [0, 0, 1, 1], [], []>} : vector<24x64xbf16>, vector<64x128xbf16>, vector<24x128xf32> -> vector<24x128xf32>
    %c0_12 = arith.constant 0 : index
    %c0_13 = arith.constant 0 : index
    %28 = vector.load %arg5[%c0_12, %c0_13] : memref<1x128xf32, #tpu.memory_space<vmem>>, vector<1x128xf32>
    %29 = vector.broadcast %28 : vector<1x128xf32> to vector<24x128xf32>
    %30 = arith.addf %27, %29 : vector<24x128xf32>
    %c0_14 = arith.constant 0 : index
    %c0_15 = arith.constant 0 : index
    %31 = vector.load %arg6[%c0_14, %c0_15] : memref<24x128xf32, #tpu.memory_space<vmem>>, vector<24x128xf32>
    tpu.vector_store %arg6[%c0_14, %c0_15], %30 {strides = array<i32>} : memref<24x128xf32, #tpu.memory_space<vmem>>, vector<24x128xf32>,
    return
  }
  func.func @transform_0(%arg0: i32) -> (i32, i32) {
    %c0_i32 = arith.constant 0 : i32
    %c0_i32_0 = arith.constant 0 : i32
    return %arg0, %c0_i32 : i32, i32
  }
  func.func @transform_1(%arg0: i32) -> (i32, i32) {
    %c0_i32 = arith.constant 0 : i32
    %c0_i32_0 = arith.constant 0 : i32
    %c0_i32_1 = arith.constant 0 : i32
    return %c0_i32, %c0_i32_0 : i32, i32
  }
  func.func @transform_2(%arg0: i32) -> (i32, i32) {
    %c0_i32 = arith.constant 0 : i32
    %c0_i32_0 = arith.constant 0 : i32
    %c0_i32_1 = arith.constant 0 : i32
    return %c0_i32, %c0_i32_0 : i32, i32
  }
  func.func @transform_3(%arg0: i32) -> (i32, i32) {
    %c0_i32 = arith.constant 0 : i32
    %c0_i32_0 = arith.constant 0 : i32
    %c0_i32_1 = arith.constant 0 : i32
    return %c0_i32, %c0_i32_0 : i32, i32
  }
  func.func @transform_4(%arg0: i32) -> (i32, i32) {
    %c0_i32 = arith.constant 0 : i32
    %c0_i32_0 = arith.constant 0 : i32
    %c0_i32_1 = arith.constant 0 : i32
    return %c0_i32, %c0_i32_0 : i32, i32
  }
  func.func @transform_5(%arg0: i32) -> (i32, i32) {
    %c0_i32 = arith.constant 0 : i32
    %c0_i32_0 = arith.constant 0 : i32
    return %arg0, %c0_i32 : i32, i32
  }
}

module attributes {stable_mosaic.version = 11 : i64} {
  func.func @_cross_entropy_kernel(%arg0: i32, %arg1: memref<24x128xf32, #tpu.memory_space<vmem>>, %arg2: memref<24x1xi32, #tpu.memory_space<vmem>>, %arg3: memref<24x1xf32, #tpu.memory_space<vmem>>, %arg4: memref<24x1xf32, #tpu.memory_space<vmem>>, %arg5: memref<24x1xf32, #tpu.memory_space<vmem>>) attributes {dimension_semantics = [#tpu.dimension_semantics<parallel>], iteration_bounds = array<i64: 1>, scalar_prefetch = 0 : i64, scratch_operands = 0 : i64, tpu.core_type = #tpu.core_type<tc>, window_params = [{transform_indices = @transform_0, window_bounds = array<i64: 24, 128>}, {transform_indices = @transform_1, window_bounds = array<i64: 24, 1>}, {transform_indices = @transform_2, window_bounds = array<i64: 24, 1>}, {transform_indices = @transform_3, window_bounds = array<i64: 24, 1>}, {transform_indices = @transform_4, window_bounds = array<i64: 24, 1>}]} {
    %c0 = arith.constant 0 : index
    %c0_0 = arith.constant 0 : index
    %0 = vector.load %arg1[%c0, %c0_0] : memref<24x128xf32, #tpu.memory_space<vmem>>, vector<24x128xf32>
    %c0_1 = arith.constant 0 : index
    %c0_2 = arith.constant 0 : index
    %1 = vector.load %arg2[%c0_1, %c0_2] : memref<24x1xi32, #tpu.memory_space<vmem>>, vector<24x1xi32>
    %2 = tpu.iota {dimensions = array<i32: 1>} : vector<24x128xi32>
    %c96_i32 = arith.constant 96 : i32
    %3 = vector.broadcast %c96_i32 : i32 to vector<24x128xi32>
    %4 = arith.cmpi slt, %2, %3 : vector<24x128xi32>
    %cst = arith.constant -1.000000e+30 : f32
    %5 = vector.broadcast %cst : f32 to vector<24x128xf32>
    %6 = arith.select %4, %0, %5 : vector<24x128xi1>, vector<24x128xf32>
    %7 = vector.broadcast %1 : vector<24x1xi32> to vector<24x128xi32>
    %8 = arith.cmpi eq, %2, %7 : vector<24x128xi32>
    %9 = arith.extui %8 : vector<24x128xi1> to vector<24x128xi32>
    %10 = arith.sitofp %9 : vector<24x128xi32> to vector<24x128xf32>
    %cst_3 = arith.constant dense<0xFF800000> : vector<24xf32>
    %11 = vector.multi_reduction <maximumf>, %6, %cst_3 [1] : vector<24x128xf32> to vector<24xf32>
    %12 = vector.shape_cast %11 : vector<24xf32> to vector<24x1xf32>
    %13 = vector.broadcast %12 : vector<24x1xf32> to vector<24x128xf32>
    %14 = arith.subf %6, %13 : vector<24x128xf32>
    %15 = math.exp %14 : vector<24x128xf32>
    %cst_4 = arith.constant dense<0.000000e+00> : vector<24xf32>
    %16 = vector.multi_reduction <add>, %15, %cst_4 [1] : vector<24x128xf32> to vector<24xf32>
    %17 = vector.shape_cast %16 : vector<24xf32> to vector<24x1xf32>
    %18 = math.log %17 : vector<24x1xf32>
    %19 = arith.addf %12, %18 : vector<24x1xf32>
    %20 = arith.mulf %6, %10 : vector<24x128xf32>
    %cst_5 = arith.constant dense<0.000000e+00> : vector<24xf32>
    %21 = vector.multi_reduction <add>, %20, %cst_5 [1] : vector<24x128xf32> to vector<24xf32>
    %22 = vector.shape_cast %21 : vector<24xf32> to vector<24x1xf32>
    %c0_i32 = arith.constant 0 : i32
    %23 = vector.broadcast %c0_i32 : i32 to vector<24x1xi32>
    %24 = arith.cmpi sge, %1, %23 : vector<24x1xi32>
    %25 = arith.extui %24 : vector<24x1xi1> to vector<24x1xi32>
    %26 = arith.sitofp %25 : vector<24x1xi32> to vector<24x1xf32>
    %27 = arith.subf %19, %22 : vector<24x1xf32>
    %28 = arith.mulf %27, %26 : vector<24x1xf32>
    %c0_6 = arith.constant 0 : index
    %c0_7 = arith.constant 0 : index
    %29 = vector.load %arg3[%c0_6, %c0_7] : memref<24x1xf32, #tpu.memory_space<vmem>>, vector<24x1xf32>
    tpu.vector_store %arg3[%c0_6, %c0_7], %28 {strides = array<i32>} : memref<24x1xf32, #tpu.memory_space<vmem>>, vector<24x1xf32>,
    %c0_8 = arith.constant 0 : index
    %c0_9 = arith.constant 0 : index
    %30 = vector.load %arg4[%c0_8, %c0_9] : memref<24x1xf32, #tpu.memory_space<vmem>>, vector<24x1xf32>
    tpu.vector_store %arg4[%c0_8, %c0_9], %26 {strides = array<i32>} : memref<24x1xf32, #tpu.memory_space<vmem>>, vector<24x1xf32>,
    %31 = vector.broadcast %12 : vector<24x1xf32> to vector<24x128xf32>
    %32 = arith.cmpf oeq, %6, %31 : vector<24x128xf32>
    %c128_i32 = arith.constant 128 : i32
    %33 = vector.broadcast %c128_i32 : i32 to vector<24x128xi32>
    %34 = arith.select %32, %2, %33 : vector<24x128xi1>, vector<24x128xi32>
    %cst_10 = arith.constant dense<2147483647> : vector<24xi32>
    %35 = vector.multi_reduction <minsi>, %34, %cst_10 [1] : vector<24x128xi32> to vector<24xi32>
    %36 = vector.shape_cast %35 : vector<24xi32> to vector<24x1xi32>
    %37 = arith.cmpi eq, %36, %1 : vector<24x1xi32>
    %38 = arith.extui %37 : vector<24x1xi1> to vector<24x1xi32>
    %39 = arith.sitofp %38 : vector<24x1xi32> to vector<24x1xf32>
    %40 = arith.mulf %39, %26 : vector<24x1xf32>
    %c0_11 = arith.constant 0 : index
    %c0_12 = arith.constant 0 : index
    %41 = vector.load %arg5[%c0_11, %c0_12] : memref<24x1xf32, #tpu.memory_space<vmem>>, vector<24x1xf32>
    tpu.vector_store %arg5[%c0_11, %c0_12], %40 {strides = array<i32>} : memref<24x1xf32, #tpu.memory_space<vmem>>, vector<24x1xf32>,
    return
  }
  func.func @transform_0(%arg0: i32) -> (i32, i32) {
    %c0_i32 = arith.constant 0 : i32
    %c0_i32_0 = arith.constant 0 : i32
    return %arg0, %c0_i32 : i32, i32
  }
  func.func @transform_1(%arg0: i32) -> (i32, i32) {
    %c0_i32 = arith.constant 0 : i32
    %c0_i32_0 = arith.constant 0 : i32
    return %arg0, %c0_i32 : i32, i32
  }
  func.func @transform_2(%arg0: i32) -> (i32, i32) {
    %c0_i32 = arith.constant 0 : i32
    %c0_i32_0 = arith.constant 0 : i32
    return %arg0, %c0_i32 : i32, i32
  }
  func.func @transform_3(%arg0: i32) -> (i32, i32) {
    %c0_i32 = arith.constant 0 : i32
    %c0_i32_0 = arith.constant 0 : i32
    return %arg0, %c0_i32 : i32, i32
  }
  func.func @transform_4(%arg0: i32) -> (i32, i32) {
    %c0_i32 = arith.constant 0 : i32
    %c0_i32_0 = arith.constant 0 : i32
    return %arg0, %c0_i32 : i32, i32
  }
}

</mosaic_0001>

<bundles_post_ra>
// kernel: _lambda_.17
= control target key start
LH: loop header
LB: loop body
LE: loop exit
PB: predicated region body
PF: predicated region fallthrough
CT: control target
= control target key end

     0   :  { %vm22_vm0 = vcmask 261120   ;;  %v149_v8 = vmov 0.0   ;;  %vm150_vm1 = vmmov 0   ;;  %vm120_vm2 = vcmask 785408   ;;  %s205_s0 = inlined_call_operand.vmem [shape: f32[8,32], index: 0, kind: input, shape index: {}]   ;;  %s206_s3 = inlined_call_operand.vmem [shape: bf16[32,96], index: 3, kind: input, shape index: {}]   ;;  %s207_s1 = inlined_call_operand.vmem [shape: f32[1,32], index: 1, kind: input, shape index: {}]   ;;  %s208_s2 = inlined_call_operand.vmem [shape: f32[1,32], index: 2, kind: input, shape index: {}]   ;;  %s209_s4 = inlined_call_operand.vmem [shape: f32[1,96], index: 4, kind: input, shape index: {}]   ;;  %s210_s5 = inlined_call_operand.vmem [shape: f32[8,96], index: 5, kind: output, shape index: {}]  }
   0x1   :  { %v21_v0 = vld [vmem:[%s205_s0] sm:$0xff]  ;;  %135 = vmatprep.subr.bf16.mxu0 %v149_v8  ;;  %v146_v9 = vld [vmem:[%s206_s3 + $0x8] sm:$0xff]   ;;  %139 = vmatprep.mubr.msk.bf16.mxu0 %vm150_vm1, %v149_v8 }
   0x2   :  { %v23_v1 = vsel %vm22_vm0, %v21_v0, 0.0  ;;  %v145_v7 = vld [vmem:[%s206_s3] sm:$0xff]  }
   0x3   :  { %24 = vadd.xlane.f32.xlu0 %v23_v1  ;;  %136 = vmatpush3.bf16.msra.mxu0 %v145_v7  ;;  %v126_v14 = vld [vmem:[%s207_s1] ss:$0 sm:$0xff] }
   0x4   :  { %137 = vmatprep.subr.bf16.mxu0 %v149_v8  ;;  %v127_v16 = vld [vmem:[%s208_s2] ss:$0 sm:$0xff] }
   0x5   :  { %v128_v20 = vld [vmem:[%s209_s4] ss:$0 sm:$0xff] }
   0x7   :  { %138 = vmatpush3.bf16.msra.mxu0 %v146_v9 }
  0x90   :  { %v25_v2 = vpop.xlane.xlu0 %24 }
  0x91   :  { %v27_v3 = vmul.f32 0.03125, %v25_v2 }
  0x93   :  { %v28_v4 = vsub.f32 %v21_v0, %v27_v3 }
  0x95   :  { %v29_v5 = vmul.f32 %v28_v4, %v28_v4 }
  0x97   :  { %v30_v6 = vsel %vm22_vm0, %v29_v5, 0.0 }
  0x98   :  { %31 = vadd.xlane.f32.xlu0 %v30_v6 }
 0x125   :  { %v32_v10 = vpop.xlane.xlu0 %31 }
 0x126   :  { %v33_v11 = vmul.f32 0.03125, %v32_v10 }
 0x128   :  { %v34_v12 = vadd.f32 1e-05, %v33_v11 }
 0x12a   :  { %147 = vrsqrt.f32 %v34_v12 }
 0x134   :  { %v148_v13 = vpop.eup %147 }
 0x135   :  { %v36_v15 = vmul.f32 %v148_v13, %v28_v4 }
 0x137   :  { %v44_v17 = vmul.f32 %v126_v14, %v36_v15 }
 0x139   :  { %v52_v18 = vadd.f32 %v127_v16, %v44_v17 }
 0x13b   :  { %v53_v19 = vpack.c.bf16 %v52_v18, %v52_v18 }
 0x13d   :  { %140 = vmatmul.mubr.msk.bf16.vlgmr.msra.gmra.mrb[0].mxu0 %vm22_vm0, %v53_v19 }
 0x210   :  { %v114_v21 = vpop.f32.mrb[0].mxu0 }
 0x211   :  { %v115_v22 = vadd.f32 %v128_v20, %v114_v21  ;;  %v141_v23 = vpop.f32.mrb[1].mxu0 }
 0x212   :  { %v117_v24 = vpop.f32.mrb[2].mxu0 }
 0x213   :  { %121 = vst.msk [vmem:[%s210_s5] sm:$0xff] %vm120_vm2, %v115_v22  ;;  %v142_v25 = vpop.f32.mrb[3].mxu0 }

// kernel: _lambda_.18
= control target key start
LH: loop header
LB: loop body
LE: loop exit
PB: predicated region body
PF: predicated region fallthrough
CT: control target
= control target key end

     0   :  { %s688_s15 = smov 0   ;;  %s732_s0 = inlined_call_operand.vmem [shape: f32[2,2,4,16], index: 0, kind: input, shape index: {}]   ;;  %s733_s1 = inlined_call_operand.vmem [shape: f32[2,2,4,16], index: 1, kind: input, shape index: {}]   ;;  %s734_s2 = inlined_call_operand.vmem [shape: f32[2,2,4,16], index: 2, kind: input, shape index: {}]   ;;  %s735_s3 = inlined_call_operand.vmem [shape: f32[2,1,4,4], index: 3, kind: input, shape index: {}]   ;;  %s736_s4 = inlined_call_operand.vmem [shape: f32[2,2,4,16], index: 4, kind: output, shape index: {}]  }
   0x1 LB: > { %s579_s16 = sadd.s32 4294967295, %s659_s15   ;;  %p583_p0 = scmp.ge.s32.totalorder %s659_s15, 1  ;;  %s659_s15 = sphi %s688_s15, %s14_s15  }
   0x2   : > { %p191_p1 = scmp.lt.s32.totalorder %s659_s15, 3 }
   0x4   : > { %p192_p2 = pnand %p583_p0, %p191_p1 }
   0x5   : > { %p231_p3 = scmp.lt.s32.totalorder (!%p192_p2), %s579_s16, 1  ;;  %v661_v0 = vmov (!%p192_p2), 0.0   ;;  %vm662_vm0 = vmmov (!%p192_p2), 0   ;;  %vm268_vm1 = vcmask (!%p192_p2), 130048   ;;  %vm366_vm2 = vcmask (!%p192_p2), 27648  }
   0x6   : > { %195 = sbr.rel (%p192_p2) target bundleno = 778 (0x30a), region = 36  ;;  %611 = vmatprep.subr.bf16.mxu0 (!%p192_p2), %v661_v0  ;;  %617 = vmatprep.subr.bf16.mxu1 (!%p192_p2), %v661_v0  ;;  %vm395_vm3 = vcmask (!%p192_p2), 1041408   ;;  %vm391_vm4 = vcmask (!%p192_p2), 31744   ;;  %vm485_vm5 = vcmask (!%p192_p2), 125952  }
   0x7   : > { %613 = vmatprep.mubr.msk.bf16.mxu0 (!%p192_p2), %vm662_vm0, %v661_v0  ;;  %619 = vmatprep.mubr.msk.bf16.mxu1 (!%p192_p2), %vm662_vm0, %v661_v0 }
   0xd   : > { %s738_s16 = smov (!%p231_p3, %s579_s16), 1 }
   0xe   : > { %s698_s17 = sshll.u32 %s738_s16, 3  ;;  %s590_s24 = sshll.u32 %s738_s16, 2 }
   0xf   : > { %s240_s20 = scalar_lea.vmem %s733_s1, %s698_s17  ;;  %s235_s23 = scalar_lea.vmem %s732_s0, %s698_s17 }
  0x10   : > { %v260_v1 = vld [vmem:[%s240_s20] sm:$0xf]  ;;  %v261_v2 = vld [vmem:[%s240_s20 + $0x4] sm:$0xf]  ;;  %s249_s27 = scalar_lea.vmem %s735_s3, %s590_s24  ;;  %s245_s30 = scalar_lea.vmem %s734_s2, %s698_s17 }
  0x11   : > { %v262_v3 = vpack.c.bf16 %v260_v1, %v260_v1  ;;  %v263_v4 = vpack.c.bf16 %v261_v2, %v261_v2  ;;  %v256_v7 = vld [vmem:[%s235_s23] sm:$0xf]  ;;  %v257_v8 = vld [vmem:[%s235_s23 + $0x4] sm:$0xf]  ;;  %s254_s7 = scalar_lea.vmem %s736_s4, %s698_s17 }
  0x12   : > { %v258_v9 = vpack.c.bf16 %v256_v7, %v256_v7  ;;  %v259_v10 = vpack.c.bf16 %v257_v8, %v257_v8  ;;  %v363_v13 = vld [vmem:[%s249_s27] sm:$0xf]  ;;  %v265_v39 = vld [vmem:[%s245_s30 + $0x4] sm:$0xf] }
  0x13   : > { %v273_v5 = vsel %vm268_vm1, %v262_v3, 0  ;;  %v319_v6 = vsel %vm268_vm1, %v263_v4, 0  ;;  %v264_v36 = vld [vmem:[%s245_s30] sm:$0xf]  ;;  %v267_v40 = vpack.c.bf16 %v265_v39, %v265_v39 }
  0x14   : > { %612 = vmatpush3.bf16.xpose.msra.mxu0 %v273_v5  ;;  %618 = vmatpush3.bf16.xpose.msra.mxu1 %v319_v6  ;;  %v266_v37 = vpack.c.bf16 %v264_v36, %v264_v36 }
  0x15   : > { %623 = vmatprep.subr.bf16.mxu0 %v661_v0  ;;  %629 = vmatprep.subr.bf16.mxu1 %v661_v0  ;;  %v443_v41 = vsel %vm395_vm3, %v267_v40, 0 }
  0x16   : > { %v397_v38 = vsel %vm395_vm3, %v266_v37, 0 }
  0x1b   : > { %614 = vmatmul.mubr.msk.bf16.vlgmr.msra.gmra.mrb[0].mxu0 %vm268_vm1, %v258_v9  ;;  %620 = vmatmul.mubr.msk.bf16.vlgmr.msra.gmra.mrb[0].mxu1 %vm268_vm1, %v259_v10 }
  0x1c   : > { %625 = vmatprep.mubr.msk.bf16.mxu0 %vm662_vm0, %v661_v0  ;;  %631 = vmatprep.mubr.msk.bf16.mxu1 %vm662_vm0, %v661_v0 }
  0x1d   : > { %624 = vmatpush3.bf16.msra.mxu0 %v397_v38  ;;  %630 = vmatpush3.bf16.msra.mxu1 %v443_v41 }
  0xee   : > { %v309_v11 = vpop.f32.mrb[0].mxu0  ;;  %v355_v12 = vpop.f32.mrb[0].mxu1 }
  0xef   : > { %v361_v14 = vmul.f32 0.25, %v309_v11  ;;  %v615_v15 = vpop.f32.mrb[1].mxu0  ;;  %v362_v16 = vmul.f32 0.25, %v355_v12  ;;  %v621_v17 = vpop.f32.mrb[1].mxu1 }
  0xf0   : > { %v312_v18 = vpop.f32.mrb[2].mxu0  ;;  %v358_v19 = vpop.f32.mrb[2].mxu1 }
  0xf1   : > { %v616_v20 = vpop.f32.mrb[3].mxu0  ;;  %v622_v21 = vpop.f32.mrb[3].mxu1  ;;  %v364_v22 = vadd.f32 %v363_v13, %v361_v14  ;;  %v365_v23 = vadd.f32 %v363_v13, %v362_v16 }
  0xf3   : > { %v367_v24 = vsel %vm366_vm2, %v364_v22, -inf  ;;  %v370_v25 = vsel %vm366_vm2, %v365_v23, -inf }
  0xf4   : > { %368 = vmax.xlane.f32.xlu0 %v367_v24 }
  0xf8   : > { %371 = vmax.xlane.f32.xlu0 %v370_v25 }
 0x181   : > { %v369_v26 = vpop.xlane.xlu0 %368 }
 0x182   : > { %v373_v27 = vsub.f32 %v364_v22, %v369_v26 }
 0x184   : > { %v375_v28 = vmul.f32 1.442695, %v373_v27 }
 0x185   : > { %v372_v29 = vpop.xlane.xlu0 %371 }
 0x186   : > { %645 = vpow2.f32 %v375_v28  ;;  %v374_v30 = vsub.f32 %v365_v23, %v372_v29 }
 0x188   : > { %v377_v31 = vmul.f32 1.442695, %v374_v30 }
 0x18a   : > { %647 = vpow2.f32 %v377_v31 }
 0x190   : > { %v646_v32 = vpop.eup %645 }
 0x191   : > { %v379_v33 = vsel %vm366_vm2, %v646_v32, 0.0 }
 0x192   : > { %380 = vadd.xlane.f32.xlu1 %v379_v33 }
 0x194   : > { %v648_v34 = vpop.eup %647 }
 0x195   : > { %v382_v35 = vsel %vm366_vm2, %v648_v34, 0.0 }
 0x196   : > { %383 = vadd.xlane.f32.xlu1 %v382_v35 }
 0x21f   : > { %v381_v42 = vpop.xlane.xlu1 %380 }
 0x220   : > { %649 = vrcp.f32 %v381_v42 }
 0x223   : > { %v384_v43 = vpop.xlane.xlu1 %383 }
 0x224   : > { %651 = vrcp.f32 %v384_v43 }
 0x22a   : > { %v650_v44 = vpop.eup %649 }
 0x22b   : > { %v387_v45 = vmul.f32 %v650_v44, %v646_v32 }
 0x22d   : > { %v389_v46 = vpack.c.bf16 %v387_v45, %v387_v45 }
 0x22e   : > { %v652_v47 = vpop.eup %651 }
 0x22f   : > { %v388_v48 = vmul.f32 %v652_v47, %v648_v34  ;;  %626 = vmatmul.mubr.msk.bf16.vlgmr.msra.gmra.mrb[4].mxu0 %vm391_vm4, %v389_v46 }
 0x231   : > { %v390_v49 = vpack.c.bf16 %v388_v48, %v388_v48 }
 0x233   : > { %632 = vmatmul.mubr.msk.bf16.vlgmr.msra.gmra.mrb[4].mxu1 %vm391_vm4, %v390_v49 }
 0x302   : > { %v433_v50 = vpop.f32.mrb[4].mxu0 }
 0x303   : > { %486 = vst.msk [vmem:[%s254_s7] sm:$0xf] %vm485_vm5, %v433_v50  ;;  %v627_v51 = vpop.f32.mrb[5].mxu0 }
 0x304   : > { %v436_v52 = vpop.f32.mrb[6].mxu0 }
 0x305   : > { %v628_v53 = vpop.f32.mrb[7].mxu0 }
 0x306   : > { %v479_v54 = vpop.f32.mrb[4].mxu1 }
 0x307   : > { %487 = vst.msk [vmem:[%s254_s7 + $0x4] sm:$0xf] %vm485_vm5, %v479_v54  ;;  %v633_v55 = vpop.f32.mrb[5].mxu1 }
 0x308   : > { %v482_v56 = vpop.f32.mrb[6].mxu1 }
 0x309   : > { %v634_v57 = vpop.f32.mrb[7].mxu1 }
 0x30a PF: > { %s14_s15 = sadd.s32 1, %s659_s15  }
 0x30b   : > { %p11_p4 = scmp.ge.s32.totalorder %s14_s15, 4  }
 0x30d   :  { %13 = sbr.rel (!%p11_p4) target bundleno = 1 (0x1), region = 75 }

// kernel: _lambda_.16
= control target key start
LH: loop header
LB: loop body
LE: loop exit
PB: predicated region body
PF: predicated region fallthrough
CT: control target
= control target key end

     0   :  { %v654_v0 = vmov 6   ;;  %v655_v1 = vmov 0   ;;  %v656_v3 = vmov 2   ;;  %v657_v4 = vmov 1   ;;  %s849_s0 = inlined_call_operand.vmem [shape: f32[8,16], index: 0, kind: input, shape index: {}]   ;;  %s850_s3 = inlined_call_operand.vmem [shape: bf16[48,32], index: 3, kind: input, shape index: {}]   ;;  %s851_s1 = inlined_call_operand.vmem [shape: f32[5,8], index: 1, kind: input, shape index: {}]   ;;  %s852_s2 = inlined_call_operand.vmem [shape: f32[1,8], index: 2, kind: input, shape index: {}]   ;;  %s853_s4 = inlined_call_operand.vmem [shape: f32[1,32], index: 4, kind: input, shape index: {}]   ;;  %s854_s5 = inlined_call_operand.vmem [shape: f32[8,32], index: 5, kind: output, shape index: {}]  }
   0x1   :  { %629 = vset.pattern.permute.xlu1 %v654_v0  ;;  %627 = vset.pattern.permute.xlu0 %v655_v1  ;;  %v21_v2 = vld [vmem:[%s849_s0] sm:$0xff]  ;;  %v658_v5 = vmov 7   ;;  %v659_v6 = vmov 3   ;;  %v660_v7 = vmov 8   ;;  %v661_v8 = vmov 9  }
   0x2   :  { %163 = vperm.xlu1 %629, %v21_v2   ;;  %41 = vperm.xlu0 %627, %v21_v2   ;;  %v662_v9 = vmov 4   ;;  %v663_v10 = vmov 11   ;;  %v664_v11 = vmov 10   ;;  %v665_v12 = vmov 14   ;;  %v100_v16 = vld [vmem:[%s850_s3] sm:$0xf] }
   0x3   :  { %v666_v13 = vmov 5   ;;  %v667_v14 = vmov 12   ;;  %v668_v15 = vmov 13   ;;  %vm105_vm0 = vcmask 1043456   ;;  %v330_v19 = vld [vmem:[%s850_s3 + $0xc] sm:$0xf] }
   0x4   :  { %v669_v17 = vmov 0.0   ;;  %v107_v18 = vsel %vm105_vm0, %v100_v16, 0  ;;  %vm670_vm1 = vmmov 0   ;;  %v335_v20 = vsel %vm105_vm0, %v330_v19, 0  ;;  %v178_v21 = vld [vmem:[%s850_s3 + $0x4] sm:$0xf] }
   0x5   :  { %556 = vmatprep.subr.bf16.mxu1 %v669_v17  ;;  %574 = vmatprep.subr.bf16.mxu0 %v669_v17  ;;  %v406_v22 = vld [vmem:[%s850_s3 + $0x10] sm:$0xf]  ;;  %v727_v23 = vsel %vm105_vm0, %v178_v21, 0  ;;  %v254_v25 = vld [vmem:[%s850_s3 + $0x8] sm:$0xf]  ;;  %v44_v29 = vlaneseq  ;;  %vm101_vm2 = vcmask 64512  }
   0x6   :  { %630 = vset.pattern.permute.xlu1 %v656_v3  ;;  %628 = vset.pattern.permute.xlu0 %v657_v4  ;;  %v730_v24 = vsel %vm105_vm0, %v406_v22, 0  ;;  %v736_v26 = vsel %vm105_vm0, %v254_v25, 0  ;;  %v482_v27 = vld [vmem:[%s850_s3 + $0x14] sm:$0xf]  ;;  %v22_v32 = vld [vmem:[%s851_s1] sm:$0x1f] }
   0x7   :  { %61 = vperm.xlu1 %630, %v21_v2   ;;  %51 = vperm.xlu0 %628, %v21_v2   ;;  %v742_v28 = vsel %vm105_vm0, %v482_v27, 0  ;;  %v45_v30 = vshrl.u32 %v44_v29, 7  ;;  %v754_v41 = vld [vmem:[%s852_s2] ss:$0 sm:$0xff]  ;;  %vm530_vm3 = vcmask 261120  }
   0x8   :  { %557 = vmatpush3.bf16.msra.mxu1 %v107_v18  ;;  %558 = vmatprep.mubr.msk.bf16.mxu1 %vm670_vm1, %v669_v17 }
   0x9   :  { %562 = vmatprep.subr.bf16.mxu1 %v669_v17  ;;  %576 = vmatprep.mubr.msk.bf16.mxu0 %vm670_vm1, %v669_v17  ;;  %v46_v31 = vsub.s32 0, %v45_v30  ;;  %v56_v35 = vsub.s32 1, %v45_v30  ;;  %v66_v42 = vsub.s32 2, %v45_v30  ;;  %v76_v45 = vsub.s32 3, %v45_v30 }
   0xa   :  { %575 = vmatpush3.bf16.msra.mxu0 %v335_v20  ;;  %v86_v52 = vsub.s32 4, %v45_v30 }
   0xb   :  { %631 = vset.pattern.permute.xlu1 %v658_v5  ;;  %632 = vset.pattern.permute.xlu0 %v659_v6  ;;  %v47_v36 = vrot.slane %v22_v32, %v46_v31  ;;  %v749_v39 = vrot.slane %v22_v32, %v56_v35  ;;  %v758_v47 = vrot.slane %v22_v32, %v66_v42 }
   0xc   :  { %233 = vperm.xlu1 %631, %v21_v2   ;;  %71 = vperm.xlu0 %632, %v21_v2   ;;  %v760_v49 = vrot.slane %v22_v32, %v76_v45  ;;  %v768_v60 = vrot.slane %v22_v32, %v86_v52 }
   0xd   :  { %580 = vmatprep.subr.bf16.mxu0 %v669_v17 }
  0x10   :  { %633 = vset.pattern.permute.xlu1 %v660_v7  ;;  %635 = vset.pattern.permute.xlu0 %v661_v8 }
  0x11   :  { %239 = vperm.xlu1 %633, %v21_v2   ;;  %309 = vperm.xlu0 %635, %v21_v2  }
  0x15   :  { %634 = vset.pattern.permute.xlu1 %v662_v9  ;;  %638 = vset.pattern.permute.xlu0 %v663_v10 }
  0x16   :  { %81 = vperm.xlu1 %634, %v21_v2   ;;  %385 = vperm.xlu0 %638, %v21_v2  }
  0x1a   :  { %636 = vset.pattern.permute.xlu1 %v664_v11  ;;  %641 = vset.pattern.permute.xlu0 %v665_v12 }
  0x1b   :  { %315 = vperm.xlu1 %636, %v21_v2   ;;  %467 = vperm.xlu0 %641, %v21_v2  }
  0x1f   :  { %637 = vset.pattern.permute.xlu1 %v666_v13 }
  0x20   :  { %157 = vperm.xlu1 %637, %v21_v2  }
  0x24   :  { %639 = vset.pattern.permute.xlu1 %v667_v14 }
  0x25   :  { %391 = vperm.xlu1 %639, %v21_v2  }
  0x29   :  { %640 = vset.pattern.permute.xlu1 %v668_v15 }
  0x2a   :  { %461 = vperm.xlu1 %640, %v21_v2  }
  0x81   :  { %v747_v33 = vpop.permute.xlu1 %163  ;;  %v42_v34 = vpop.permute.xlu0 %41 }
  0x82   :  { %v48_v37 = vmul.f32 %v47_v36, %v42_v34  ;;  %v302_v50 = vmul.f32 %v747_v33, %v47_v36  ;;  %v230_v45 = vmul.f32 %v747_v33, %v758_v47 }
  0x84   :  { %v49_v43 = vadd.f32 %v754_v41, %v48_v37  ;;  %v303_v58 = vadd.f32 %v754_v41, %v302_v50 }
  0x86   :  { %v62_v38 = vpop.permute.xlu1 %61  ;;  %v52_v40 = vpop.permute.xlu0 %51 }
  0x87   :  { %v58_v44 = vmul.f32 %v749_v39, %v52_v40  ;;  %v68_v53 = vmul.f32 %v758_v47, %v62_v38  ;;  %v150_v0 = vmul.f32 %v62_v38, %v47_v36  ;;  %v166_v40 = vmul.f32 %v747_v33, %v768_v60 }
  0x89   :  { %v59_v48 = vadd.f32 %v58_v44, %v49_v43  ;;  %v151_v8 = vadd.f32 %v754_v41, %v150_v0 }
  0x8b   :  { %v234_v46 = vpop.permute.xlu1 %233  ;;  %v72_v51 = vpop.permute.xlu0 %71  ;;  %v69_v56 = vadd.f32 %v68_v53, %v59_v48 }
  0x8c   :  { %v304_v55 = vmul.f32 %v234_v46, %v749_v39  ;;  %v78_v57 = vmul.f32 %v760_v49, %v72_v51  ;;  %v152_v7 = vmul.f32 %v72_v51, %v749_v39  ;;  %v236_v51 = vmul.f32 %v234_v46, %v760_v49 }
  0x8e   :  { %v305_v62 = vadd.f32 %v304_v55, %v303_v58  ;;  %v79_v1 = vadd.f32 %v78_v57, %v69_v56  ;;  %v153_v19 = vadd.f32 %v152_v7, %v151_v8 }
  0x90   :  { %v240_v54 = vpop.permute.xlu1 %239  ;;  %v310_v61 = vpop.permute.xlu0 %309 }
  0x91   :  { %v306_v59 = vmul.f32 %v240_v54, %v758_v47  ;;  %v378_v2 = vmul.f32 %v240_v54, %v47_v36  ;;  %v312_v5 = vmul.f32 %v310_v61, %v760_v49  ;;  %v380_v10 = vmul.f32 %v310_v61, %v749_v39 }
  0x93   :  { %v307_v4 = vadd.f32 %v306_v59, %v305_v62  ;;  %v379_v9 = vadd.f32 %v754_v41, %v378_v2  ;;  %v242_v62 = vmul.f32 %v240_v54, %v768_v60 }
  0x95   :  { %v82_v63 = vpop.permute.xlu1 %81  ;;  %v313_v13 = vadd.f32 %v312_v5, %v307_v4  ;;  %v386_v22 = vpop.permute.xlu0 %385  ;;  %v381_v27 = vadd.f32 %v380_v10, %v379_v9 }
  0x96   :  { %v88_v3 = vmul.f32 %v768_v60, %v82_v63  ;;  %v154_v14 = vmul.f32 %v82_v63, %v758_v47  ;;  %v226_v15 = vmul.f32 %v82_v63, %v47_v36  ;;  %v388_v43 = vmul.f32 %v386_v22, %v760_v49 }
  0x97   :  { %v456_v52 = vmul.f32 %v386_v22, %v749_v39 }
  0x98   :  { %v772_v6 = vadd.f32 %v88_v3, %v79_v1  ;;  %v155_v29 = vadd.f32 %v154_v14, %v153_v19  ;;  %v227_v30 = vadd.f32 %v754_v41, %v226_v15 }
  0x9a   :  { %v91_v11 = vmul.f32 0.044715, %v772_v6  ;;  %v316_v12 = vpop.permute.xlu1 %315  ;;  %v468_v0 = vpop.permute.xlu0 %467  ;;  %v90_v22 = vmul.f32 0.5, %v772_v6 }
  0x9b   :  { %v318_v16 = vmul.f32 %v316_v12, %v768_v60  ;;  %v382_v21 = vmul.f32 %v316_v12, %v758_v47  ;;  %v454_v34 = vmul.f32 %v316_v12, %v47_v36  ;;  %v470_v8 = vmul.f32 %v468_v0, %v768_v60 }
  0x9c   :  { %v92_v18 = vmul.f32 %v91_v11, %v772_v6 }
  0x9d   :  { %v782_v20 = vadd.f32 %v318_v16, %v313_v13  ;;  %v383_v42 = vadd.f32 %v382_v21, %v381_v27  ;;  %v455_v55 = vadd.f32 %v754_v41, %v454_v34 }
  0x9e   :  { %v93_v25 = vmul.f32 %v92_v18, %v772_v6 }
  0x9f   :  { %v321_v31 = vmul.f32 0.044715, %v782_v20  ;;  %v158_v32 = vpop.permute.xlu1 %157  ;;  %v389_v59 = vadd.f32 %v388_v43, %v383_v42  ;;  %v457_v2 = vadd.f32 %v456_v52, %v455_v55 }
  0xa0   :  { %v160_v35 = vmul.f32 %v158_v32, %v760_v49  ;;  %v228_v37 = vmul.f32 %v158_v32, %v749_v39  ;;  %v94_v38 = vadd.f32 %v93_v25, %v772_v6 }
  0xa1   :  { %v322_v44 = vmul.f32 %v321_v31, %v782_v20 }
  0xa2   :  { %v161_v48 = vadd.f32 %v160_v35, %v155_v29  ;;  %v229_v50 = vadd.f32 %v228_v37, %v227_v30  ;;  %v95_v36 = vmul.f32 0.7978846, %v94_v38  ;;  %v320_v38 = vmul.f32 0.5, %v782_v20 }
  0xa3   :  { %v323_v53 = vmul.f32 %v322_v44, %v782_v20 }
  0xa4   :  { %v801_v56 = vadd.f32 %v166_v40, %v161_v48  ;;  %v231_v57 = vadd.f32 %v230_v45, %v229_v50  ;;  %v392_v58 = vpop.permute.xlu1 %391  ;;  %642 = vtanh.f32 %v95_v36 }
  0xa5   :  { %v394_v61 = vmul.f32 %v392_v58, %v768_v60  ;;  %v324_v33 = vadd.f32 %v323_v53, %v782_v20  ;;  %v458_v39 = vmul.f32 %v392_v58, %v758_v47 }
  0xa6   :  { %v169_v46 = vmul.f32 0.044715, %v801_v56  ;;  %v237_v63 = vadd.f32 %v236_v51, %v231_v57  ;;  %v168_v20 = vmul.f32 0.5, %v801_v56 }
  0xa7   :  { %v395_v1 = vadd.f32 %v394_v61, %v389_v59  ;;  %v325_v41 = vmul.f32 0.7978846, %v324_v33  ;;  %v459_v10 = vadd.f32 %v458_v39, %v457_v2  ;;  %v536_v39 = vld [vmem:[%s853_s4] ss:$0 sm:$0xff] }
  0xa8   :  { %v170_v3 = vmul.f32 %v169_v46, %v801_v56  ;;  %v809_v4 = vadd.f32 %v242_v62, %v237_v63 }
  0xa9   :  { %v397_v5 = vmul.f32 0.044715, %v395_v1  ;;  %v462_v7 = vpop.permute.xlu1 %461  ;;  %644 = vtanh.f32 %v325_v41  ;;  %v396_v36 = vmul.f32 0.5, %v395_v1 }
  0xaa   :  { %v171_v54 = vmul.f32 %v170_v3, %v801_v56  ;;  %v245_v9 = vmul.f32 0.044715, %v809_v4  ;;  %v464_v47 = vmul.f32 %v462_v7, %v760_v49  ;;  %v244_v58 = vmul.f32 0.5, %v809_v4 }
  0xab   :  { %v398_v11 = vmul.f32 %v397_v5, %v395_v1 }
  0xac   :  { %v465_v12 = vadd.f32 %v464_v47, %v459_v10  ;;  %v172_v13 = vadd.f32 %v171_v54, %v801_v56  ;;  %v246_v14 = vmul.f32 %v245_v9, %v809_v4 }
  0xad   :  { %v399_v15 = vmul.f32 %v398_v11, %v395_v1 }
  0xae   :  { %v643_v16 = vpop.eup %642  ;;  %v471_v18 = vadd.f32 %v470_v8, %v465_v12  ;;  %v173_v19 = vmul.f32 0.7978846, %v172_v13  ;;  %v247_v60 = vmul.f32 %v246_v14, %v809_v4 }
  0xaf   :  { %v400_v21 = vadd.f32 %v399_v15, %v395_v1  ;;  %v97_v25 = vadd.f32 1.0, %v643_v16 }
  0xb0   :  { %v473_v27 = vmul.f32 0.044715, %v471_v18  ;;  %646 = vtanh.f32 %v173_v19  ;;  %v248_v49 = vadd.f32 %v247_v60, %v809_v4  ;;  %v472_v33 = vmul.f32 0.5, %v471_v18 }
  0xb1   :  { %v401_v29 = vmul.f32 0.7978846, %v400_v21  ;;  %v98_v30 = vmul.f32 %v97_v25, %v90_v22 }
  0xb2   :  { %v474_v31 = vmul.f32 %v473_v27, %v471_v18  ;;  %v249_v32 = vmul.f32 0.7978846, %v248_v49 }
  0xb3   :  { %v645_v34 = vpop.eup %644  ;;  %v99_v35 = vpack.c.bf16 %v98_v30, %v98_v30  ;;  %648 = vtanh.f32 %v401_v29 }
  0xb4   :  { %v475_v37 = vmul.f32 %v474_v31, %v471_v18  ;;  %v327_v40 = vadd.f32 1.0, %v645_v34  ;;  %650 = vtanh.f32 %v249_v32 }
  0xb5   :  { %559 = vmatmul.mubr.msk.bf16.vlgmr.msra.gmra.mrb[0].mxu1 %vm101_vm2, %v99_v35 }
  0xb6   :  { %v476_v6 = vadd.f32 %v475_v37, %v471_v18  ;;  %563 = vmatpush3.bf16.msra.mxu1 %v727_v23  ;;  %v328_v42 = vmul.f32 %v327_v40, %v320_v38  ;;  %564 = vmatprep.mubr.msk.bf16.mxu1 %vm670_vm1, %v669_v17 }
  0xb7   :  { %568 = vmatprep.subr.bf16.mxu1 %v669_v17 }
  0xb8   :  { %v477_v43 = vmul.f32 0.7978846, %v476_v6  ;;  %v329_v44 = vpack.c.bf16 %v328_v42, %v328_v42 }
  0xba   :  { %v647_v45 = vpop.eup %646  ;;  %577 = vmatmul.mubr.msk.bf16.vlgmr.msra.gmra.mrb[0].mxu0 %vm101_vm2, %v329_v44  ;;  %652 = vtanh.f32 %v477_v43 }
  0xbb   :  { %581 = vmatpush3.bf16.msra.mxu0 %v730_v24  ;;  %v175_v48 = vadd.f32 1.0, %v647_v45  ;;  %582 = vmatprep.mubr.msk.bf16.mxu0 %vm670_vm1, %v669_v17 }
  0xbc   :  { %586 = vmatprep.subr.bf16.mxu0 %v669_v17 }
  0xbd   :  { %v649_v23 = vpop.eup %648  ;;  %v176_v50 = vmul.f32 %v175_v48, %v168_v20 }
  0xbe   :  { %v403_v51 = vadd.f32 1.0, %v649_v23  ;;  %v651_v53 = vpop.eup %650 }
  0xbf   :  { %v177_v52 = vpack.c.bf16 %v176_v50, %v176_v50  ;;  %v251_v24 = vadd.f32 1.0, %v651_v53 }
  0xc0   :  { %v404_v55 = vmul.f32 %v403_v51, %v396_v36 }
  0xc1   :  { %565 = vmatmul.mubr.msk.bf16.vlgmr.msra.gmra.mrb[0].mxu1 %vm101_vm2, %v177_v52  ;;  %v252_v59 = vmul.f32 %v251_v24, %v244_v58 }
  0xc2   :  { %569 = vmatpush3.bf16.msra.mxu1 %v736_v26  ;;  %570 = vmatprep.mubr.msk.bf16.mxu1 %vm670_vm1, %v669_v17  ;;  %v405_v56 = vpack.c.bf16 %v404_v55, %v404_v55 }
  0xc3   :  { %v253_v62 = vpack.c.bf16 %v252_v59, %v252_v59 }
  0xc4   :  { %v653_v57 = vpop.eup %652 }
  0xc5   :  { %v479_v61 = vadd.f32 1.0, %v653_v57 }
  0xc6   :  { %583 = vmatmul.mubr.msk.bf16.vlgmr.msra.gmra.mrb[0].mxu0 %vm101_vm2, %v405_v56 }
  0xc7   :  { %587 = vmatpush3.bf16.msra.mxu0 %v742_v28  ;;  %588 = vmatprep.mubr.msk.bf16.mxu0 %vm670_vm1, %v669_v17  ;;  %v480_v26 = vmul.f32 %v479_v61, %v472_v33 }
  0xc9   :  { %v481_v46 = vpack.c.bf16 %v480_v26, %v480_v26 }
  0xcd   :  { %571 = vmatmul.mubr.msk.bf16.vlgmr.msra.gmra.mrb[0].mxu1 %vm101_vm2, %v253_v62 }
  0xd2   :  { %589 = vmatmul.mubr.msk.bf16.vlgmr.msra.gmra.mrb[0].mxu0 %vm101_vm2, %v481_v46 }
 0x1a0   :  { %v295_v63 = vpop.f32.mrb[0].mxu1 }
 0x1a1   :  { %v572_v0 = vpop.f32.mrb[1].mxu1  ;;  %v592_v41 = vadd.f32 %v536_v39, %v295_v63 }
 0x1a2   :  { %v298_v28 = vpop.f32.mrb[2].mxu1 }
 0x1a3   :  { %v573_v1 = vpop.f32.mrb[3].mxu1 }
 0x1a5   :  { %v523_v2 = vpop.f32.mrb[0].mxu0 }
 0x1a6   :  { %v593_v17 = vadd.f32 %v592_v41, %v523_v2  ;;  %v590_v3 = vpop.f32.mrb[1].mxu0 }
 0x1a7   :  { %v526_v4 = vpop.f32.mrb[2].mxu0 }
 0x1a8   :  { %531 = vst.msk [vmem:[%s854_s5] sm:$0xff] %vm530_vm3, %v593_v17  ;;  %v591_v5 = vpop.f32.mrb[3].mxu0 }

// kernel: _lambda_.19
= control target key start
LH: loop header
LB: loop body
LE: loop exit
PB: predicated region body
PF: predicated region fallthrough
CT: control target
= control target key end

     0   :  { %v113_v0 = vmov 0.0   ;;  %vm114_vm0 = vmmov 0   ;;  %vm43_vm1 = vcmask 261120   ;;  %s158_s1 = inlined_call_operand.vmem [shape: bf16[32,32], index: 1, kind: input, shape index: {}]   ;;  %s159_s0 = inlined_call_operand.vmem [shape: f32[8,32], index: 0, kind: input, shape index: {}]   ;;  %s160_s2 = inlined_call_operand.vmem [shape: f32[1,32], index: 2, kind: input, shape index: {}]   ;;  %s161_s3 = inlined_call_operand.vmem [shape: f32[8,32], index: 3, kind: input, shape index: {}]   ;;  %s162_s4 = inlined_call_operand.vmem [shape: f32[8,32], index: 4, kind: output, shape index: {}]  }
   0x1   :  { %101 = vmatprep.subr.bf16.mxu0 %v113_v0  ;;  %v111_v1 = vld [vmem:[%s158_s1] sm:$0xff]   ;;  %105 = vmatprep.mubr.msk.bf16.mxu0 %vm114_vm0, %v113_v0  ;;  %v112_v2 = vld [vmem:[%s158_s1 + $0x8] sm:$0xff]  }
   0x2   :  { %102 = vmatpush3.bf16.msra.mxu0 %v111_v1  ;;  %v18_v3 = vld [vmem:[%s159_s0] sm:$0xff] }
   0x3   :  { %103 = vmatprep.subr.bf16.mxu0 %v113_v0  ;;  %v19_v4 = vpack.c.bf16 %v18_v3, %v18_v3  ;;  %v94_v5 = vld [vmem:[%s160_s2] ss:$0 sm:$0xff] }
   0x4   :  { %v87_v7 = vld [vmem:[%s161_s3] sm:$0xff] }
   0x6   :  { %104 = vmatpush3.bf16.msra.mxu0 %v112_v2 }
   0x9   :  { %106 = vmatmul.mubr.msk.bf16.vlgmr.msra.gmra.mrb[0].mxu0 %vm43_vm1, %v19_v4 }
  0xdc   :  { %v81_v6 = vpop.f32.mrb[0].mxu0 }
  0xdd   :  { %v82_v8 = vadd.f32 %v94_v5, %v81_v6  ;;  %v107_v9 = vpop.f32.mrb[1].mxu0 }
  0xde   :  { %v84_v10 = vpop.f32.mrb[2].mxu0 }
  0xdf   :  { %v88_v11 = vadd.f32 %v87_v7, %v82_v8  ;;  %v108_v12 = vpop.f32.mrb[3].mxu0 }
  0xe1   :  { %89 = vst.msk [vmem:[%s162_s4] sm:$0xff] %vm43_vm1, %v88_v11 }

// kernel: _lambda_.20
= control target key start
LH: loop header
LB: loop body
LE: loop exit
PB: predicated region body
PF: predicated region fallthrough
CT: control target
= control target key end

     0   :  { %vm28_vm0 = vcmask 261120   ;;  %v324_v8 = vmov 0.0   ;;  %vm325_vm1 = vmmov 0   ;;  %s423_s0 = inlined_call_operand.vmem [shape: f32[8,32], index: 0, kind: input, shape index: {}]   ;;  %s424_s3 = inlined_call_operand.vmem [shape: bf16[32,128], index: 3, kind: input, shape index: {}]   ;;  %s425_s5 = inlined_call_operand.vmem [shape: bf16[128,32], index: 5, kind: input, shape index: {}]   ;;  %s426_s1 = inlined_call_operand.vmem [shape: f32[1,32], index: 1, kind: input, shape index: {}]   ;;  %s427_s2 = inlined_call_operand.vmem [shape: f32[1,32], index: 2, kind: input, shape index: {}]   ;;  %s428_s4 = inlined_call_operand.vmem [shape: f32[1,128], index: 4, kind: input, shape index: {}]   ;;  %s429_s6 = inlined_call_operand.vmem [shape: f32[1,32], index: 6, kind: input, shape index: {}]   ;;  %s430_s7 = inlined_call_operand.vmem [shape: f32[8,32], index: 7, kind: output, shape index: {}]  }
   0x1   :  { %v369_v0 = vld [vmem:[%s423_s0] sm:$0xff]  ;;  %280 = vmatprep.subr.bf16.mxu0 %v324_v8  ;;  %288 = vmatprep.subr.bf16.mxu1 %v324_v8  ;;  %v311_v9 = vld [vmem:[%s424_s3 + $0x8] sm:$0xff]   ;;  %v314_v22 = vld [vmem:[%s425_s5 + $0x10] sm:$0xff]  }
   0x2   :  { %v29_v1 = vsel %vm28_vm0, %v369_v0, 0.0  ;;  %v310_v7 = vld [vmem:[%s424_s3] sm:$0xff]   ;;  %284 = vmatprep.mubr.msk.bf16.mxu0 %vm325_vm1, %v324_v8  ;;  %304 = vmatprep.mubr.msk.bf16.mxu1 %vm325_vm1, %v324_v8  ;;  %v313_v21 = vld [vmem:[%s425_s5 + $0x8] sm:$0xff]   ;;  %v315_v23 = vld [vmem:[%s425_s5 + $0x18] sm:$0xff]  }
   0x3   :  { %30 = vadd.xlane.f32.xlu0 %v29_v1  ;;  %281 = vmatpush3.bf16.msra.mxu0 %v310_v7  ;;  %v312_v10 = vld [vmem:[%s425_s5] sm:$0xff]   ;;  %v317_v25 = vld [vmem:[%s425_s5 + $0x28] sm:$0xff]   ;;  %v318_v26 = vld [vmem:[%s425_s5 + $0x30] sm:$0xff]  }
   0x4   :  { %282 = vmatprep.subr.bf16.mxu0 %v324_v8  ;;  %289 = vmatpush3.bf16.msra.mxu1 %v312_v10  ;;  %v253_v15 = vld [vmem:[%s426_s1] ss:$0 sm:$0xff]  ;;  %v319_v27 = vld [vmem:[%s425_s5 + $0x38] sm:$0xff]  }
   0x5   :  { %290 = vmatprep.subr.bf16.mxu1 %v324_v8  ;;  %v254_v17 = vld [vmem:[%s427_s2] ss:$0 sm:$0xff] }
   0x6   :  { %v316_v24 = vld [vmem:[%s425_s5 + $0x20] sm:$0xff]  }
   0x7   :  { %283 = vmatpush3.bf16.msra.mxu0 %v311_v9  ;;  %v255_v28 = vld [vmem:[%s428_s4] ss:$0 sm:$0xff] }
   0x8   :  { %291 = vmatpush3.bf16.msra.mxu1 %v313_v21  ;;  %v259_v44 = vld [vmem:[%s429_s6] ss:$0 sm:$0xff] }
   0x9   :  { %292 = vmatprep.subr.bf16.mxu1 %v324_v8 }
   0xc   :  { %293 = vmatpush3.bf16.msra.mxu1 %v314_v22 }
   0xd   :  { %294 = vmatprep.subr.bf16.mxu1 %v324_v8 }
  0x10   :  { %295 = vmatpush3.bf16.msra.mxu1 %v315_v23 }
  0x11   :  { %296 = vmatprep.subr.bf16.mxu1 %v324_v8 }
  0x14   :  { %297 = vmatpush3.bf16.msra.mxu1 %v316_v24 }
  0x15   :  { %298 = vmatprep.subr.bf16.mxu1 %v324_v8 }
  0x18   :  { %299 = vmatpush3.bf16.msra.mxu1 %v317_v25 }
  0x19   :  { %300 = vmatprep.subr.bf16.mxu1 %v324_v8 }
  0x1c   :  { %301 = vmatpush3.bf16.msra.mxu1 %v318_v26 }
  0x1d   :  { %302 = vmatprep.subr.bf16.mxu1 %v324_v8 }
  0x20   :  { %303 = vmatpush3.bf16.msra.mxu1 %v319_v27 }
  0x90   :  { %v31_v2 = vpop.xlane.xlu0 %30 }
  0x91   :  { %v33_v3 = vmul.f32 0.03125, %v31_v2 }
  0x93   :  { %v34_v4 = vsub.f32 %v369_v0, %v33_v3 }
  0x95   :  { %v35_v5 = vmul.f32 %v34_v4, %v34_v4 }
  0x97   :  { %v36_v6 = vsel %vm28_vm0, %v35_v5, 0.0 }
  0x98   :  { %37 = vadd.xlane.f32.xlu0 %v36_v6 }
 0x125   :  { %v38_v11 = vpop.xlane.xlu0 %37 }
 0x126   :  { %v39_v12 = vmul.f32 0.03125, %v38_v11 }
 0x128   :  { %v40_v13 = vadd.f32 1e-05, %v39_v12 }
 0x12a   :  { %320 = vrsqrt.f32 %v40_v13 }
 0x134   :  { %v321_v14 = vpop.eup %320 }
 0x135   :  { %v42_v16 = vmul.f32 %v321_v14, %v34_v4 }
 0x137   :  { %v50_v18 = vmul.f32 %v253_v15, %v42_v16 }
 0x139   :  { %v58_v19 = vadd.f32 %v254_v17, %v50_v18 }
 0x13b   :  { %v59_v20 = vpack.c.bf16 %v58_v19, %v58_v19 }
 0x13d   :  { %285 = vmatmul.mubr.msk.bf16.vlgmr.msra.gmra.mrb[0].mxu0 %vm28_vm0, %v59_v20 }
 0x210   :  { %v120_v29 = vpop.f32.mrb[0].mxu0 }
 0x211   :  { %v121_v30 = vadd.f32 %v255_v28, %v120_v29  ;;  %v286_v31 = vpop.f32.mrb[1].mxu0 }
 0x212   :  { %v123_v32 = vpop.f32.mrb[2].mxu0 }
 0x213   :  { %v127_v33 = vmul.f32 0.044715, %v121_v30  ;;  %v287_v34 = vpop.f32.mrb[3].mxu0  ;;  %v126_v40 = vmul.f32 0.5, %v121_v30 }
 0x215   :  { %v128_v35 = vmul.f32 %v127_v33, %v121_v30 }
 0x217   :  { %v129_v36 = vmul.f32 %v128_v35, %v121_v30 }
 0x219   :  { %v130_v37 = vadd.f32 %v129_v36, %v121_v30 }
 0x21b   :  { %v131_v38 = vmul.f32 0.7978846, %v130_v37 }
 0x21d   :  { %322 = vtanh.f32 %v131_v38 }
 0x227   :  { %v323_v39 = vpop.eup %322 }
 0x228   :  { %v133_v41 = vadd.f32 1.0, %v323_v39 }
 0x22a   :  { %v134_v42 = vmul.f32 %v133_v41, %v126_v40 }
 0x22c   :  { %v135_v43 = vpack.c.bf16 %v134_v42, %v134_v42 }
 0x22e   :  { %305 = vmatmul.mubr.bf16.vlgmr.msra.gmra.mrb[0].mxu1 %v135_v43 }
 0x301   :  { %v241_v45 = vpop.f32.mrb[0].mxu1 }
 0x302   :  { %v242_v46 = vadd.f32 %v259_v44, %v241_v45  ;;  %v306_v47 = vpop.f32.mrb[1].mxu1 }
 0x303   :  { %v244_v48 = vpop.f32.mrb[2].mxu1 }
 0x304   :  { %v247_v49 = vadd.f32 %v242_v46, %v369_v0  ;;  %v307_v50 = vpop.f32.mrb[3].mxu1 }
 0x306   :  { %248 = vst.msk [vmem:[%s430_s7] sm:$0xff] %vm28_vm0, %v247_v49 }

// kernel: _lambda_.21
= control target key start
LH: loop header
LB: loop body
LE: loop exit
PB: predicated region body
PF: predicated region fallthrough
CT: control target
= control target key end

     0   :  { %vm22_vm0 = vcmask 261120   ;;  %v160_v8 = vmov 0.0   ;;  %vm161_vm1 = vmmov 0   ;;  %vm129_vm2 = vcmask 523264   ;;  %s216_s0 = inlined_call_operand.vmem [shape: f32[8,32], index: 0, kind: input, shape index: {}]   ;;  %s217_s3 = inlined_call_operand.vmem [shape: bf16[32,64], index: 3, kind: input, shape index: {}]   ;;  %s218_s1 = inlined_call_operand.vmem [shape: f32[1,32], index: 1, kind: input, shape index: {}]   ;;  %s219_s2 = inlined_call_operand.vmem [shape: f32[1,32], index: 2, kind: input, shape index: {}]   ;;  %s220_s4 = inlined_call_operand.vmem [shape: f32[1,64], index: 4, kind: input, shape index: {}]   ;;  %s221_s5 = inlined_call_operand.vmem [shape: f32[8,64], index: 5, kind: output, shape index: {}]  }
   0x1   :  { %v21_v0 = vld [vmem:[%s216_s0] sm:$0xff]  ;;  %144 = vmatprep.subr.bf16.mxu0 %v160_v8  ;;  %v155_v9 = vld [vmem:[%s217_s3 + $0x8] sm:$0xff]   ;;  %148 = vmatprep.mubr.msk.bf16.mxu0 %vm161_vm1, %v160_v8 }
   0x2   :  { %v23_v1 = vsel %vm22_vm0, %v21_v0, 0.0  ;;  %v154_v7 = vld [vmem:[%s217_s3] sm:$0xff]  }
   0x3   :  { %24 = vadd.xlane.f32.xlu0 %v23_v1  ;;  %145 = vmatpush3.bf16.msra.mxu0 %v154_v7  ;;  %v135_v14 = vld [vmem:[%s218_s1] ss:$0 sm:$0xff] }
   0x4   :  { %146 = vmatprep.subr.bf16.mxu0 %v160_v8  ;;  %v136_v16 = vld [vmem:[%s219_s2] ss:$0 sm:$0xff] }
   0x5   :  { %v137_v20 = vld [vmem:[%s220_s4] ss:$0 sm:$0xff] }
   0x7   :  { %147 = vmatpush3.bf16.msra.mxu0 %v155_v9 }
  0x90   :  { %v25_v2 = vpop.xlane.xlu0 %24 }
  0x91   :  { %v27_v3 = vmul.f32 0.03125, %v25_v2 }
  0x93   :  { %v28_v4 = vsub.f32 %v21_v0, %v27_v3 }
  0x95   :  { %v29_v5 = vmul.f32 %v28_v4, %v28_v4 }
  0x97   :  { %v30_v6 = vsel %vm22_vm0, %v29_v5, 0.0 }
  0x98   :  { %31 = vadd.xlane.f32.xlu0 %v30_v6 }
 0x125   :  { %v32_v10 = vpop.xlane.xlu0 %31 }
 0x126   :  { %v33_v11 = vmul.f32 0.03125, %v32_v10 }
 0x128   :  { %v34_v12 = vadd.f32 1e-05, %v33_v11 }
 0x12a   :  { %156 = vrsqrt.f32 %v34_v12 }
 0x134   :  { %v157_v13 = vpop.eup %156 }
 0x135   :  { %v36_v15 = vmul.f32 %v157_v13, %v28_v4 }
 0x137   :  { %v44_v17 = vmul.f32 %v135_v14, %v36_v15 }
 0x139   :  { %v52_v18 = vadd.f32 %v136_v16, %v44_v17 }
 0x13b   :  { %v53_v19 = vpack.c.bf16 %v52_v18, %v52_v18 }
 0x13d   :  { %149 = vmatmul.mubr.msk.bf16.vlgmr.msra.gmra.mrb[0].mxu0 %vm22_vm0, %v53_v19 }
 0x210   :  { %v114_v21 = vpop.f32.mrb[0].mxu0 }
 0x211   :  { %v115_v22 = vadd.f32 %v137_v20, %v114_v21  ;;  %v150_v23 = vpop.f32.mrb[1].mxu0 }
 0x212   :  { %v117_v24 = vpop.f32.mrb[2].mxu0 }
 0x213   :  { %v121_v25 = vmul.f32 0.044715, %v115_v22  ;;  %v151_v26 = vpop.f32.mrb[3].mxu0  ;;  %v120_v32 = vmul.f32 0.5, %v115_v22 }
 0x215   :  { %v122_v27 = vmul.f32 %v121_v25, %v115_v22 }
 0x217   :  { %v123_v28 = vmul.f32 %v122_v27, %v115_v22 }
 0x219   :  { %v124_v29 = vadd.f32 %v123_v28, %v115_v22 }
 0x21b   :  { %v125_v30 = vmul.f32 0.7978846, %v124_v29 }
 0x21d   :  { %158 = vtanh.f32 %v125_v30 }
 0x227   :  { %v159_v31 = vpop.eup %158 }
 0x228   :  { %v127_v33 = vadd.f32 1.0, %v159_v31 }
 0x22a   :  { %v128_v34 = vmul.f32 %v127_v33, %v120_v32 }
 0x22c   :  { %130 = vst.msk [vmem:[%s221_s5] sm:$0xff] %vm129_vm2, %v128_v34 }

// kernel: _lambda_.22
= control target key start
LH: loop header
LB: loop body
LE: loop exit
PB: predicated region body
PF: predicated region fallthrough
CT: control target
= control target key end

     0   :  { %vm24_vm0 = vcmask 523264   ;;  %v253_v29 = vmov 0   ;;  %v97_v55 = vlaneseq  ;;  %s355_s0 = inlined_call_operand.vmem [shape: f32[24,64], index: 0, kind: input, shape index: {}]   ;;  %s356_s3 = inlined_call_operand.vmem [shape: bf16[64,192], index: 3, kind: input, shape index: {}]   ;;  %s357_s1 = inlined_call_operand.vmem [shape: f32[1,64], index: 1, kind: input, shape index: {}]   ;;  %s358_s2 = inlined_call_operand.vmem [shape: f32[1,64], index: 2, kind: input, shape index: {}]   ;;  %s359_s4 = inlined_call_operand.vmem [shape: f32[1,192], index: 4, kind: input, shape index: {}]   ;;  %s360_s5 = inlined_call_operand.vmem [shape: f32[24,192], index: 5, kind: output, shape index: {}]  }
   0x1   :  { %v21_v0 = vld [vmem:[%s355_s0] sm:$0xff]  ;;  %v23_v1 = vld [vmem:[%s355_s0 + $0x10] sm:$0xff]  ;;  %v22_v2 = vld [vmem:[%s355_s0 + $0x8] sm:$0xff]  ;;  %185 = vmatprep.mubr.bf16.mxu0 %v253_v29  ;;  %195 = vmatprep.mubr.bf16.mxu1 %v253_v29 }
   0x2   :  { %v25_v3 = vsel %vm24_vm0, %v21_v0, 0.0  ;;  %v31_v4 = vsel %vm24_vm0, %v23_v1, 0.0  ;;  %v28_v5 = vsel %vm24_vm0, %v22_v2, 0.0  ;;  %v235_v21 = vld [vmem:[%s356_s3 + $0x4] ss:$8 sps:$4 sm:$0xff]   ;;  %v98_v56 = vshrl.u32 %v97_v55, 7 }
   0x3   :  { %26 = vadd.xlane.f32.xlu0 %v25_v3  ;;  %32 = vadd.xlane.f32.xlu1 %v31_v4  ;;  %v237_v22 = vld [vmem:[%s356_s3] ss:$8 sps:$4 sm:$0xff]   ;;  %v238_v23 = vld [vmem:[%s356_s3 + $0x14] ss:$8 sps:$4 sm:$0xff]   ;;  %v240_v24 = vld [vmem:[%s356_s3 + $0x10] ss:$8 sps:$4 sm:$0xff]  }
   0x4   :  { %153 = vmatprep.subr.bf16.mxu0 %v235_v21  ;;  %226 = vmatprep.subr.bf16.mxu1 %v235_v21  ;;  %v241_v25 = vld [vmem:[%s356_s3 + $0x24] ss:$8 sps:$4 sm:$0xff]   ;;  %v243_v26 = vld [vmem:[%s356_s3 + $0x20] ss:$8 sps:$4 sm:$0xff]   ;;  %v244_v27 = vld [vmem:[%s356_s3 + $0x34] ss:$8 sps:$4 sm:$0xff]  }
   0x5   :  { %154 = vmatpush1.bf16.msra.mxu0 %v237_v22  ;;  %230 = vmatpush1.bf16.msra.mxu1 %v237_v22  ;;  %v246_v28 = vld [vmem:[%s356_s3 + $0x30] ss:$8 sps:$4 sm:$0xff]   ;;  %v214_v41 = vld [vmem:[%s357_s1] ss:$0 sm:$0xff]  ;;  %v99_v57 = vsub.s32 0, %v98_v56  ;;  %v103_v59 = vsub.s32 1, %v98_v56 }
   0x6   :  { %155 = vmatprep.subr.bf16.mxu0 %v238_v23  ;;  %227 = vmatprep.subr.bf16.mxu1 %v238_v23  ;;  %v215_v47 = vld [vmem:[%s358_s2] ss:$0 sm:$0xff] }
   0x7   :  { %29 = vadd.xlane.f32.xlu0 %v28_v5  ;;  %v95_v58 = vld [vmem:[%s359_s4] sm:$0x3] }
   0x8   :  { %v100_v60 = vrot.slane %v95_v58, %v99_v57  ;;  %v104_v61 = vrot.slane %v95_v58, %v103_v59 }
   0x9   :  { %156 = vmatpush1.bf16.msra.mxu0 %v240_v24  ;;  %231 = vmatpush1.bf16.msra.mxu1 %v240_v24 }
   0xa   :  { %157 = vmatprep.subr.bf16.mxu0 %v241_v25  ;;  %228 = vmatprep.subr.bf16.mxu1 %v241_v25 }
   0xd   :  { %158 = vmatpush1.bf16.msra.mxu0 %v243_v26  ;;  %232 = vmatpush1.bf16.msra.mxu1 %v243_v26 }
   0xe   :  { %159 = vmatprep.subr.bf16.mxu0 %v244_v27  ;;  %229 = vmatprep.subr.bf16.mxu1 %v244_v27 }
  0x11   :  { %160 = vmatpush1.bf16.msra.mxu0 %v246_v28  ;;  %233 = vmatpush1.bf16.msra.mxu1 %v246_v28 }
  0x90   :  { %v27_v6 = vpop.xlane.xlu0 %26  ;;  %v33_v7 = vpop.xlane.xlu1 %32 }
  0x91   :  { %v35_v8 = vmul.f32 0.015625, %v27_v6  ;;  %v37_v9 = vmul.f32 0.015625, %v33_v7 }
  0x93   :  { %v38_v10 = vsub.f32 %v21_v0, %v35_v8  ;;  %v40_v11 = vsub.f32 %v23_v1, %v37_v9 }
  0x94   :  { %v30_v12 = vpop.xlane.xlu0 %29 }
  0x95   :  { %v36_v13 = vmul.f32 0.015625, %v30_v12  ;;  %v41_v14 = vmul.f32 %v38_v10, %v38_v10  ;;  %v43_v15 = vmul.f32 %v40_v11, %v40_v11 }
  0x97   :  { %v39_v16 = vsub.f32 %v22_v2, %v36_v13  ;;  %v44_v17 = vsel %vm24_vm0, %v41_v14, 0.0  ;;  %v50_v18 = vsel %vm24_vm0, %v43_v15, 0.0 }
  0x98   :  { %45 = vadd.xlane.f32.xlu1 %v44_v17 }
  0x99   :  { %v42_v19 = vmul.f32 %v39_v16, %v39_v16 }
  0x9b   :  { %v47_v20 = vsel %vm24_vm0, %v42_v19, 0.0 }
  0x9c   :  { %51 = vadd.xlane.f32.xlu1 %v50_v18  ;;  %48 = vadd.xlane.f32.xlu0 %v47_v20 }
 0x125   :  { %v46_v30 = vpop.xlane.xlu1 %45 }
 0x126   :  { %v53_v31 = vmul.f32 0.015625, %v46_v30 }
 0x128   :  { %v56_v32 = vadd.f32 1e-05, %v53_v31 }
 0x129   :  { %v52_v33 = vpop.xlane.xlu1 %51  ;;  %v49_v34 = vpop.xlane.xlu0 %48 }
 0x12a   :  { %247 = vrsqrt.f32 %v56_v32  ;;  %v55_v35 = vmul.f32 0.015625, %v52_v33  ;;  %v54_v36 = vmul.f32 0.015625, %v49_v34 }
 0x12c   :  { %v58_v37 = vadd.f32 1e-05, %v55_v35  ;;  %v57_v38 = vadd.f32 1e-05, %v54_v36 }
 0x12e   :  { %249 = vrsqrt.f32 %v58_v37 }
 0x12f   :  { %251 = vrsqrt.f32 %v57_v38 }
 0x134   :  { %v248_v39 = vpop.eup %247 }
 0x135   :  { %v62_v40 = vmul.f32 %v248_v39, %v38_v10 }
 0x137   :  { %v72_v46 = vmul.f32 %v214_v41, %v62_v40 }
 0x138   :  { %v250_v42 = vpop.eup %249 }
 0x139   :  { %v252_v43 = vpop.eup %251  ;;  %v64_v44 = vmul.f32 %v250_v42, %v40_v11  ;;  %v82_v51 = vadd.f32 %v215_v47, %v72_v46 }
 0x13a   :  { %v63_v45 = vmul.f32 %v252_v43, %v39_v16 }
 0x13b   :  { %v74_v48 = vmul.f32 %v214_v41, %v64_v44 }
 0x13c   :  { %v73_v49 = vmul.f32 %v214_v41, %v63_v45 }
 0x13d   :  { %v84_v50 = vadd.f32 %v215_v47, %v74_v48 }
 0x13e   :  { %v83_v52 = vadd.f32 %v215_v47, %v73_v49 }
 0x13f   :  { %v86_v53 = vpack.c.bf16 %v84_v50, %v84_v50 }
 0x140   :  { %v85_v54 = vpack.c.bf16 %v83_v52, %v82_v51 }
 0x141   :  { %225 = vmatmul.mubr.msk.bf16.vlgmr.msra.gmra.mrb[0].mxu1 %vm24_vm0, %v86_v53 }
 0x142   :  { %224 = vmatmul.mubr.msk.bf16.vlgmr.msra.gmra.mrb[0].mxu0 %vm24_vm0, %v85_v54 }
 0x214   :  { %v197_v62 = vpop.f32.mrb[0].mxu1 }
 0x215   :  { %v187_v63 = vpop.f32.mrb[0].mxu0  ;;  %v198_v0 = vadd.f32 %v197_v62, %v100_v60  ;;  %v199_v1 = vpop.f32.mrb[1].mxu1 }
 0x216   :  { %v188_v2 = vadd.f32 %v187_v63, %v100_v60  ;;  %v189_v3 = vpop.f32.mrb[1].mxu0  ;;  %v200_v4 = vadd.f32 %v199_v1, %v104_v61  ;;  %v201_v5 = vpop.f32.mrb[2].mxu1 }
 0x217   :  { %208 = vst [vmem:[%s360_s5 + $0x20] sm:$0xff] %v198_v0  ;;  %v190_v6 = vadd.f32 %v189_v3, %v104_v61  ;;  %v191_v7 = vpop.f32.mrb[2].mxu0  ;;  %v202_v8 = vpop.f32.mrb[3].mxu1 }
 0x218   :  { %204 = vst [vmem:[%s360_s5] sm:$0xff] %v188_v2  ;;  %209 = vst.msk [vmem:[%s360_s5 + $0x28] sm:$0xff] %vm24_vm0, %v200_v4  ;;  %v192_v9 = vadd.f32 %v191_v7, %v100_v60  ;;  %v193_v10 = vpop.f32.mrb[3].mxu0 }
 0x219   :  { %205 = vst.msk [vmem:[%s360_s5 + $0x8] sm:$0xff] %vm24_vm0, %v190_v6  ;;  %v194_v11 = vadd.f32 %v193_v10, %v104_v61 }
 0x21a   :  { %206 = vst [vmem:[%s360_s5 + $0x10] sm:$0xff] %v192_v9 }
 0x21b   :  { %207 = vst.msk [vmem:[%s360_s5 + $0x18] sm:$0xff] %vm24_vm0, %v194_v11 }

// kernel: _lambda_.23
= control target key start
LH: loop header
LB: loop body
LE: loop exit
PB: predicated region body
PF: predicated region fallthrough
CT: control target
= control target key end

     0   :  { %s740_s15 = smov 0   ;;  %s796_s0 = inlined_call_operand.vmem [shape: f32[2,2,12,32], index: 0, kind: input, shape index: {}]   ;;  %s797_s1 = inlined_call_operand.vmem [shape: f32[2,2,12,32], index: 1, kind: input, shape index: {}]   ;;  %s798_s2 = inlined_call_operand.vmem [shape: f32[2,2,12,32], index: 2, kind: input, shape index: {}]   ;;  %s799_s3 = inlined_call_operand.vmem [shape: f32[2,1,12,12], index: 3, kind: input, shape index: {}]   ;;  %s800_s4 = inlined_call_operand.vmem [shape: f32[2,2,12,32], index: 4, kind: output, shape index: {}]  }
   0x1 LB: > { %s621_s16 = sadd.s32 4294967295, %s711_s15   ;;  %p625_p0 = scmp.ge.s32.totalorder %s711_s15, 1  ;;  %s711_s15 = sphi %s740_s15, %s14_s15  }
   0x2   : > { %p192_p1 = scmp.lt.s32.totalorder %s711_s15, 3 }
   0x4   : > { %p193_p2 = pnand %p625_p0, %p192_p1 }
   0x5   : > { %p233_p3 = scmp.lt.s32.totalorder (!%p193_p2), %s621_s16, 1  ;;  %v713_v0 = vmov (!%p193_p2), 0.0   ;;  %vm714_vm0 = vmmov (!%p193_p2), 0   ;;  %vm277_vm1 = vcmask (!%p193_p2), 261120   ;;  %vm382_vm2 = vcmask (!%p193_p2), 97280  }
   0x6   : > { %196 = sbr.rel (%p193_p2) target bundleno = 782 (0x30e), region = 36  ;;  %655 = vmatprep.subr.bf16.mxu0 (!%p193_p2), %v713_v0  ;;  %661 = vmatprep.subr.bf16.mxu1 (!%p193_p2), %v713_v0  ;;  %vm386_vm3 = vcmask (!%p193_p2), 93184   ;;  %vm433_vm4 = vcmask (!%p193_p2), 1045504   ;;  %vm526_vm5 = vcmask (!%p193_p2), 257024  }
   0x7   : > { %657 = vmatprep.mubr.msk.bf16.mxu0 (!%p193_p2), %vm714_vm0, %v713_v0  ;;  %663 = vmatprep.mubr.msk.bf16.mxu1 (!%p193_p2), %vm714_vm0, %v713_v0 }
   0xd   : > { %s802_s16 = smov (!%p233_p3, %s621_s16), 1 }
   0xe   : > { %s753_s17 = sshll.u32 %s802_s16, 5  ;;  %s645_s24 = sshll.u32 %s802_s16, 4 }
   0xf   : > { %s242_s20 = scalar_lea.vmem %s797_s1, %s753_s17  ;;  %s237_s23 = scalar_lea.vmem %s796_s0, %s753_s17 }
  0x10   : > { %v265_v1 = vld [vmem:[%s242_s20] sm:$0xff]  ;;  %v266_v2 = vld [vmem:[%s242_s20 + $0x8] sm:$0xf]  ;;  %v267_v3 = vld [vmem:[%s242_s20 + $0x10] sm:$0xff]  ;;  %s252_s27 = scalar_lea.vmem %s799_s3, %s645_s24  ;;  %s247_s30 = scalar_lea.vmem %s798_s2, %s753_s17 }
  0x11   : > { %v269_v4 = vpack.c.bf16 %v266_v2, %v265_v1  ;;  %v268_v5 = vld [vmem:[%s242_s20 + $0x18] sm:$0xf]  ;;  %v259_v9 = vld [vmem:[%s237_s23] sm:$0xff]  ;;  %v260_v10 = vld [vmem:[%s237_s23 + $0x8] sm:$0xf]  ;;  %s257_s7 = scalar_lea.vmem %s800_s4, %s753_s17 }
  0x12   : > { %v270_v6 = vpack.c.bf16 %v268_v5, %v267_v3  ;;  %v261_v11 = vld [vmem:[%s237_s23 + $0x10] sm:$0xff]  ;;  %v262_v12 = vld [vmem:[%s237_s23 + $0x18] sm:$0xf]  ;;  %v263_v13 = vpack.c.bf16 %v260_v10, %v259_v9  ;;  %v376_v16 = vld [vmem:[%s252_s27] sm:$0xff] }
  0x13   : > { %v282_v7 = vsel %vm277_vm1, %v269_v4, 0  ;;  %v264_v14 = vpack.c.bf16 %v262_v12, %v261_v11  ;;  %v377_v23 = vld [vmem:[%s252_s27 + $0x8] sm:$0xf]  ;;  %v271_v57 = vld [vmem:[%s247_s30] sm:$0xff]  ;;  %v273_v61 = vld [vmem:[%s247_s30 + $0x10] sm:$0xff] }
  0x14   : > { %656 = vmatpush3.bf16.xpose.msra.mxu0 %v282_v7  ;;  %v329_v8 = vsel %vm277_vm1, %v270_v6, 0  ;;  %v272_v58 = vld [vmem:[%s247_s30 + $0x8] sm:$0xf]  ;;  %v274_v62 = vld [vmem:[%s247_s30 + $0x18] sm:$0xf] }
  0x15   : > { %662 = vmatpush3.bf16.xpose.msra.mxu1 %v329_v8  ;;  %667 = vmatprep.subr.bf16.mxu0 %v713_v0  ;;  %v275_v59 = vpack.c.bf16 %v272_v58, %v271_v57  ;;  %v276_v63 = vpack.c.bf16 %v274_v62, %v273_v61 }
  0x16   : > { %673 = vmatprep.subr.bf16.mxu1 %v713_v0 }
  0x17   : > { %v435_v60 = vsel %vm433_vm4, %v275_v59, 0 }
  0x1b   : > { %658 = vmatmul.mubr.msk.bf16.vlgmr.msra.gmra.mrb[0].mxu0 %vm277_vm1, %v263_v13 }
  0x1c   : > { %664 = vmatmul.mubr.msk.bf16.vlgmr.msra.gmra.mrb[0].mxu1 %vm277_vm1, %v264_v14  ;;  %669 = vmatprep.mubr.msk.bf16.mxu0 %vm714_vm0, %v713_v0 }
  0x1d   : > { %675 = vmatprep.mubr.msk.bf16.mxu1 %vm714_vm0, %v713_v0  ;;  %668 = vmatpush3.bf16.msra.mxu0 %v435_v60  ;;  %v482_v0 = vsel %vm433_vm4, %v276_v63, 0 }
  0x1e   : > { %674 = vmatpush3.bf16.msra.mxu1 %v482_v0 }
  0xee   : > { %v318_v15 = vpop.f32.mrb[0].mxu0 }
  0xef   : > { %v372_v17 = vmul.f32 0.17677669, %v318_v15  ;;  %v365_v18 = vpop.f32.mrb[0].mxu1  ;;  %v659_v19 = vpop.f32.mrb[1].mxu0 }
  0xf0   : > { %v374_v20 = vmul.f32 0.17677669, %v365_v18  ;;  %v321_v21 = vpop.f32.mrb[2].mxu0  ;;  %v665_v22 = vpop.f32.mrb[1].mxu1 }
  0xf1   : > { %v373_v24 = vmul.f32 0.17677669, %v321_v21  ;;  %v660_v25 = vpop.f32.mrb[3].mxu0  ;;  %v368_v26 = vpop.f32.mrb[2].mxu1  ;;  %v378_v27 = vadd.f32 %v376_v16, %v372_v17 }
  0xf2   : > { %v375_v28 = vmul.f32 0.17677669, %v368_v26  ;;  %v666_v29 = vpop.f32.mrb[3].mxu1  ;;  %v380_v30 = vadd.f32 %v376_v16, %v374_v20 }
  0xf3   : > { %v383_v31 = vsel %vm382_vm2, %v378_v27, -inf  ;;  %v379_v32 = vadd.f32 %v377_v23, %v373_v24 }
  0xf4   : > { %v390_v33 = vsel %vm382_vm2, %v380_v30, -inf  ;;  %384 = vmax.xlane.f32.xlu0 %v383_v31  ;;  %v381_v34 = vadd.f32 %v377_v23, %v375_v28 }
  0xf5   : > { %391 = vmax.xlane.f32.xlu1 %v390_v33  ;;  %v387_v36 = vsel %vm386_vm3, %v379_v32, -inf }
  0xf6   : > { %v393_v35 = vsel %vm386_vm3, %v381_v34, -inf }
  0xf8   : > { %388 = vmax.xlane.f32.xlu0 %v387_v36 }
  0xf9   : > { %394 = vmax.xlane.f32.xlu1 %v393_v35 }
 0x181   : > { %v385_v37 = vpop.xlane.xlu0 %384 }
 0x182   : > { %v392_v38 = vpop.xlane.xlu1 %391  ;;  %v396_v39 = vsub.f32 %v378_v27, %v385_v37 }
 0x183   : > { %v398_v40 = vsub.f32 %v380_v30, %v392_v38 }
 0x184   : > { %v400_v41 = vmul.f32 1.442695, %v396_v39 }
 0x185   : > { %v404_v42 = vmul.f32 1.442695, %v398_v40  ;;  %v389_v43 = vpop.xlane.xlu0 %388 }
 0x186   : > { %689 = vpow2.f32 %v400_v41  ;;  %v395_v44 = vpop.xlane.xlu1 %394  ;;  %v397_v45 = vsub.f32 %v379_v32, %v389_v43 }
 0x187   : > { %v399_v46 = vsub.f32 %v381_v34, %v395_v44  ;;  %691 = vpow2.f32 %v404_v42 }
 0x188   : > { %v402_v47 = vmul.f32 1.442695, %v397_v45 }
 0x189   : > { %v406_v48 = vmul.f32 1.442695, %v399_v46 }
 0x18a   : > { %693 = vpow2.f32 %v402_v47 }
 0x18b   : > { %695 = vpow2.f32 %v406_v48 }
 0x190   : > { %v690_v49 = vpop.eup %689 }
 0x191   : > { %v408_v50 = vsel %vm382_vm2, %v690_v49, 0.0  ;;  %v692_v51 = vpop.eup %691 }
 0x192   : > { %409 = vadd.xlane.f32.xlu0 %v408_v50  ;;  %v414_v53 = vsel %vm382_vm2, %v692_v51, 0.0 }
 0x194   : > { %v694_v52 = vpop.eup %693 }
 0x195   : > { %v411_v54 = vsel %vm386_vm3, %v694_v52, 0.0  ;;  %v696_v55 = vpop.eup %695 }
 0x196   : > { %415 = vadd.xlane.f32.xlu0 %v414_v53  ;;  %412 = vadd.xlane.f32.xlu1 %v411_v54  ;;  %v417_v56 = vsel %vm386_vm3, %v696_v55, 0.0 }
 0x19a   : > { %418 = vadd.xlane.f32.xlu1 %v417_v56 }
 0x21f   : > { %v410_v1 = vpop.xlane.xlu0 %409 }
 0x220   : > { %697 = vrcp.f32 %v410_v1 }
 0x223   : > { %v413_v2 = vpop.xlane.xlu1 %412  ;;  %v416_v3 = vpop.xlane.xlu0 %415 }
 0x224   : > { %699 = vrcp.f32 %v413_v2 }
 0x225   : > { %701 = vrcp.f32 %v416_v3 }
 0x227   : > { %v419_v4 = vpop.xlane.xlu1 %418 }
 0x228   : > { %703 = vrcp.f32 %v419_v4 }
 0x22a   : > { %v698_v5 = vpop.eup %697 }
 0x22b   : > { %v424_v7 = vmul.f32 %v698_v5, %v690_v49 }
 0x22e   : > { %v700_v6 = vpop.eup %699 }
 0x22f   : > { %v425_v8 = vmul.f32 %v700_v6, %v694_v52  ;;  %v702_v9 = vpop.eup %701 }
 0x230   : > { %v426_v12 = vmul.f32 %v702_v9, %v692_v51 }
 0x231   : > { %v428_v10 = vpack.c.bf16 %v425_v8, %v424_v7 }
 0x232   : > { %v704_v11 = vpop.eup %703 }
 0x233   : > { %v427_v13 = vmul.f32 %v704_v11, %v696_v55  ;;  %670 = vmatmul.mubr.msk.bf16.vlgmr.msra.gmra.mrb[4].mxu0 %vm382_vm2, %v428_v10 }
 0x235   : > { %v429_v14 = vpack.c.bf16 %v427_v13, %v426_v12 }
 0x237   : > { %676 = vmatmul.mubr.msk.bf16.vlgmr.msra.gmra.mrb[4].mxu1 %vm382_vm2, %v429_v14 }
 0x306   : > { %v471_v15 = vpop.f32.mrb[4].mxu0 }
 0x307   : > { %525 = vst.msk [vmem:[%s257_s7] sm:$0xff] %vm277_vm1, %v471_v15  ;;  %v671_v16 = vpop.f32.mrb[5].mxu0 }
 0x308   : > { %v474_v17 = vpop.f32.mrb[6].mxu0 }
 0x309   : > { %527 = vst.msk [vmem:[%s257_s7 + $0x8] sm:$0xf] %vm526_vm5, %v474_v17  ;;  %v672_v18 = vpop.f32.mrb[7].mxu0 }
 0x30a   : > { %v518_v19 = vpop.f32.mrb[4].mxu1 }
 0x30b   : > { %528 = vst.msk [vmem:[%s257_s7 + $0x10] sm:$0xff] %vm277_vm1, %v518_v19  ;;  %v677_v20 = vpop.f32.mrb[5].mxu1 }
 0x30c   : > { %v521_v21 = vpop.f32.mrb[6].mxu1 }
 0x30d   : > { %529 = vst.msk [vmem:[%s257_s7 + $0x18] sm:$0xf] %vm526_vm5, %v521_v21  ;;  %v678_v22 = vpop.f32.mrb[7].mxu1 }
 0x30e PF: > { %s14_s15 = sadd.s32 1, %s711_s15  }
 0x30f   : > { %p11_p4 = scmp.ge.s32.totalorder %s14_s15, 4  }
 0x311   :  { %13 = sbr.rel (!%p11_p4) target bundleno = 1 (0x1), region = 75 }

// kernel: _lambda_.24
= control target key start
LH: loop header
LB: loop body
LE: loop exit
PB: predicated region body
PF: predicated region fallthrough
CT: control target
= control target key end

     0   :  { %vm62_vm0 = vcmask 523264   ;;  %s231_s1 = inlined_call_operand.vmem [shape: bf16[64,64], index: 1, kind: input, shape index: {}]   ;;  %s232_s0 = inlined_call_operand.vmem [shape: f32[24,64], index: 0, kind: input, shape index: {}]   ;;  %s233_s2 = inlined_call_operand.vmem [shape: f32[1,64], index: 2, kind: input, shape index: {}]   ;;  %s234_s3 = inlined_call_operand.vmem [shape: f32[24,64], index: 3, kind: input, shape index: {}]   ;;  %s235_s4 = inlined_call_operand.vmem [shape: f32[24,64], index: 4, kind: output, shape index: {}]  }
   0x1   :  { %v155_v0 = vld [vmem:[%s231_s1] sm:$0xff]   ;;  %v156_v1 = vld [vmem:[%s231_s1 + $0x8] sm:$0xff]   ;;  %v157_v2 = vld [vmem:[%s231_s1 + $0x10] sm:$0xff]  }
   0x2   :  { %143 = vmatprep.subr.bf16.mxu0 %v155_v0  ;;  %v18_v3 = vld [vmem:[%s232_s0] sm:$0xff]  ;;  %v19_v4 = vld [vmem:[%s232_s0 + $0x8] sm:$0xff]  ;;  %v158_v6 = vld [vmem:[%s231_s1 + $0x18] sm:$0xff]  }
   0x3   :  { %144 = vmatpush3.bf16.msra.mxu0 %v155_v0  ;;  %v21_v5 = vpack.c.bf16 %v19_v4, %v18_v3  ;;  %v20_v7 = vld [vmem:[%s232_s0 + $0x10] sm:$0xff]  ;;  %v130_v9 = vld [vmem:[%s233_s2] ss:$0 sm:$0xff]  ;;  %v118_v19 = vld [vmem:[%s234_s3 + $0x8] sm:$0xff] }
   0x4   :  { %145 = vmatprep.subr.bf16.mxu0 %v156_v1  ;;  %v22_v8 = vpack.c.bf16 %v20_v7, %v20_v7  ;;  %v119_v11 = vld [vmem:[%s234_s3 + $0x10] sm:$0xff]  ;;  %v117_v14 = vld [vmem:[%s234_s3] sm:$0xff] }
   0x5   :  { %151 = vmatprep.mubr.msk.bf16.mxu0 %vm62_vm0, %v21_v5 }
   0x7   :  { %146 = vmatpush3.bf16.msra.mxu0 %v156_v1 }
   0x8   :  { %147 = vmatprep.subr.bf16.mxu0 %v157_v2 }
   0xb   :  { %148 = vmatpush3.bf16.msra.mxu0 %v157_v2 }
   0xc   :  { %149 = vmatprep.subr.bf16.mxu0 %v158_v6 }
   0xf   :  { %150 = vmatpush3.bf16.msra.mxu0 %v158_v6 }
  0x12   :  { %152 = vmatmul.mubr.msk.bf16.vlgmr.msra.gmra.mrb[0].mxu0 %vm62_vm0, %v22_v8 }
  0xe5   :  { %v153_v10 = vpop.f32.mrb[0].mxu0 }
  0xe6   :  { %v112_v12 = vadd.f32 %v153_v10, %v130_v9  ;;  %v103_v13 = vpop.f32.mrb[1].mxu0 }
  0xe7   :  { %v104_v15 = vadd.f32 %v130_v9, %v103_v13  ;;  %v154_v16 = vpop.f32.mrb[2].mxu0 }
  0xe8   :  { %v122_v17 = vadd.f32 %v119_v11, %v112_v12  ;;  %v106_v18 = vpop.f32.mrb[3].mxu0 }
  0xe9   :  { %v120_v20 = vadd.f32 %v117_v14, %v104_v15  ;;  %v107_v21 = vadd.f32 %v130_v9, %v106_v18 }
  0xea   :  { %125 = vst.msk [vmem:[%s235_s4 + $0x10] sm:$0xff] %vm62_vm0, %v122_v17 }
  0xeb   :  { %123 = vst.msk [vmem:[%s235_s4] sm:$0xff] %vm62_vm0, %v120_v20  ;;  %v121_v22 = vadd.f32 %v118_v19, %v107_v21 }
  0xed   :  { %124 = vst.msk [vmem:[%s235_s4 + $0x8] sm:$0xff] %vm62_vm0, %v121_v22 }

// kernel: _lambda_.25
= control target key start
LH: loop header
LB: loop body
LE: loop exit
PB: predicated region body
PF: predicated region fallthrough
CT: control target
= control target key end

     0   :  { %vm30_vm0 = vcmask 523264   ;;  %v565_v29 = vmov 0   ;;  %s734_s0 = inlined_call_operand.vmem [shape: f32[24,64], index: 0, kind: input, shape index: {}]   ;;  %s735_s3 = inlined_call_operand.vmem [shape: bf16[64,256], index: 3, kind: input, shape index: {}]   ;;  %s736_s1 = inlined_call_operand.vmem [shape: f32[1,64], index: 1, kind: input, shape index: {}]   ;;  %s737_s2 = inlined_call_operand.vmem [shape: f32[1,64], index: 2, kind: input, shape index: {}]   ;;  %s738_s5 = inlined_call_operand.vmem [shape: bf16[256,64], index: 5, kind: input, shape index: {}]   ;;  %s739_s4 = inlined_call_operand.vmem [shape: f32[1,256], index: 4, kind: input, shape index: {}]   ;;  %s740_s6 = inlined_call_operand.vmem [shape: f32[1,64], index: 6, kind: input, shape index: {}]   ;;  %s741_s7 = inlined_call_operand.vmem [shape: f32[24,64], index: 7, kind: output, shape index: {}]  }
   0x1   :  { %v609_v0 = vld [vmem:[%s734_s0] sm:$0xff]  ;;  %v614_v1 = vld [vmem:[%s734_s0 + $0x10] sm:$0xff]  ;;  %v619_v2 = vld [vmem:[%s734_s0 + $0x8] sm:$0xff]  ;;  %191 = vmatprep.mubr.bf16.mxu0 %v565_v29 }
   0x2   :  { %v31_v3 = vsel %vm30_vm0, %v609_v0, 0.0  ;;  %v37_v4 = vsel %vm30_vm0, %v614_v1, 0.0  ;;  %v34_v5 = vsel %vm30_vm0, %v619_v2, 0.0  ;;  %v519_v21 = vld [vmem:[%s735_s3 + $0x4] ss:$8 sps:$4 sm:$0xff]   ;;  %v535_v59 = vld [vmem:[%s738_s5 + $0x50] sm:$0xff]  }
   0x3   :  { %32 = vadd.xlane.f32.xlu0 %v31_v3  ;;  %38 = vadd.xlane.f32.xlu1 %v37_v4  ;;  %v521_v22 = vld [vmem:[%s735_s3] ss:$8 sps:$4 sm:$0xff]   ;;  %v522_v23 = vld [vmem:[%s735_s3 + $0x14] ss:$8 sps:$4 sm:$0xff]   ;;  %v524_v24 = vld [vmem:[%s735_s3 + $0x10] ss:$8 sps:$4 sm:$0xff]  }
   0x4   :  { %159 = vmatprep.subr.bf16.mxu0 %v519_v21  ;;  %v525_v25 = vld [vmem:[%s735_s3 + $0x24] ss:$8 sps:$4 sm:$0xff]   ;;  %v527_v26 = vld [vmem:[%s735_s3 + $0x20] ss:$8 sps:$4 sm:$0xff]   ;;  %v528_v27 = vld [vmem:[%s735_s3 + $0x34] ss:$8 sps:$4 sm:$0xff]  }
   0x5   :  { %160 = vmatpush1.bf16.msra.mxu0 %v521_v22  ;;  %v530_v28 = vld [vmem:[%s735_s3 + $0x30] ss:$8 sps:$4 sm:$0xff]   ;;  %v461_v41 = vld [vmem:[%s736_s1] ss:$0 sm:$0xff]  ;;  %v533_v57 = vld [vmem:[%s738_s5 + $0x48] sm:$0xff]  }
   0x6   :  { %161 = vmatprep.subr.bf16.mxu0 %v522_v23  ;;  %v462_v46 = vld [vmem:[%s737_s2] ss:$0 sm:$0xff]  ;;  %v534_v58 = vld [vmem:[%s738_s5 + $0x8] sm:$0xff]   ;;  %v536_v60 = vld [vmem:[%s738_s5 + $0x10] sm:$0xff]  }
   0x7   :  { %35 = vadd.xlane.f32.xlu0 %v34_v5  ;;  %v531_v55 = vld [vmem:[%s738_s5 + $0x40] sm:$0xff]   ;;  %v537_v61 = vld [vmem:[%s738_s5 + $0x58] sm:$0xff]   ;;  %v541_v4 = vld [vmem:[%s738_s5 + $0x68] sm:$0xff]  }
   0x8   :  { %v532_v56 = vld [vmem:[%s738_s5] sm:$0xff]   ;;  %490 = vmatprep.subr.bf16.mxu1 %v531_v55  ;;  %v538_v62 = vld [vmem:[%s738_s5 + $0x18] sm:$0xff]   ;;  %v542_v5 = vld [vmem:[%s738_s5 + $0x28] sm:$0xff]  }
   0x9   :  { %162 = vmatpush1.bf16.msra.mxu0 %v524_v24  ;;  %491 = vmatpush3.bf16.msra.mxu1 %v532_v56  ;;  %v539_v63 = vld [vmem:[%s738_s5 + $0x60] sm:$0xff]  }
   0xa   :  { %163 = vmatprep.subr.bf16.mxu0 %v525_v25  ;;  %492 = vmatprep.subr.bf16.mxu1 %v533_v57  ;;  %v540_v3 = vld [vmem:[%s738_s5 + $0x20] sm:$0xff]  }
   0xd   :  { %164 = vmatpush1.bf16.msra.mxu0 %v527_v26  ;;  %493 = vmatpush3.bf16.msra.mxu1 %v534_v58 }
   0xe   :  { %165 = vmatprep.subr.bf16.mxu0 %v528_v27  ;;  %494 = vmatprep.subr.bf16.mxu1 %v535_v59 }
  0x11   :  { %166 = vmatpush1.bf16.msra.mxu0 %v530_v28  ;;  %495 = vmatpush3.bf16.msra.mxu1 %v536_v60 }
  0x12   :  { %496 = vmatprep.subr.bf16.mxu1 %v537_v61 }
  0x15   :  { %497 = vmatpush3.bf16.msra.mxu1 %v538_v62 }
  0x16   :  { %498 = vmatprep.subr.bf16.mxu1 %v539_v63 }
  0x19   :  { %499 = vmatpush3.bf16.msra.mxu1 %v540_v3 }
  0x1a   :  { %500 = vmatprep.subr.bf16.mxu1 %v541_v4 }
  0x1d   :  { %501 = vmatpush3.bf16.msra.mxu1 %v542_v5 }
  0x90   :  { %v33_v6 = vpop.xlane.xlu0 %32  ;;  %v39_v7 = vpop.xlane.xlu1 %38 }
  0x91   :  { %v41_v8 = vmul.f32 0.015625, %v33_v6  ;;  %v43_v9 = vmul.f32 0.015625, %v39_v7  ;;  %v543_v6 = vld [vmem:[%s738_s5 + $0x70] sm:$0xff]  }
  0x92   :  { %v544_v7 = vld [vmem:[%s738_s5 + $0x30] sm:$0xff]   ;;  %502 = vmatprep.subr.bf16.mxu1 %v543_v6 }
  0x93   :  { %v44_v10 = vsub.f32 %v609_v0, %v41_v8  ;;  %v46_v11 = vsub.f32 %v614_v1, %v43_v9  ;;  %v545_v8 = vld [vmem:[%s738_s5 + $0x78] sm:$0xff]   ;;  %503 = vmatpush3.bf16.msra.mxu1 %v544_v7 }
  0x94   :  { %v36_v12 = vpop.xlane.xlu0 %35  ;;  %v546_v9 = vld [vmem:[%s738_s5 + $0x38] sm:$0xff]   ;;  %504 = vmatprep.subr.bf16.mxu1 %v545_v8 }
  0x95   :  { %v42_v13 = vmul.f32 0.015625, %v36_v12  ;;  %v47_v14 = vmul.f32 %v44_v10, %v44_v10  ;;  %v49_v15 = vmul.f32 %v46_v11, %v46_v11 }
  0x97   :  { %v45_v16 = vsub.f32 %v619_v2, %v42_v13  ;;  %v50_v17 = vsel %vm30_vm0, %v47_v14, 0.0  ;;  %v56_v18 = vsel %vm30_vm0, %v49_v15, 0.0  ;;  %505 = vmatpush3.bf16.msra.mxu1 %v546_v9  ;;  %v101_v13 = vld [vmem:[%s739_s4] sm:$0x3] }
  0x98   :  { %51 = vadd.xlane.f32.xlu1 %v50_v17 }
  0x99   :  { %v48_v19 = vmul.f32 %v45_v16, %v45_v16 }
  0x9b   :  { %v53_v20 = vsel %vm30_vm0, %v48_v19, 0.0 }
  0x9c   :  { %57 = vadd.xlane.f32.xlu1 %v56_v18  ;;  %54 = vadd.xlane.f32.xlu0 %v53_v20 }
 0x125   :  { %v52_v30 = vpop.xlane.xlu1 %51 }
 0x126   :  { %v59_v31 = vmul.f32 0.015625, %v52_v30 }
 0x128   :  { %v62_v32 = vadd.f32 1e-05, %v59_v31 }
 0x129   :  { %v58_v33 = vpop.xlane.xlu1 %57  ;;  %v55_v34 = vpop.xlane.xlu0 %54 }
 0x12a   :  { %547 = vrsqrt.f32 %v62_v32  ;;  %v61_v35 = vmul.f32 0.015625, %v58_v33  ;;  %v60_v36 = vmul.f32 0.015625, %v55_v34 }
 0x12c   :  { %v64_v37 = vadd.f32 1e-05, %v61_v35  ;;  %v63_v38 = vadd.f32 1e-05, %v60_v36 }
 0x12e   :  { %549 = vrsqrt.f32 %v64_v37 }
 0x12f   :  { %551 = vrsqrt.f32 %v63_v38 }
 0x134   :  { %v548_v39 = vpop.eup %547 }
 0x135   :  { %v68_v40 = vmul.f32 %v548_v39, %v44_v10  ;;  %v103_v10 = vlaneseq }
 0x137   :  { %v78_v45 = vmul.f32 %v461_v41, %v68_v40 }
 0x138   :  { %v550_v42 = vpop.eup %549 }
 0x139   :  { %v552_v43 = vpop.eup %551  ;;  %v70_v47 = vmul.f32 %v550_v42, %v46_v11  ;;  %v88_v49 = vadd.f32 %v462_v46, %v78_v45  ;;  %v104_v11 = vshrl.u32 %v103_v10, 7 }
 0x13a   :  { %v69_v44 = vmul.f32 %v552_v43, %v45_v16 }
 0x13b   :  { %v80_v52 = vmul.f32 %v461_v41, %v70_v47  ;;  %v105_v12 = vsub.s32 0, %v104_v11  ;;  %v109_v14 = vsub.s32 1, %v104_v11 }
 0x13c   :  { %v79_v48 = vmul.f32 %v461_v41, %v69_v44 }
 0x13d   :  { %v90_v53 = vadd.f32 %v462_v46, %v80_v52  ;;  %v106_v15 = vrot.slane %v101_v13, %v105_v12  ;;  %v110_v16 = vrot.slane %v101_v13, %v109_v14 }
 0x13e   :  { %v89_v50 = vadd.f32 %v462_v46, %v79_v48 }
 0x13f   :  { %v92_v54 = vpack.c.bf16 %v90_v53, %v90_v53 }
 0x140   :  { %v91_v51 = vpack.c.bf16 %v89_v50, %v88_v49 }
 0x142   :  { %471 = vmatmul.mubr.msk.bf16.vlgmr.msra.gmra.mrb[0].mxu0 %vm30_vm0, %v91_v51 }
 0x143   :  { %201 = vmatprep.mubr.bf16.mxu0 %v565_v29 }
 0x14a   :  { %472 = vmatmul.mubr.msk.bf16.gmra.mrb[4].mxu0 %vm30_vm0, %v92_v54 }
 0x215   :  { %v193_v17 = vpop.f32.mrb[0].mxu0 }
 0x216   :  { %v194_v18 = vadd.f32 %v193_v17, %v106_v15  ;;  %v195_v19 = vpop.f32.mrb[1].mxu0 }
 0x217   :  { %v196_v20 = vadd.f32 %v195_v19, %v110_v16  ;;  %v197_v21 = vpop.f32.mrb[2].mxu0 }
 0x218   :  { %v216_v22 = vmul.f32 0.044715, %v194_v18  ;;  %v198_v23 = vadd.f32 %v197_v21, %v106_v15  ;;  %v199_v24 = vpop.f32.mrb[3].mxu0  ;;  %v210_v6 = vmul.f32 0.5, %v194_v18 }
 0x219   :  { %v217_v25 = vmul.f32 0.044715, %v196_v20  ;;  %v200_v26 = vadd.f32 %v199_v24, %v110_v16  ;;  %v211_v9 = vmul.f32 0.5, %v196_v20 }
 0x21a   :  { %v222_v27 = vmul.f32 %v216_v22, %v194_v18  ;;  %v218_v28 = vmul.f32 0.044715, %v198_v23  ;;  %v212_v7 = vmul.f32 0.5, %v198_v23 }
 0x21b   :  { %v219_v29 = vmul.f32 0.044715, %v200_v26  ;;  %v223_v30 = vmul.f32 %v217_v25, %v196_v20  ;;  %v213_v10 = vmul.f32 0.5, %v200_v26 }
 0x21c   :  { %v228_v31 = vmul.f32 %v222_v27, %v194_v18  ;;  %v224_v32 = vmul.f32 %v218_v28, %v198_v23 }
 0x21d   :  { %v203_v33 = vpop.f32.mrb[4].mxu0  ;;  %v225_v34 = vmul.f32 %v219_v29, %v200_v26  ;;  %v229_v35 = vmul.f32 %v223_v30, %v196_v20  ;;  %v473_v29 = vld [vmem:[%s740_s6] ss:$0 sm:$0xff] }
 0x21e   :  { %v230_v36 = vmul.f32 %v224_v32, %v198_v23  ;;  %v204_v37 = vadd.f32 %v203_v33, %v106_v15  ;;  %v205_v38 = vpop.f32.mrb[5].mxu0  ;;  %v234_v39 = vadd.f32 %v228_v31, %v194_v18 }
 0x21f   :  { %v206_v40 = vadd.f32 %v205_v38, %v110_v16  ;;  %v207_v41 = vpop.f32.mrb[6].mxu0  ;;  %v231_v42 = vmul.f32 %v225_v34, %v200_v26  ;;  %v235_v43 = vadd.f32 %v229_v35, %v196_v20 }
 0x220   :  { %v220_v44 = vmul.f32 0.044715, %v204_v37  ;;  %v208_v45 = vpop.f32.mrb[7].mxu0  ;;  %v236_v46 = vadd.f32 %v230_v36, %v198_v23  ;;  %v240_v47 = vmul.f32 0.7978846, %v234_v39  ;;  %v214_v27 = vmul.f32 0.5, %v204_v37 }
 0x221   :  { %v221_v48 = vmul.f32 0.044715, %v206_v40  ;;  %v237_v49 = vadd.f32 %v231_v42, %v200_v26  ;;  %v241_v50 = vmul.f32 0.7978846, %v235_v43  ;;  %v215_v24 = vmul.f32 0.5, %v206_v40 }
 0x222   :  { %v226_v51 = vmul.f32 %v220_v44, %v204_v37  ;;  %v242_v52 = vmul.f32 0.7978846, %v236_v46  ;;  %553 = vtanh.f32 %v240_v47 }
 0x223   :  { %v227_v53 = vmul.f32 %v221_v48, %v206_v40  ;;  %v243_v54 = vmul.f32 0.7978846, %v237_v49  ;;  %555 = vtanh.f32 %v241_v50 }
 0x224   :  { %557 = vtanh.f32 %v242_v52  ;;  %v232_v55 = vmul.f32 %v226_v51, %v204_v37 }
 0x225   :  { %559 = vtanh.f32 %v243_v54  ;;  %v233_v56 = vmul.f32 %v227_v53, %v206_v40 }
 0x226   :  { %v238_v57 = vadd.f32 %v232_v55, %v204_v37 }
 0x227   :  { %v239_v58 = vadd.f32 %v233_v56, %v206_v40 }
 0x228   :  { %v244_v59 = vmul.f32 0.7978846, %v238_v57 }
 0x229   :  { %v245_v60 = vmul.f32 0.7978846, %v239_v58 }
 0x22a   :  { %561 = vtanh.f32 %v244_v59 }
 0x22b   :  { %563 = vtanh.f32 %v245_v60 }
 0x22c   :  { %v554_v61 = vpop.eup %553 }
 0x22d   :  { %v556_v62 = vpop.eup %555  ;;  %v252_v63 = vadd.f32 1.0, %v554_v61 }
 0x22e   :  { %v558_v3 = vpop.eup %557  ;;  %v253_v4 = vadd.f32 1.0, %v556_v62 }
 0x22f   :  { %v560_v5 = vpop.eup %559  ;;  %v254_v8 = vadd.f32 1.0, %v558_v3  ;;  %v258_v12 = vmul.f32 %v252_v63, %v210_v6 }
 0x230   :  { %v255_v11 = vadd.f32 1.0, %v560_v5  ;;  %v259_v14 = vmul.f32 %v253_v4, %v211_v9 }
 0x231   :  { %v260_v13 = vmul.f32 %v254_v8, %v212_v7 }
 0x232   :  { %v261_v15 = vmul.f32 %v255_v11, %v213_v10 }
 0x233   :  { %v264_v16 = vpack.c.bf16 %v260_v13, %v258_v12 }
 0x234   :  { %v562_v17 = vpop.eup %561  ;;  %v265_v19 = vpack.c.bf16 %v261_v15, %v259_v14 }
 0x235   :  { %v564_v21 = vpop.eup %563  ;;  %v256_v22 = vadd.f32 1.0, %v562_v17 }
 0x236   :  { %435 = vmatprep.mubr.bf16.mxu1 %v265_v19  ;;  %v257_v25 = vadd.f32 1.0, %v564_v21 }
 0x237   :  { %436 = vmatmul.mubr.bf16.vlgmr.msra.gmra.mrb[0].mxu1 %v264_v16  ;;  %v262_v23 = vmul.f32 %v256_v22, %v214_v27 }
 0x238   :  { %v263_v18 = vmul.f32 %v257_v25, %v215_v24 }
 0x239   :  { %v266_v20 = vpack.c.bf16 %v262_v23, %v262_v23 }
 0x23a   :  { %v267_v28 = vpack.c.bf16 %v263_v18, %v263_v18 }
 0x23c   :  { %443 = vmatprep.mubr.bf16.mxu1 %v267_v28 }
 0x23f   :  { %444 = vmatmul.mubr.bf16.gmra.mrb[4].mxu1 %v266_v20 }
 0x30a   :  { %v506_v26 = vpop.f32.mrb[0].mxu1 }
 0x30b   :  { %v507_v30 = vpop.f32.mrb[1].mxu1 }
 0x30c   :  { %v508_v31 = vadd.f32 %v507_v30, %v506_v26  ;;  %v509_v32 = vpop.f32.mrb[2].mxu1 }
 0x30d   :  { %v510_v33 = vpop.f32.mrb[3].mxu1 }
 0x30e   :  { %v438_v34 = vadd.f32 %v508_v31, %v473_v29  ;;  %v511_v35 = vadd.f32 %v510_v33, %v509_v32 }
 0x310   :  { %v451_v36 = vadd.f32 %v438_v34, %v609_v0  ;;  %v441_v37 = vadd.f32 %v511_v35, %v473_v29 }
 0x312   :  { %454 = vst.msk [vmem:[%s741_s7] sm:$0xff] %vm30_vm0, %v451_v36  ;;  %v452_v38 = vadd.f32 %v441_v37, %v619_v2  ;;  %v512_v39 = vpop.f32.mrb[4].mxu1 }
 0x313   :  { %v513_v40 = vpop.f32.mrb[5].mxu1 }
 0x314   :  { %455 = vst.msk [vmem:[%s741_s7 + $0x8] sm:$0xff] %vm30_vm0, %v452_v38  ;;  %v514_v41 = vadd.f32 %v513_v40, %v512_v39  ;;  %v515_v42 = vpop.f32.mrb[6].mxu1 }
 0x315   :  { %v516_v43 = vpop.f32.mrb[7].mxu1 }
 0x316   :  { %v446_v44 = vadd.f32 %v514_v41, %v473_v29 }
 0x318   :  { %v453_v0 = vadd.f32 %v446_v44, %v614_v1 }
 0x31a   :  { %456 = vst.msk [vmem:[%s741_s7 + $0x10] sm:$0xff] %vm30_vm0, %v453_v0 }

// kernel: _lambda_.30
= control target key start
LH: loop header
LB: loop body
LE: loop exit
PB: predicated region body
PF: predicated region fallthrough
CT: control target
= control target key end

     0   :  { %vm24_vm0 = vcmask 523264   ;;  %s301_s0 = inlined_call_operand.vmem [shape: f32[24,64], index: 0, kind: input, shape index: {}]   ;;  %s302_s3 = inlined_call_operand.vmem [shape: bf16[64,128], index: 3, kind: input, shape index: {}]   ;;  %s303_s1 = inlined_call_operand.vmem [shape: f32[1,64], index: 1, kind: input, shape index: {}]   ;;  %s304_s2 = inlined_call_operand.vmem [shape: f32[1,64], index: 2, kind: input, shape index: {}]   ;;  %s305_s4 = inlined_call_operand.vmem [shape: f32[1,128], index: 4, kind: input, shape index: {}]   ;;  %s306_s5 = inlined_call_operand.vmem [shape: f32[24,128], index: 5, kind: output, shape index: {}]  }
   0x1   :  { %v21_v0 = vld [vmem:[%s301_s0] sm:$0xff]  ;;  %v23_v1 = vld [vmem:[%s301_s0 + $0x10] sm:$0xff]  ;;  %v22_v2 = vld [vmem:[%s301_s0 + $0x8] sm:$0xff] }
   0x2   :  { %v25_v3 = vsel %vm24_vm0, %v21_v0, 0.0  ;;  %v31_v4 = vsel %vm24_vm0, %v23_v1, 0.0  ;;  %v28_v5 = vsel %vm24_vm0, %v22_v2, 0.0  ;;  %v214_v21 = vld [vmem:[%s302_s3] sm:$0xff]   ;;  %v215_v22 = vld [vmem:[%s302_s3 + $0x8] sm:$0xff]   ;;  %v216_v23 = vld [vmem:[%s302_s3 + $0x10] sm:$0xff]  }
   0x3   :  { %26 = vadd.xlane.f32.xlu0 %v25_v3  ;;  %32 = vadd.xlane.f32.xlu1 %v31_v4  ;;  %v217_v24 = vld [vmem:[%s302_s3 + $0x18] sm:$0xff]   ;;  %v187_v36 = vld [vmem:[%s303_s1] ss:$0 sm:$0xff] }
   0x4   :  { %202 = vmatprep.subr.bf16.mxu0 %v214_v21  ;;  %v188_v42 = vld [vmem:[%s304_s2] ss:$0 sm:$0xff] }
   0x5   :  { %203 = vmatpush3.bf16.msra.mxu0 %v214_v21  ;;  %v189_v50 = vld [vmem:[%s305_s4] ss:$0 sm:$0xff] }
   0x6   :  { %204 = vmatprep.subr.bf16.mxu0 %v215_v22 }
   0x7   :  { %29 = vadd.xlane.f32.xlu0 %v28_v5 }
   0x9   :  { %205 = vmatpush3.bf16.msra.mxu0 %v215_v22 }
   0xa   :  { %206 = vmatprep.subr.bf16.mxu0 %v216_v23 }
   0xd   :  { %207 = vmatpush3.bf16.msra.mxu0 %v216_v23 }
   0xe   :  { %208 = vmatprep.subr.bf16.mxu0 %v217_v24 }
  0x11   :  { %209 = vmatpush3.bf16.msra.mxu0 %v217_v24 }
  0x90   :  { %v27_v6 = vpop.xlane.xlu0 %26  ;;  %v33_v7 = vpop.xlane.xlu1 %32 }
  0x91   :  { %v35_v8 = vmul.f32 0.015625, %v27_v6  ;;  %v37_v9 = vmul.f32 0.015625, %v33_v7 }
  0x93   :  { %v38_v10 = vsub.f32 %v21_v0, %v35_v8  ;;  %v40_v11 = vsub.f32 %v23_v1, %v37_v9 }
  0x94   :  { %v30_v12 = vpop.xlane.xlu0 %29 }
  0x95   :  { %v36_v13 = vmul.f32 0.015625, %v30_v12  ;;  %v41_v14 = vmul.f32 %v38_v10, %v38_v10  ;;  %v43_v15 = vmul.f32 %v40_v11, %v40_v11 }
  0x97   :  { %v39_v16 = vsub.f32 %v22_v2, %v36_v13  ;;  %v44_v17 = vsel %vm24_vm0, %v41_v14, 0.0  ;;  %v50_v18 = vsel %vm24_vm0, %v43_v15, 0.0 }
  0x98   :  { %45 = vadd.xlane.f32.xlu1 %v44_v17 }
  0x99   :  { %v42_v19 = vmul.f32 %v39_v16, %v39_v16 }
  0x9b   :  { %v47_v20 = vsel %vm24_vm0, %v42_v19, 0.0 }
  0x9c   :  { %51 = vadd.xlane.f32.xlu1 %v50_v18  ;;  %48 = vadd.xlane.f32.xlu0 %v47_v20 }
 0x125   :  { %v46_v25 = vpop.xlane.xlu1 %45 }
 0x126   :  { %v53_v26 = vmul.f32 0.015625, %v46_v25 }
 0x128   :  { %v56_v27 = vadd.f32 1e-05, %v53_v26 }
 0x129   :  { %v52_v28 = vpop.xlane.xlu1 %51  ;;  %v49_v29 = vpop.xlane.xlu0 %48 }
 0x12a   :  { %218 = vrsqrt.f32 %v56_v27  ;;  %v55_v30 = vmul.f32 0.015625, %v52_v28  ;;  %v54_v31 = vmul.f32 0.015625, %v49_v29 }
 0x12c   :  { %v58_v32 = vadd.f32 1e-05, %v55_v30  ;;  %v57_v33 = vadd.f32 1e-05, %v54_v31 }
 0x12e   :  { %220 = vrsqrt.f32 %v58_v32 }
 0x12f   :  { %222 = vrsqrt.f32 %v57_v33 }
 0x134   :  { %v219_v34 = vpop.eup %218 }
 0x135   :  { %v62_v35 = vmul.f32 %v219_v34, %v38_v10 }
 0x137   :  { %v72_v41 = vmul.f32 %v187_v36, %v62_v35 }
 0x138   :  { %v221_v37 = vpop.eup %220 }
 0x139   :  { %v223_v38 = vpop.eup %222  ;;  %v64_v39 = vmul.f32 %v221_v37, %v40_v11  ;;  %v82_v46 = vadd.f32 %v188_v42, %v72_v41 }
 0x13a   :  { %v63_v40 = vmul.f32 %v223_v38, %v39_v16 }
 0x13b   :  { %v74_v43 = vmul.f32 %v187_v36, %v64_v39 }
 0x13c   :  { %v73_v44 = vmul.f32 %v187_v36, %v63_v40 }
 0x13d   :  { %v84_v45 = vadd.f32 %v188_v42, %v74_v43 }
 0x13e   :  { %v83_v47 = vadd.f32 %v188_v42, %v73_v44 }
 0x13f   :  { %v86_v48 = vpack.c.bf16 %v84_v45, %v84_v45 }
 0x140   :  { %v85_v49 = vpack.c.bf16 %v83_v47, %v82_v46 }
 0x142   :  { %210 = vmatprep.mubr.msk.bf16.mxu0 %vm24_vm0, %v85_v49 }
 0x143   :  { %211 = vmatmul.mubr.msk.bf16.vlgmr.msra.gmra.mrb[0].mxu0 %vm24_vm0, %v86_v48 }
 0x216   :  { %v212_v51 = vpop.f32.mrb[0].mxu0 }
 0x217   :  { %v175_v52 = vadd.f32 %v212_v51, %v189_v50  ;;  %v166_v53 = vpop.f32.mrb[1].mxu0 }
 0x218   :  { %v167_v54 = vadd.f32 %v189_v50, %v166_v53  ;;  %v213_v55 = vpop.f32.mrb[2].mxu0 }
 0x219   :  { %182 = vst [vmem:[%s306_s5 + $0x10] sm:$0xff] %v175_v52  ;;  %v169_v56 = vpop.f32.mrb[3].mxu0 }
 0x21a   :  { %180 = vst [vmem:[%s306_s5] sm:$0xff] %v167_v54  ;;  %v170_v57 = vadd.f32 %v189_v50, %v169_v56 }
 0x21c   :  { %181 = vst [vmem:[%s306_s5 + $0x8] sm:$0xff] %v170_v57 }

// kernel: _lambda_.31
= control target key start
LH: loop header
LB: loop body
LE: loop exit
PB: predicated region body
PF: predicated region fallthrough
CT: control target
= control target key end

     0   :  { %v20_v0 = vlaneseq  ;;  %v205_v8 = vmov 0   ;;  %v206_v30 = vmov 0.0   ;;  %vm98_vm5 = vcmask 7168   ;;  %s359_s0 = inlined_call_operand.vmem [shape: f32[24,128], index: 0, kind: input, shape index: {}]   ;;  %s360_s1 = inlined_call_operand.vmem [shape: s32[24,1], index: 1, kind: input, shape index: {}]   ;;  %s361_s3 = inlined_call_operand.vmem [shape: f32[24,1], index: 3, kind: output, shape index: {1}]   ;;  %s362_s2 = inlined_call_operand.vmem [shape: f32[24,1], index: 2, kind: output, shape index: {0}]   ;;  %s363_s4 = inlined_call_operand.vmem [shape: f32[24,1], index: 4, kind: output, shape index: {2}]  }
   0x1   :  { %v14_v1 = vld [vmem:[%s359_s0] sm:$0xff]  ;;  %v16_v3 = vld [vmem:[%s359_s0 + $0x10] sm:$0xff]  ;;  %v15_v4 = vld [vmem:[%s359_s0 + $0x8] sm:$0xff]  ;;  %192 = vset.pattern.permute.xlu1 %v205_v8  ;;  %191 = vset.pattern.permute.xlu0 %v205_v8 }
   0x2   :  { %v235_v2 = vand.u32 127, %v20_v0  ;;  %v262_v17 = vld [vmem:[%s360_s1 + $0x8] sm:$0xff]  ;;  %v268_v18 = vld [vmem:[%s360_s1] sm:$0xff]  ;;  %v280_v26 = vld [vmem:[%s360_s1 + $0x10] sm:$0xff] }
   0x3   :  { %vm84_vm4 = vcmp.ge.s32.totalorder %v262_v17, 0  ;;  %vm83_vm9 = vcmp.ge.s32.totalorder %v268_v18, 0  ;;  %vm85_vm13 = vcmp.ge.s32.totalorder %v280_v26, 0 }
   0x4   :  { %vm22_vm0 = vcmp.lt.s32.totalorder %v235_v2, 96  ;;  %v287_v31 = vsel %vm84_vm4, 1.0, %v206_v30  ;;  %v183_v48 = vsel %vm83_vm9, 1.0, %v206_v30  ;;  %v185_v57 = vsel %vm85_vm13, 1.0, %v206_v30 }
   0x5   :  { %v244_v5 = vsel %vm22_vm0, %v14_v1, -1e+30  ;;  %v246_v6 = vsel %vm22_vm0, %v16_v3, -1e+30  ;;  %v24_v7 = vsel %vm22_vm0, %v15_v4, -1e+30 }
   0x6   :  { %44 = vmax.xlane.f32.xlu0 %v244_v5  ;;  %48 = vmax.xlane.f32.xlu1 %v246_v6  ;;  %103 = vst.msk [vmem:[%s361_s3 + $0x8] sm:$0xff] %vm98_vm5, %v287_v31  ;;  %102 = vst.msk [vmem:[%s361_s3] sm:$0xff] %vm98_vm5, %v183_v48 }
   0x7   :  { %104 = vst.msk [vmem:[%s361_s3 + $0x10] sm:$0xff] %vm98_vm5, %v185_v57 }
   0xa   :  { %46 = vmax.xlane.f32.xlu0 %v24_v7 }
  0x93   :  { %v250_v9 = vpop.xlane.xlu0 %44  ;;  %v271_v19 = vpop.xlane.xlu1 %48 }
  0x94   :  { %vm105_vm1 = vcmp.eq.f32.partialorder %v244_v5, %v250_v9  ;;  %vm107_vm3 = vcmp.eq.f32.partialorder %v246_v6, %v271_v19  ;;  %v50_v27 = vsub.f32 %v244_v5, %v250_v9  ;;  %v52_v33 = vsub.f32 %v246_v6, %v271_v19 }
  0x95   :  { %v108_v10 = vsel %vm105_vm1, %v235_v2, 128  ;;  %v110_v22 = vsel %vm107_vm3, %v235_v2, 128 }
  0x96   :  { %v112_v11 = vshra.s32 %v108_v10, 16  ;;  %v140_v23 = vshra.s32 %v110_v22, 16  ;;  %v53_v28 = vmul.f32 1.442695, %v50_v27  ;;  %v57_v35 = vmul.f32 1.442695, %v52_v33 }
  0x97   :  { %v255_v12 = vpop.xlane.xlu0 %46  ;;  %v111_v42 = vand.u32 65535, %v108_v10  ;;  %v139_v50 = vand.u32 65535, %v110_v22 }
  0x98   :  { %vm106_vm2 = vcmp.eq.f32.partialorder %v24_v7, %v255_v12  ;;  %v114_v13 = vcvt.s32.f32 %v112_v11  ;;  %v51_v20 = vsub.f32 %v24_v7, %v255_v12  ;;  %v142_v24 = vcvt.s32.f32 %v140_v23 }
  0x99   :  { %v109_v14 = vsel %vm106_vm2, %v235_v2, 128  ;;  %v113_v44 = vcvt.s32.f32 %v111_v42  ;;  %v141_v52 = vcvt.s32.f32 %v139_v50 }
  0x9a   :  { %115 = vmin.xlane.f32.xlu1 %v114_v13  ;;  %v126_v15 = vshra.s32 %v109_v14, 16  ;;  %v55_v21 = vmul.f32 1.442695, %v51_v20  ;;  %v125_v45 = vand.u32 65535, %v109_v14 }
  0x9c   :  { %v128_v16 = vcvt.s32.f32 %v126_v15  ;;  %193 = vpow2.f32 %v55_v21  ;;  %v127_v47 = vcvt.s32.f32 %v125_v45 }
  0x9d   :  { %195 = vpow2.f32 %v53_v28 }
  0x9e   :  { %129 = vmin.xlane.f32.xlu0 %v128_v16  ;;  %197 = vpow2.f32 %v57_v35 }
  0xa6   :  { %v194_v25 = vpop.eup %193 }
  0xa7   :  { %v196_v29 = vpop.eup %195 }
  0xa8   :  { %v198_v43 = vpop.eup %197 }
  0xab   :  { %30 = vperm.xlu1 %192, %v262_v17  }
  0xb4   :  { %27 = vperm.xlu0 %191, %v268_v18  }
  0xcf   :  { %143 = vmin.xlane.f32.xlu1 %v142_v24 }
  0xd3   :  { %61 = vadd.xlane.f32.xlu0 %v194_v25 }
  0xe0   :  { %33 = vperm.xlu1 %192, %v280_v26  }
 0x104   :  { %59 = vadd.xlane.f32.xlu1 %v196_v29 }
 0x127   :  { %v294_v32 = vpop.xlane.xlu1 %115 }
 0x128   :  { %vm117_vm8 = vcmp.eq.f32.partialorder %v114_v13, %v294_v32  ;;  %v122_v10 = vcvt.f32.s32 %v294_v32 }
 0x129   :  { %v118_v46 = vsel %vm117_vm8, %v113_v44, inf }
 0x12b   :  { %v31_v34 = vpop.permute.xlu1 %30  ;;  %v300_v38 = vpop.xlane.xlu0 %129 }
 0x12c   :  { %vm36_vm6 = vcmp.eq.s32.totalorder %v235_v2, %v31_v34  ;;  %vm131_vm10 = vcmp.eq.f32.partialorder %v128_v16, %v300_v38  ;;  %v136_v13 = vcvt.f32.s32 %v300_v38 }
 0x12d   :  { %v181_v36 = vsel %vm36_vm6, 1.0, %v206_v30  ;;  %v132_v49 = vsel %vm131_vm10, %v127_v47, inf }
 0x12e   :  { %v75_v37 = vmul.f32 %v181_v36, %v24_v7  ;;  %v137_v20 = vshll.u32 %v136_v13, 16 }
 0x130   :  { %79 = vadd.xlane.f32.xlu0 %v75_v37 }
 0x133   :  { %v28_v39 = vpop.permute.xlu0 %27 }
 0x134   :  { %vm35_vm7 = vcmp.eq.s32.totalorder %v235_v2, %v28_v39 }
 0x135   :  { %v180_v40 = vsel %vm35_vm7, 1.0, %v206_v30 }
 0x136   :  { %v74_v41 = vmul.f32 %v180_v40, %v244_v5 }
 0x138   :  { %77 = vadd.xlane.f32.xlu1 %v74_v41 }
 0x13c   :  { %63 = vadd.xlane.f32.xlu1 %v198_v43 }
 0x140   :  { %119 = vmin.xlane.f32.xlu1 %v118_v46 }
 0x144   :  { %133 = vmin.xlane.f32.xlu1 %v132_v49 }
 0x15c   :  { %v144_v51 = vpop.xlane.xlu1 %143 }
 0x15d   :  { %vm145_vm11 = vcmp.eq.f32.partialorder %v142_v24, %v144_v51 }
 0x15e   :  { %v146_v53 = vsel %vm145_vm11, %v141_v52, inf }
 0x15f   :  { %147 = vmin.xlane.f32.xlu1 %v146_v53 }
 0x160   :  { %v34_v54 = vpop.permute.xlu1 %33  ;;  %v62_v58 = vpop.xlane.xlu0 %61 }
 0x161   :  { %vm37_vm12 = vcmp.eq.s32.totalorder %v235_v2, %v34_v54  ;;  %199 = vlog2.f32 %v62_v58 }
 0x162   :  { %v182_v55 = vsel %vm37_vm12, 1.0, %v206_v30 }
 0x163   :  { %v76_v56 = vmul.f32 %v182_v55, %v246_v6 }
 0x165   :  { %81 = vadd.xlane.f32.xlu1 %v76_v56 }
 0x16b   :  { %v200_v60 = vpop.eup %199 }
 0x16c   :  { %v68_v61 = vmul.f32 0.6931472, %v200_v60 }
 0x16e   :  { %v72_v62 = vadd.f32 %v68_v61, %v255_v12  ;;  %v123_v12 = vshll.u32 %v122_v10, 16 }
 0x191   :  { %v60_v59 = vpop.xlane.xlu1 %59 }
 0x192   :  { %201 = vlog2.f32 %v60_v59 }
 0x19c   :  { %v202_v63 = vpop.eup %201 }
 0x19d   :  { %v66_v2 = vmul.f32 0.6931472, %v202_v63 }
 0x19f   :  { %v71_v4 = vadd.f32 %v66_v2, %v250_v9 }
 0x1bd   :  { %v80_v0 = vpop.xlane.xlu0 %79 }
 0x1be   :  { %v93_v1 = vsub.f32 %v72_v62, %v80_v0 }
 0x1c0   :  { %v96_v3 = vmul.f32 %v287_v31, %v93_v1 }
 0x1c2   :  { %100 = vst.msk [vmem:[%s362_s2 + $0x8] sm:$0xff] %vm98_vm5, %v96_v3 }
 0x1c5   :  { %v78_v5 = vpop.xlane.xlu1 %77 }
 0x1c6   :  { %v92_v6 = vsub.f32 %v71_v4, %v78_v5 }
 0x1c8   :  { %v95_v7 = vmul.f32 %v183_v48, %v92_v6 }
 0x1c9   :  { %v64_v8 = vpop.xlane.xlu1 %63 }
 0x1ca   :  { %99 = vst.msk [vmem:[%s362_s2] sm:$0xff] %vm98_vm5, %v95_v7  ;;  %203 = vlog2.f32 %v64_v8 }
 0x1cd   :  { %v120_v11 = vpop.xlane.xlu1 %119 }
 0x1ce   :  { %v121_v14 = vcvt.f32.s32 %v120_v11 }
 0x1d0   :  { %v124_v15 = vadd.s32 %v123_v12, %v121_v14 }
 0x1d1   :  { %v134_v16 = vpop.xlane.xlu1 %133 }
 0x1d2   :  { %vm153_vm14 = vcmp.eq.s32.totalorder %v124_v15, %v268_v18  ;;  %v135_v9 = vcvt.f32.s32 %v134_v16  ;;  %v150_v18 = vcvt.f32.s32 %v144_v51 }
 0x1d3   :  { %v186_v21 = vsel %vm153_vm14, 1.0, %v206_v30 }
 0x1d4   :  { %v162_v22 = vmul.f32 %v186_v21, %v183_v48  ;;  %v138_v23 = vadd.s32 %v137_v20, %v135_v9  ;;  %v204_v27 = vpop.eup %203  ;;  %v151_v29 = vshll.u32 %v150_v18, 16 }
 0x1d5   :  { %v70_v32 = vmul.f32 0.6931472, %v204_v27 }
 0x1d6   :  { %165 = vst.msk [vmem:[%s363_s4] sm:$0xff] %vm98_vm5, %v162_v22  ;;  %vm154_vm15 = vcmp.eq.s32.totalorder %v138_v23, %v262_v17 }
 0x1d7   :  { %v187_v24 = vsel %vm154_vm15, 1.0, %v206_v30  ;;  %v73_v17 = vadd.f32 %v70_v32, %v271_v19 }
 0x1d8   :  { %v163_v25 = vmul.f32 %v187_v24, %v287_v31 }
 0x1da   :  { %166 = vst.msk [vmem:[%s363_s4 + $0x8] sm:$0xff] %vm98_vm5, %v163_v25 }
 0x1ec   :  { %v148_v28 = vpop.xlane.xlu1 %147 }
 0x1ed   :  { %v149_v33 = vcvt.f32.s32 %v148_v28 }
 0x1ef   :  { %v152_v34 = vadd.s32 %v151_v29, %v149_v33 }
 0x1f1   :  { %vm155_vm0 = vcmp.eq.s32.totalorder %v152_v34, %v280_v26 }
 0x1f2   :  { %v188_v35 = vsel %vm155_vm0, 1.0, %v206_v30  ;;  %v82_v31 = vpop.xlane.xlu1 %81 }
 0x1f3   :  { %v164_v36 = vmul.f32 %v188_v35, %v185_v57  ;;  %v94_v37 = vsub.f32 %v73_v17, %v82_v31 }
 0x1f5   :  { %167 = vst.msk [vmem:[%s363_s4 + $0x10] sm:$0xff] %vm98_vm5, %v164_v36  ;;  %v97_v38 = vmul.f32 %v185_v57, %v94_v37 }
 0x1f7   :  { %101 = vst.msk [vmem:[%s362_s2 + $0x10] sm:$0xff] %vm98_vm5, %v97_v38 }

</bundles_post_ra>
